<compile_context>
chip_gen: v5e
topology: v5e:2x2
jax: 0.10.0
libtpu: 0.0.40
codegen_flags: <defaults>
</compile_context>

<pallas_src>
import functools

import jax
import jax.numpy as jnp
from jax.experimental import pallas as pl
from jax.experimental.pallas import tpu as pltpu


def _gelu_exact(x):
    # nn.GELU() default (approximate='none'): 0.5*x*(1+erf(x/sqrt(2)))
    return 0.5 * x * (1.0 + jax.lax.erf(x * jnp.float32(0.7071067811865476)))


def seg_encoder_kernel(xpad_ref, wf_ref, w4_ref, b_ref, out_ref, cols_ref, *,
                       TH, W, Cin, Cout, KP):
    """Grid = (batch, row-tile).

    xpad_ref : (1, H+4, W+4, Cin) bf16  spatially padded input (resident per batch)
    wf_ref   : (KP, 3*Cout)       bf16  BN-folded, tap-embedded conv1/2/3 weights
                                        (rows >= 25*Cin are zero padding)
    w4_ref   : (3*Cout, Cout)     bf16  fusing 1x1 conv weight (no lane padding)
    b_ref    : (1, 4*Cout)        f32   [b1|b2|b3 folded | b4]
    out_ref  : (1, TH*W, Cout)    f32   packed output rows (no lane padding to HBM)
    cols_ref : (TH*W, KP)         bf16  VMEM scratch for the im2col slab
    """
    thw = TH * W
    K = 25 * Cin
    r0 = pl.multiple_of(pl.program_id(1) * TH, TH)     # first output row of this tile

    # Zero the K-padding lanes so the zero-weight pad rows of wf cannot pick up
    # NaN/Inf garbage from uninitialized scratch (0 * NaN = NaN).
    if KP > K:
        cols_ref[:, K:] = jnp.zeros((thw, KP - K), cols_ref.dtype)

    # Row slab needed for this tile (2-pixel halo on each side): (TH+4, W+4, Cin).
    xs = xpad_ref[0, pl.ds(r0, TH + 4), :, :]

    # im2col into the lane-padded bf16 scratch: tap-major, channel-minor columns,
    # matching the row order of wf = (5,5,Cin,3*Cout).reshape(25*Cin, 3*Cout).
    for dy in range(5):
        for dx in range(5):
            t = dy * 5 + dx
            win = xs[dy:dy + TH, dx:dx + W, :]                      # (TH, W, Cin)
            cols_ref[:, t * Cin:(t + 1) * Cin] = win.reshape(thw, Cin)

    # conv1x1 + conv3x3 + conv5x5 with BatchNorm folded in: ONE MXU matmul whose
    # output columns are already in torch.cat([x1, x2, x3], C) order.
    a = jnp.dot(cols_ref[...], wf_ref[...], preferred_element_type=jnp.float32)
    x123 = _gelu_exact(a + b_ref[:, :3 * Cout])                     # (THW, 3*Cout) f32

    # Fusing 1x1 conv; store only the real Cout channels (no writeback amplification).
    n = jnp.dot(x123.astype(w4_ref.dtype), w4_ref[...],
                preferred_element_type=jnp.float32) + b_ref[:, 3 * Cout:]
    out_ref[...] = n.reshape(1, thw, Cout)                          # (1, THW, Cout)


def _fold_and_fuse_params(params, Cin, Cout, KP, eps=1e-5):
    """Wrapper-side (one-time) BN folding + branch fusion + K padding + bf16 cast."""

    def bn_affine(gamma, beta, mean, var):
        s = gamma / jnp.sqrt(var + eps)
        return s, beta - mean * s

    s1, t1 = bn_affine(*params["bn1"])
    s2, t2 = bn_affine(*params["bn2"])
    s3, t3 = bn_affine(*params["bn3"])

    w1f = params["w1"] * s1                        # (Cin, Cout)
    w2f = params["w2"] * s2                        # (9, Cin, Cout)
    w3f = params["w3"] * s3                        # (25, Cin, Cout)
    b1f = params["b1"] * s1 + t1
    b2f = params["b2"] * s2 + t2
    b3f = params["b3"] * s3 + t3

    # Zero-embed the 1x1 weight at tap (2,2) and the 3x3 weights at taps (1..3,1..3)
    # of the 5x5 tap grid; output-channel blocks in [x1 | x2 | x3] order.
    wf = jnp.zeros((5, 5, Cin, 3 * Cout), jnp.float32)
    wf = wf.at[2, 2, :, 0:Cout].set(w1f)
    wf = wf.at[1:4, 1:4, :, Cout:2 * Cout].set(w2f.reshape(3, 3, Cin, Cout))
    wf = wf.at[:, :, :, 2 * Cout:3 * Cout].set(w3f.reshape(5, 5, Cin, Cout))
    wf = wf.reshape(25 * Cin, 3 * Cout)

    # Pad K (rows) to a multiple of 128 with zeros so the MXU K feed is unmasked.
    wfp = jnp.zeros((KP, 3 * Cout), jnp.float32).at[:25 * Cin].set(wf)
    wfp = wfp.astype(jnp.bfloat16)

    w4 = params["w4"].astype(jnp.bfloat16)         # (3*Cout, Cout), no lane padding

    # Single packed bias vector: [b1 | b2 | b3 (folded) | b4], kept in f32.
    b_all = jnp.concatenate([b1f, b2f, b3f, params["b4"]]).reshape(1, 4 * Cout)
    return wfp, w4, b_all.astype(jnp.float32)


def _pick_row_tile(H, W, max_pixels=2048):
    """Largest divisor of H with TH*W <= max_pixels and sublane-friendly TH*W."""
    for th in range(H, 0, -1):
        if H % th == 0 and th * W <= max_pixels and (th * W) % 8 == 0:
            return th
    return H


def seg_encoder_pallas(seg_logits_nchw, params, row_tile=None):
    """seg_logits_nchw: (N, Cin, H, W) float32. Returns tuple of 4 NCHW arrays."""
    N, Cin, H, W = seg_logits_nchw.shape
    Cout = params["w1"].shape[-1]
    K = 25 * Cin
    KP = ((K + 127) // 128) * 128                  # K padded to a multiple of 128

    TH = _pick_row_tile(H, W) if row_tile is None else row_tile
    assert H % TH == 0, "row tile must divide H"
    assert (TH * W) % 8 == 0 or TH == H

    # NCHW -> NHWC, pad spatially by 2 (largest kernel needs pad=2), cast to bf16
    # (the MXU default path truncated to bf16 anyway; explicit bf16 halves DMA bytes).
    x = jnp.transpose(seg_logits_nchw, (0, 2, 3, 1)).astype(jnp.bfloat16)
    xpad = jnp.pad(x, ((0, 0), (2, 2), (2, 2), (0, 0)))
    # TODO(synk): at production sizes replace this padded HBM copy with an in-kernel
    # halo DMA (memory_space=pl.ANY + make_async_copy of TH+4 row slabs).

    wfp, w4, b_all = _fold_and_fuse_params(params, Cin, Cout, KP)

    kern = functools.partial(seg_encoder_kernel, TH=TH, W=W, Cin=Cin, Cout=Cout, KP=KP)
    out = pl.pallas_call(
        kern,
        grid=(N, H // TH),
        in_specs=[
            # Whole padded image per batch (Cin is small); same block index across the
            # row-tile axis => stays resident in VMEM, no re-DMA per row step.
            pl.BlockSpec((1, H + 4, W + 4, Cin), lambda b, r: (b, 0, 0, 0)),
            pl.BlockSpec((KP, 3 * Cout), lambda b, r: (0, 0)),
            pl.BlockSpec((3 * Cout, Cout), lambda b, r: (0, 0)),
            pl.BlockSpec((1, 4 * Cout), lambda b, r: (0, 0)),
        ],
        out_specs=pl.BlockSpec((1, TH * W, Cout), lambda b, r: (b, r, 0)),
        out_shape=jax.ShapeDtypeStruct((N, H * W, Cout), jnp.float32),
        scratch_shapes=[pltpu.VMEM((TH * W, KP), jnp.bfloat16)],   # im2col slab
        compiler_params=pltpu.CompilerParams(
            dimension_semantics=("parallel", "parallel"),
            vmem_limit_bytes=48 * 1024 * 1024),   # <= v7x's 64 MiB/TC; > v5e's 16 MiB default
    )(xpad, wfp, w4, b_all)

    # Layout plumbing only: (N, H*W, Cout) -> NHWC -> NCHW.
    n = out.reshape(N, H, W, Cout)
    n_nchw = jnp.transpose(n, (0, 3, 1, 2))
    return tuple(n_nchw for _ in range(4))


def seg_encoder_reference(seg_logits_nchw, params):
    """Pure-JAX (XLA conv, f32 HIGHEST precision) reference for validation."""
    N, Cin, H, W = seg_logits_nchw.shape
    Cout = params["w1"].shape[-1]
    eps = 1e-5
    x = jnp.transpose(seg_logits_nchw, (0, 2, 3, 1)).astype(jnp.float32)

    def conv(inp, w_hwio, b, pad):
        y = jax.lax.conv_general_dilated(
            inp, w_hwio, (1, 1), [(pad, pad), (pad, pad)],
            dimension_numbers=("NHWC", "HWIO", "NHWC"),
            precision=jax.lax.Precision.HIGHEST)
        return y + b

    def bn(y, gamma, beta, mean, var):
        return (y - mean) / jnp.sqrt(var + eps) * gamma + beta

    g = lambda v: jax.nn.gelu(v, approximate=False)
    x1 = g(bn(conv(x, params["w1"].reshape(1, 1, Cin, Cout), params["b1"], 0), *params["bn1"]))
    x2 = g(bn(conv(x, params["w2"].reshape(3, 3, Cin, Cout), params["b2"], 1), *params["bn2"]))
    x3 = g(bn(conv(x, params["w3"].reshape(5, 5, Cin, Cout), params["b3"], 2), *params["bn3"]))
    cat = jnp.concatenate([x1, x2, x3], axis=-1)
    n = conv(cat, params["w4"].reshape(1, 1, 3 * Cout, Cout), params["b4"], 0)
    return jnp.transpose(n, (0, 3, 1, 2))


def make_params(key, dim, out_dim):
    ks = jax.random.split(key, 14)
    f32 = jnp.float32
    params = {
        "w1": 0.1 * jax.random.normal(ks[0], (dim, out_dim), f32),
        "b1": 0.1 * jax.random.normal(ks[1], (out_dim,), f32),
        "w2": 0.1 * jax.random.normal(ks[2], (9, dim, out_dim), f32),
        "b2": 0.1 * jax.random.normal(ks[3], (out_dim,), f32),
        "w3": 0.1 * jax.random.normal(ks[4], (25, dim, out_dim), f32),
        "b3": 0.1 * jax.random.normal(ks[5], (out_dim,), f32),
        "w4": 0.1 * jax.random.normal(ks[6], (3 * out_dim, out_dim), f32),
        "b4": 0.1 * jax.random.normal(ks[7], (out_dim,), f32),
        # BatchNorm (gamma, beta, running_mean, running_var) per branch
        "bn1": (1.0 + 0.1 * jax.random.normal(ks[8], (out_dim,), f32),
                0.1 * jax.random.normal(ks[9], (out_dim,), f32),
                jnp.zeros((out_dim,), f32), jnp.ones((out_dim,), f32)),
        "bn2": (1.0 + 0.1 * jax.random.normal(ks[10], (out_dim,), f32),
                0.1 * jax.random.normal(ks[11], (out_dim,), f32),
                jnp.zeros((out_dim,), f32), jnp.ones((out_dim,), f32)),
        "bn3": (1.0 + 0.1 * jax.random.normal(ks[12], (out_dim,), f32),
                0.1 * jax.random.normal(ks[13], (out_dim,), f32),
                jnp.zeros((out_dim,), f32), jnp.ones((out_dim,), f32)),
    }
    return params


if __name__ == "__main__":
    dim, out_dim, p_drop = 4, 8, 0.1
    N, H, W = 2, 16, 16

    key = jax.random.PRNGKey(0)
    pkey, xkey = jax.random.split(key)
    params = make_params(pkey, dim, out_dim)
    seg_logits = jax.random.normal(xkey, (N, dim, H, W), jnp.float32)  # NCHW, like PyTorch

    ref = jax.block_until_ready(seg_encoder_reference(seg_logits, params))

    # Run both the multi-row-tile path (grid=(N, 2)) and the auto-picked tile.
    for rt in (8, None):
        outs = jax.block_until_ready(seg_encoder_pallas(seg_logits, params, row_tile=rt))
        assert len(outs) == 4
        # Kernel inputs/weights are bf16 with f32 MXU accumulation (same effective
        # precision as the previous default-precision dots); reference is f32 HIGHEST,
        # so tolerance stays at 2e-2.
        for o in outs:
            assert o.shape == (N, out_dim, H, W)
            assert jnp.allclose(o, ref, atol=2e-2, rtol=2e-2)

    print("KERNEL_OK")
</pallas_src>

<mosaic_0001>
module attributes {stable_mosaic.version = 11 : i64} {
  func.func @seg_encoder_kernel(%arg0: i32, %arg1: i32, %arg2: memref<1x20x20x4xbf16, #tpu.memory_space<vmem>>, %arg3: memref<128x24xbf16, #tpu.memory_space<vmem>>, %arg4: memref<24x8xbf16, #tpu.memory_space<vmem>>, %arg5: memref<1x32xf32, #tpu.memory_space<vmem>>, %arg6: memref<1x128x8xf32, #tpu.memory_space<vmem>>, %arg7: memref<128x128xbf16, #tpu.memory_space<vmem>>) attributes {dimension_semantics = [#tpu.dimension_semantics<parallel>, #tpu.dimension_semantics<parallel>], iteration_bounds = array<i64: 2, 2>, scalar_prefetch = 0 : i64, scratch_operands = 1 : i64, tpu.core_type = #tpu.core_type<tc>, window_params = [{transform_indices = @transform_0, window_bounds = array<i64: 1, 20, 20, 4>}, {pipeline_mode = #tpu.pipeline_mode<synchronous>, transform_indices = @transform_1, window_bounds = array<i64: 128, 24>}, {pipeline_mode = #tpu.pipeline_mode<synchronous>, transform_indices = @transform_2, window_bounds = array<i64: 24, 8>}, {pipeline_mode = #tpu.pipeline_mode<synchronous>, transform_indices = @transform_3, window_bounds = array<i64: 1, 32>}, {transform_indices = @transform_4, window_bounds = array<i64: 1, 128, 8>}]} {
    %c8_i32 = arith.constant 8 : i32
    %0 = arith.muli %arg1, %c8_i32 : i32
    %1 = tpu.assume_multiple %0, 8 : i32
    %cst = arith.constant 0.000000e+00 : bf16
    %2 = vector.broadcast %cst : bf16 to vector<128x28xbf16>
    %c0 = arith.constant 0 : index
    %c100 = arith.constant 100 : index
    %3 = vector.load %arg7[%c0, %c100] : memref<128x128xbf16, #tpu.memory_space<vmem>>, vector<128x28xbf16>
    tpu.vector_store %arg7[%c0, %c100], %2 {strides = array<i32>} : memref<128x128xbf16, #tpu.memory_space<vmem>>, vector<128x28xbf16>,
    %c0_0 = arith.constant 0 : index
    %4 = arith.index_cast %1 : i32 to index
    %c0_1 = arith.constant 0 : index
    %c0_2 = arith.constant 0 : index
    %5 = vector.load %arg2[%c0_0, %4, %c0_1, %c0_2] : memref<1x20x20x4xbf16, #tpu.memory_space<vmem>>, vector<1x12x20x4xbf16>
    %6 = vector.shape_cast %5 : vector<1x12x20x4xbf16> to vector<12x20x4xbf16>
    %7 = vector.extract_strided_slice %6 {offsets = [0, 0, 0], sizes = [8, 16, 4], strides = [1, 1, 1]} : vector<12x20x4xbf16> to vector<8x16x4xbf16>
    %8 = vector.shape_cast %7 : vector<8x16x4xbf16> to vector<128x4xbf16>
    %c0_3 = arith.constant 0 : index
    %c0_4 = arith.constant 0 : index
    %9 = vector.load %arg7[%c0_3, %c0_4] : memref<128x128xbf16, #tpu.memory_space<vmem>>, vector<128x4xbf16>
    tpu.vector_store %arg7[%c0_3, %c0_4], %8 {strides = array<i32>} : memref<128x128xbf16, #tpu.memory_space<vmem>>, vector<128x4xbf16>,
    %10 = vector.extract_strided_slice %6 {offsets = [0, 1, 0], sizes = [8, 16, 4], strides = [1, 1, 1]} : vector<12x20x4xbf16> to vector<8x16x4xbf16>
    %11 = vector.shape_cast %10 : vector<8x16x4xbf16> to vector<128x4xbf16>
    %c0_5 = arith.constant 0 : index
    %c4 = arith.constant 4 : index
    %12 = vector.load %arg7[%c0_5, %c4] : memref<128x128xbf16, #tpu.memory_space<vmem>>, vector<128x4xbf16>
    tpu.vector_store %arg7[%c0_5, %c4], %11 {strides = array<i32>} : memref<128x128xbf16, #tpu.memory_space<vmem>>, vector<128x4xbf16>,
    %13 = vector.extract_strided_slice %6 {offsets = [0, 2, 0], sizes = [8, 16, 4], strides = [1, 1, 1]} : vector<12x20x4xbf16> to vector<8x16x4xbf16>
    %14 = vector.shape_cast %13 : vector<8x16x4xbf16> to vector<128x4xbf16>
    %c0_6 = arith.constant 0 : index
    %c8 = arith.constant 8 : index
    %15 = vector.load %arg7[%c0_6, %c8] : memref<128x128xbf16, #tpu.memory_space<vmem>>, vector<128x4xbf16>
    tpu.vector_store %arg7[%c0_6, %c8], %14 {strides = array<i32>} : memref<128x128xbf16, #tpu.memory_space<vmem>>, vector<128x4xbf16>,
    %16 = vector.extract_strided_slice %6 {offsets = [0, 3, 0], sizes = [8, 16, 4], strides = [1, 1, 1]} : vector<12x20x4xbf16> to vector<8x16x4xbf16>
    %17 = vector.shape_cast %16 : vector<8x16x4xbf16> to vector<128x4xbf16>
    %c0_7 = arith.constant 0 : index
    %c12 = arith.constant 12 : index
    %18 = vector.load %arg7[%c0_7, %c12] : memref<128x128xbf16, #tpu.memory_space<vmem>>, vector<128x4xbf16>
    tpu.vector_store %arg7[%c0_7, %c12], %17 {strides = array<i32>} : memref<128x128xbf16, #tpu.memory_space<vmem>>, vector<128x4xbf16>,
    %19 = vector.extract_strided_slice %6 {offsets = [0, 4, 0], sizes = [8, 16, 4], strides = [1, 1, 1]} : vector<12x20x4xbf16> to vector<8x16x4xbf16>
    %20 = vector.shape_cast %19 : vector<8x16x4xbf16> to vector<128x4xbf16>
    %c0_8 = arith.constant 0 : index
    %c16 = arith.constant 16 : index
    %21 = vector.load %arg7[%c0_8, %c16] : memref<128x128xbf16, #tpu.memory_space<vmem>>, vector<128x4xbf16>
    tpu.vector_store %arg7[%c0_8, %c16], %20 {strides = array<i32>} : memref<128x128xbf16, #tpu.memory_space<vmem>>, vector<128x4xbf16>,
    %22 = vector.extract_strided_slice %6 {offsets = [1, 0, 0], sizes = [8, 16, 4], strides = [1, 1, 1]} : vector<12x20x4xbf16> to vector<8x16x4xbf16>
    %23 = vector.shape_cast %22 : vector<8x16x4xbf16> to vector<128x4xbf16>
    %c0_9 = arith.constant 0 : index
    %c20 = arith.constant 20 : index
    %24 = vector.load %arg7[%c0_9, %c20] : memref<128x128xbf16, #tpu.memory_space<vmem>>, vector<128x4xbf16>
    tpu.vector_store %arg7[%c0_9, %c20], %23 {strides = array<i32>} : memref<128x128xbf16, #tpu.memory_space<vmem>>, vector<128x4xbf16>,
    %25 = vector.extract_strided_slice %6 {offsets = [1, 1, 0], sizes = [8, 16, 4], strides = [1, 1, 1]} : vector<12x20x4xbf16> to vector<8x16x4xbf16>
    %26 = vector.shape_cast %25 : vector<8x16x4xbf16> to vector<128x4xbf16>
    %c0_10 = arith.constant 0 : index
    %c24 = arith.constant 24 : index
    %27 = vector.load %arg7[%c0_10, %c24] : memref<128x128xbf16, #tpu.memory_space<vmem>>, vector<128x4xbf16>
    tpu.vector_store %arg7[%c0_10, %c24], %26 {strides = array<i32>} : memref<128x128xbf16, #tpu.memory_space<vmem>>, vector<128x4xbf16>,
    %28 = vector.extract_strided_slice %6 {offsets = [1, 2, 0], sizes = [8, 16, 4], strides = [1, 1, 1]} : vector<12x20x4xbf16> to vector<8x16x4xbf16>
    %29 = vector.shape_cast %28 : vector<8x16x4xbf16> to vector<128x4xbf16>
    %c0_11 = arith.constant 0 : index
    %c28 = arith.constant 28 : index
    %30 = vector.load %arg7[%c0_11, %c28] : memref<128x128xbf16, #tpu.memory_space<vmem>>, vector<128x4xbf16>
    tpu.vector_store %arg7[%c0_11, %c28], %29 {strides = array<i32>} : memref<128x128xbf16, #tpu.memory_space<vmem>>, vector<128x4xbf16>,
    %31 = vector.extract_strided_slice %6 {offsets = [1, 3, 0], sizes = [8, 16, 4], strides = [1, 1, 1]} : vector<12x20x4xbf16> to vector<8x16x4xbf16>
    %32 = vector.shape_cast %31 : vector<8x16x4xbf16> to vector<128x4xbf16>
    %c0_12 = arith.constant 0 : index
    %c32 = arith.constant 32 : index
    %33 = vector.load %arg7[%c0_12, %c32] : memref<128x128xbf16, #tpu.memory_space<vmem>>, vector<128x4xbf16>
    tpu.vector_store %arg7[%c0_12, %c32], %32 {strides = array<i32>} : memref<128x128xbf16, #tpu.memory_space<vmem>>, vector<128x4xbf16>,
    %34 = vector.extract_strided_slice %6 {offsets = [1, 4, 0], sizes = [8, 16, 4], strides = [1, 1, 1]} : vector<12x20x4xbf16> to vector<8x16x4xbf16>
    %35 = vector.shape_cast %34 : vector<8x16x4xbf16> to vector<128x4xbf16>
    %c0_13 = arith.constant 0 : index
    %c36 = arith.constant 36 : index
    %36 = vector.load %arg7[%c0_13, %c36] : memref<128x128xbf16, #tpu.memory_space<vmem>>, vector<128x4xbf16>
    tpu.vector_store %arg7[%c0_13, %c36], %35 {strides = array<i32>} : memref<128x128xbf16, #tpu.memory_space<vmem>>, vector<128x4xbf16>,
    %37 = vector.extract_strided_slice %6 {offsets = [2, 0, 0], sizes = [8, 16, 4], strides = [1, 1, 1]} : vector<12x20x4xbf16> to vector<8x16x4xbf16>
    %38 = vector.shape_cast %37 : vector<8x16x4xbf16> to vector<128x4xbf16>
    %c0_14 = arith.constant 0 : index
    %c40 = arith.constant 40 : index
    %39 = vector.load %arg7[%c0_14, %c40] : memref<128x128xbf16, #tpu.memory_space<vmem>>, vector<128x4xbf16>
    tpu.vector_store %arg7[%c0_14, %c40], %38 {strides = array<i32>} : memref<128x128xbf16, #tpu.memory_space<vmem>>, vector<128x4xbf16>,
    %40 = vector.extract_strided_slice %6 {offsets = [2, 1, 0], sizes = [8, 16, 4], strides = [1, 1, 1]} : vector<12x20x4xbf16> to vector<8x16x4xbf16>
    %41 = vector.shape_cast %40 : vector<8x16x4xbf16> to vector<128x4xbf16>
    %c0_15 = arith.constant 0 : index
    %c44 = arith.constant 44 : index
    %42 = vector.load %arg7[%c0_15, %c44] : memref<128x128xbf16, #tpu.memory_space<vmem>>, vector<128x4xbf16>
    tpu.vector_store %arg7[%c0_15, %c44], %41 {strides = array<i32>} : memref<128x128xbf16, #tpu.memory_space<vmem>>, vector<128x4xbf16>,
    %43 = vector.extract_strided_slice %6 {offsets = [2, 2, 0], sizes = [8, 16, 4], strides = [1, 1, 1]} : vector<12x20x4xbf16> to vector<8x16x4xbf16>
    %44 = vector.shape_cast %43 : vector<8x16x4xbf16> to vector<128x4xbf16>
    %c0_16 = arith.constant 0 : index
    %c48 = arith.constant 48 : index
    %45 = vector.load %arg7[%c0_16, %c48] : memref<128x128xbf16, #tpu.memory_space<vmem>>, vector<128x4xbf16>
    tpu.vector_store %arg7[%c0_16, %c48], %44 {strides = array<i32>} : memref<128x128xbf16, #tpu.memory_space<vmem>>, vector<128x4xbf16>,
    %46 = vector.extract_strided_slice %6 {offsets = [2, 3, 0], sizes = [8, 16, 4], strides = [1, 1, 1]} : vector<12x20x4xbf16> to vector<8x16x4xbf16>
    %47 = vector.shape_cast %46 : vector<8x16x4xbf16> to vector<128x4xbf16>
    %c0_17 = arith.constant 0 : index
    %c52 = arith.constant 52 : index
    %48 = vector.load %arg7[%c0_17, %c52] : memref<128x128xbf16, #tpu.memory_space<vmem>>, vector<128x4xbf16>
    tpu.vector_store %arg7[%c0_17, %c52], %47 {strides = array<i32>} : memref<128x128xbf16, #tpu.memory_space<vmem>>, vector<128x4xbf16>,
    %49 = vector.extract_strided_slice %6 {offsets = [2, 4, 0], sizes = [8, 16, 4], strides = [1, 1, 1]} : vector<12x20x4xbf16> to vector<8x16x4xbf16>
    %50 = vector.shape_cast %49 : vector<8x16x4xbf16> to vector<128x4xbf16>
    %c0_18 = arith.constant 0 : index
    %c56 = arith.constant 56 : index
    %51 = vector.load %arg7[%c0_18, %c56] : memref<128x128xbf16, #tpu.memory_space<vmem>>, vector<128x4xbf16>
    tpu.vector_store %arg7[%c0_18, %c56], %50 {strides = array<i32>} : memref<128x128xbf16, #tpu.memory_space<vmem>>, vector<128x4xbf16>,
    %52 = vector.extract_strided_slice %6 {offsets = [3, 0, 0], sizes = [8, 16, 4], strides = [1, 1, 1]} : vector<12x20x4xbf16> to vector<8x16x4xbf16>
    %53 = vector.shape_cast %52 : vector<8x16x4xbf16> to vector<128x4xbf16>
    %c0_19 = arith.constant 0 : index
    %c60 = arith.constant 60 : index
    %54 = vector.load %arg7[%c0_19, %c60] : memref<128x128xbf16, #tpu.memory_space<vmem>>, vector<128x4xbf16>
    tpu.vector_store %arg7[%c0_19, %c60], %53 {strides = array<i32>} : memref<128x128xbf16, #tpu.memory_space<vmem>>, vector<128x4xbf16>,
    %55 = vector.extract_strided_slice %6 {offsets = [3, 1, 0], sizes = [8, 16, 4], strides = [1, 1, 1]} : vector<12x20x4xbf16> to vector<8x16x4xbf16>
    %56 = vector.shape_cast %55 : vector<8x16x4xbf16> to vector<128x4xbf16>
    %c0_20 = arith.constant 0 : index
    %c64 = arith.constant 64 : index
    %57 = vector.load %arg7[%c0_20, %c64] : memref<128x128xbf16, #tpu.memory_space<vmem>>, vector<128x4xbf16>
    tpu.vector_store %arg7[%c0_20, %c64], %56 {strides = array<i32>} : memref<128x128xbf16, #tpu.memory_space<vmem>>, vector<128x4xbf16>,
    %58 = vector.extract_strided_slice %6 {offsets = [3, 2, 0], sizes = [8, 16, 4], strides = [1, 1, 1]} : vector<12x20x4xbf16> to vector<8x16x4xbf16>
    %59 = vector.shape_cast %58 : vector<8x16x4xbf16> to vector<128x4xbf16>
    %c0_21 = arith.constant 0 : index
    %c68 = arith.constant 68 : index
    %60 = vector.load %arg7[%c0_21, %c68] : memref<128x128xbf16, #tpu.memory_space<vmem>>, vector<128x4xbf16>
    tpu.vector_store %arg7[%c0_21, %c68], %59 {strides = array<i32>} : memref<128x128xbf16, #tpu.memory_space<vmem>>, vector<128x4xbf16>,
    %61 = vector.extract_strided_slice %6 {offsets = [3, 3, 0], sizes = [8, 16, 4], strides = [1, 1, 1]} : vector<12x20x4xbf16> to vector<8x16x4xbf16>
    %62 = vector.shape_cast %61 : vector<8x16x4xbf16> to vector<128x4xbf16>
    %c0_22 = arith.constant 0 : index
    %c72 = arith.constant 72 : index
    %63 = vector.load %arg7[%c0_22, %c72] : memref<128x128xbf16, #tpu.memory_space<vmem>>, vector<128x4xbf16>
    tpu.vector_store %arg7[%c0_22, %c72], %62 {strides = array<i32>} : memref<128x128xbf16, #tpu.memory_space<vmem>>, vector<128x4xbf16>,
    %64 = vector.extract_strided_slice %6 {offsets = [3, 4, 0], sizes = [8, 16, 4], strides = [1, 1, 1]} : vector<12x20x4xbf16> to vector<8x16x4xbf16>
    %65 = vector.shape_cast %64 : vector<8x16x4xbf16> to vector<128x4xbf16>
    %c0_23 = arith.constant 0 : index
    %c76 = arith.constant 76 : index
    %66 = vector.load %arg7[%c0_23, %c76] : memref<128x128xbf16, #tpu.memory_space<vmem>>, vector<128x4xbf16>
    tpu.vector_store %arg7[%c0_23, %c76], %65 {strides = array<i32>} : memref<128x128xbf16, #tpu.memory_space<vmem>>, vector<128x4xbf16>,
    %67 = vector.extract_strided_slice %6 {offsets = [4, 0, 0], sizes = [8, 16, 4], strides = [1, 1, 1]} : vector<12x20x4xbf16> to vector<8x16x4xbf16>
    %68 = vector.shape_cast %67 : vector<8x16x4xbf16> to vector<128x4xbf16>
    %c0_24 = arith.constant 0 : index
    %c80 = arith.constant 80 : index
    %69 = vector.load %arg7[%c0_24, %c80] : memref<128x128xbf16, #tpu.memory_space<vmem>>, vector<128x4xbf16>
    tpu.vector_store %arg7[%c0_24, %c80], %68 {strides = array<i32>} : memref<128x128xbf16, #tpu.memory_space<vmem>>, vector<128x4xbf16>,
    %70 = vector.extract_strided_slice %6 {offsets = [4, 1, 0], sizes = [8, 16, 4], strides = [1, 1, 1]} : vector<12x20x4xbf16> to vector<8x16x4xbf16>
    %71 = vector.shape_cast %70 : vector<8x16x4xbf16> to vector<128x4xbf16>
    %c0_25 = arith.constant 0 : index
    %c84 = arith.constant 84 : index
    %72 = vector.load %arg7[%c0_25, %c84] : memref<128x128xbf16, #tpu.memory_space<vmem>>, vector<128x4xbf16>
    tpu.vector_store %arg7[%c0_25, %c84], %71 {strides = array<i32>} : memref<128x128xbf16, #tpu.memory_space<vmem>>, vector<128x4xbf16>,
    %73 = vector.extract_strided_slice %6 {offsets = [4, 2, 0], sizes = [8, 16, 4], strides = [1, 1, 1]} : vector<12x20x4xbf16> to vector<8x16x4xbf16>
    %74 = vector.shape_cast %73 : vector<8x16x4xbf16> to vector<128x4xbf16>
    %c0_26 = arith.constant 0 : index
    %c88 = arith.constant 88 : index
    %75 = vector.load %arg7[%c0_26, %c88] : memref<128x128xbf16, #tpu.memory_space<vmem>>, vector<128x4xbf16>
    tpu.vector_store %arg7[%c0_26, %c88], %74 {strides = array<i32>} : memref<128x128xbf16, #tpu.memory_space<vmem>>, vector<128x4xbf16>,
    %76 = vector.extract_strided_slice %6 {offsets = [4, 3, 0], sizes = [8, 16, 4], strides = [1, 1, 1]} : vector<12x20x4xbf16> to vector<8x16x4xbf16>
    %77 = vector.shape_cast %76 : vector<8x16x4xbf16> to vector<128x4xbf16>
    %c0_27 = arith.constant 0 : index
    %c92 = arith.constant 92 : index
    %78 = vector.load %arg7[%c0_27, %c92] : memref<128x128xbf16, #tpu.memory_space<vmem>>, vector<128x4xbf16>
    tpu.vector_store %arg7[%c0_27, %c92], %77 {strides = array<i32>} : memref<128x128xbf16, #tpu.memory_space<vmem>>, vector<128x4xbf16>,
    %79 = vector.extract_strided_slice %6 {offsets = [4, 4, 0], sizes = [8, 16, 4], strides = [1, 1, 1]} : vector<12x20x4xbf16> to vector<8x16x4xbf16>
    %80 = vector.shape_cast %79 : vector<8x16x4xbf16> to vector<128x4xbf16>
    %c0_28 = arith.constant 0 : index
    %c96 = arith.constant 96 : index
    %81 = vector.load %arg7[%c0_28, %c96] : memref<128x128xbf16, #tpu.memory_space<vmem>>, vector<128x4xbf16>
    tpu.vector_store %arg7[%c0_28, %c96], %80 {strides = array<i32>} : memref<128x128xbf16, #tpu.memory_space<vmem>>, vector<128x4xbf16>,
    %c0_29 = arith.constant 0 : index
    %c0_30 = arith.constant 0 : index
    %82 = vector.load %arg7[%c0_29, %c0_30] : memref<128x128xbf16, #tpu.memory_space<vmem>>, vector<128x128xbf16>
    %c0_31 = arith.constant 0 : index
    %c0_32 = arith.constant 0 : index
    %83 = vector.load %arg3[%c0_31, %c0_32] : memref<128x24xbf16, #tpu.memory_space<vmem>>, vector<128x24xbf16>
    %cst_33 = arith.constant dense<0.000000e+00> : vector<128x24xf32>
    %84 = tpu.matmul %82, %83, %cst_33 {dimension_numbers = #tpu.dot_dimension_numbers<[1], [0], [0], [1], [0, 0, 1, 1], [], []>} : vector<128x128xbf16>, vector<128x24xbf16>, vector<128x24xf32> -> vector<128x24xf32>
    %c0_34 = arith.constant 0 : index
    %c0_35 = arith.constant 0 : index
    %85 = vector.load %arg5[%c0_34, %c0_35] : memref<1x32xf32, #tpu.memory_space<vmem>>, vector<1x24xf32>
    %86 = vector.broadcast %85 : vector<1x24xf32> to vector<128x24xf32>
    %87 = arith.addf %84, %86 : vector<128x24xf32>
    %cst_36 = arith.constant 5.000000e-01 : f32
    %88 = vector.broadcast %cst_36 : f32 to vector<128x24xf32>
    %89 = arith.mulf %88, %87 : vector<128x24xf32>
    %cst_37 = arith.constant 0.707106769 : f32
    %90 = vector.broadcast %cst_37 : f32 to vector<128x24xf32>
    %91 = arith.mulf %87, %90 : vector<128x24xf32>
    %92 = math.erf %91 : vector<128x24xf32>
    %cst_38 = arith.constant 1.000000e+00 : f32
    %93 = vector.broadcast %cst_38 : f32 to vector<128x24xf32>
    %94 = arith.addf %93, %92 : vector<128x24xf32>
    %95 = arith.mulf %89, %94 : vector<128x24xf32>
    %96 = arith.truncf %95 : vector<128x24xf32> to vector<128x24xbf16>
    %c0_39 = arith.constant 0 : index
    %c0_40 = arith.constant 0 : index
    %97 = vector.load %arg4[%c0_39, %c0_40] : memref<24x8xbf16, #tpu.memory_space<vmem>>, vector<24x8xbf16>
    %cst_41 = arith.constant dense<0.000000e+00> : vector<128x8xf32>
    %98 = tpu.matmul %96, %97, %cst_41 {dimension_numbers = #tpu.dot_dimension_numbers<[1], [0], [0], [1], [0, 0, 1, 1], [], []>} : vector<128x24xbf16>, vector<24x8xbf16>, vector<128x8xf32> -> vector<128x8xf32>
    %c0_42 = arith.constant 0 : index
    %c24_43 = arith.constant 24 : index
    %99 = vector.load %arg5[%c0_42, %c24_43] : memref<1x32xf32, #tpu.memory_space<vmem>>, vector<1x8xf32>
    %100 = vector.broadcast %99 : vector<1x8xf32> to vector<128x8xf32>
    %101 = arith.addf %98, %100 : vector<128x8xf32>
    %102 = vector.shape_cast %101 : vector<128x8xf32> to vector<1x128x8xf32>
    %c0_44 = arith.constant 0 : index
    %c0_45 = arith.constant 0 : index
    %c0_46 = arith.constant 0 : index
    %103 = vector.load %arg6[%c0_44, %c0_45, %c0_46] : memref<1x128x8xf32, #tpu.memory_space<vmem>>, vector<1x128x8xf32>
    tpu.vector_store %arg6[%c0_44, %c0_45, %c0_46], %102 {strides = array<i32>} : memref<1x128x8xf32, #tpu.memory_space<vmem>>, vector<1x128x8xf32>,
    return
  }
  func.func @transform_0(%arg0: i32, %arg1: i32) -> (i32, i32, i32, i32) {
    %c0_i32 = arith.constant 0 : i32
    %c0_i32_0 = arith.constant 0 : i32
    %c0_i32_1 = arith.constant 0 : i32
    %c0_i32_2 = arith.constant 0 : i32
    return %arg0, %c0_i32, %c0_i32_0, %c0_i32_1 : i32, i32, i32, i32
  }
  func.func @transform_1(%arg0: i32, %arg1: i32) -> (i32, i32) {
    %c0_i32 = arith.constant 0 : i32
    %c0_i32_0 = arith.constant 0 : i32
    %c0_i32_1 = arith.constant 0 : i32
    return %c0_i32, %c0_i32_0 : i32, i32
  }
  func.func @transform_2(%arg0: i32, %arg1: i32) -> (i32, i32) {
    %c0_i32 = arith.constant 0 : i32
    %c0_i32_0 = arith.constant 0 : i32
    %c0_i32_1 = arith.constant 0 : i32
    return %c0_i32, %c0_i32_0 : i32, i32
  }
  func.func @transform_3(%arg0: i32, %arg1: i32) -> (i32, i32) {
    %c0_i32 = arith.constant 0 : i32
    %c0_i32_0 = arith.constant 0 : i32
    %c0_i32_1 = arith.constant 0 : i32
    return %c0_i32, %c0_i32_0 : i32, i32
  }
  func.func @transform_4(%arg0: i32, %arg1: i32) -> (i32, i32, i32) {
    %c0_i32 = arith.constant 0 : i32
    %c0_i32_0 = arith.constant 0 : i32
    return %arg0, %arg1, %c0_i32 : i32, i32, i32
  }
}

</mosaic_0001>

<bundles_post_ra>
// kernel: tpu_custom_call.1
= control target key start
LH: loop header
LB: loop body
LE: loop exit
PB: predicated region body
PF: predicated region fallthrough
CT: control target
= control target key end

     0   :  { %s3982_s15 = smov 0   ;;  %s3984_s16 = smov 0   ;;  %s6643_s0 = inlined_call_operand.vmem [shape: bf16[2,20,20,4], index: 0, kind: input, shape index: {}]   ;;  %s6644_s1 = inlined_call_operand.vmem [shape: bf16[128,24], index: 1, kind: input, shape index: {}]   ;;  %s6645_s2 = inlined_call_operand.vmem [shape: bf16[24,8], index: 2, kind: input, shape index: {}]   ;;  %s6646_s3 = inlined_call_operand.vmem [shape: f32[1,32], index: 3, kind: input, shape index: {}]   ;;  %s6647_s4 = inlined_call_operand.vmem [shape: f32[2,256,8], index: 4, kind: output, shape index: {}]  }
   0x1   :  { %s3986_s17 = smov 0   ;;  %s3988_s18 = smov 0  }
   0x2   :  { %s3990_s19 = smov 0  }
   0x3 LB: > { %s23_s20 = sadd.s32 1, %s3921_s17  ;;  %s26_s21 = sadd.s32 1, %s3925_s18  ;;  %s3929_s19 = sphi %s3990_s19, %s14_s19   ;;  %s3925_s18 = sphi %s3988_s18, %s6939_s18   ;;  %s3921_s17 = sphi %s3986_s17, %s6938_s17   ;;  %s3917_s16 = sphi %s3984_s16, %s6937_s16   ;;  %s3913_s15 = sphi %s3982_s15, %s6936_s15  }
   0x4   : > { %p24_p0 = scmp.ge.s32.totalorder %s23_s20, 2  ;;  %p3633_p1 = scmp.ge.s32.totalorder %s3929_s19, 1 }
   0x5   : > { %p176_p2 = scmp.lt.s32.totalorder %s3929_s19, 5 }
   0x6   : > { %s6941_s20 = smov (%p24_p0, %s23_s20), 0  ;;  %s6943_s21 = smov (!%p24_p0, %s26_s21), %s3925_s18 }
   0x7   : > { %p177_p3 = pnand %p3633_p1, %p176_p2  ;;  %p28_p4 = scmp.ge.s32.totalorder %s6943_s21, 2 }
   0x9   : > { %s6945_s21 = smov (%p28_p4, %s6943_s21), 0  ;;  %180 = sbr.rel (%p177_p3) target bundleno = 1511 (0x5e7), region = 36 }
   0xe   : > { %p206_p5 = scmp.lt.s32.totalorder %s3917_s16, 1  ;;  %s3759_s22 = smul.u32 96, %s3913_s15  ;;  %vm296_vm0 = vsmask.f32 3328  ;;  %vm297_vm1 = vsmask.f32 7440 }
   0xf   : > { %vm4067_vm2 = vmor %vm296_vm0, %vm297_vm1  ;;  %v6769_v23 = vmov 0  ;;  %s3931_s28 = smov 4   ;;  %vm580_vm3 = vcmask 1042432   ;;  %vm581_vm4 = vcmask 1046532   ;;  %s3932_s29 = smov 8   ;;  %vm223_vm9 = vcmask 1044256  }
  0x10   : > { %s6947_s16 = smov (!%p206_p5, %s3917_s16), 1  ;;  %v6770_v23 = vsel %vm4067_vm2, 4294967295, %v6769_v23  ;;  %vm4296_vm5 = vmor %vm580_vm3, %vm581_vm4  ;;  %vm704_vm6 = vsmask.f32 2304  ;;  %vm705_vm7 = vsmask.f32 6416 }
  0x11   : > { %s3787_s23 = smul.u32 240, %s6947_s16  ;;  %6771 = vst [vmem:[#allocation3_spill] sm:$0xff] %v6770_v23  ;;  %vm4370_vm8 = vmor %vm704_vm6, %vm705_vm7  ;;  %vm279_vm10 = vcmask 27648   ;;  %s3934_s30 = smov 12   ;;  %vm539_vm11 = vcmask 60448   ;;  %vm892_vm12 = vcmask 1041408  }
  0x12   : > { %vm893_vm13 = vcmask 1045508   ;;  %s3935_s5 = smov 16   ;;  %vm687_vm15 = vcmask 93248   ;;  %s3936_s6 = smov 20   ;;  %vm875_vm0 = vcmask 126048   ;;  %vm999_vm1 = vcmask 158848  }
  0x13   : > { %s210_s26 = scalar_lea.vmem %s6643_s0, %s3787_s23  ;;  %vm4683_vm14 = vmor %vm892_vm12, %vm893_vm13  ;;  %s3937_s7 = smov 24   ;;  %vm1066_vm3 = vcmask 191648   ;;  %vm1155_vm4 = vcmask 224448   ;;  %vm1228_vm6 = vcmask 257248   ;;  %vm1308_vm7 = vcmask 290048  }
  0x14   : > { %s4021_s27 = scalar_lea.vmem %s210_s26, %s3759_s22  ;;  %s3938_s8 = smov 28   ;;  %vm1609_vm12 = vcmask 421248   ;;  %vm1689_vm13 = vcmask 454048  }
  0x15   : > { %v4024_v0 = vld [vmem:[%s4021_s27 + $0xc] sm:$0xf]  ;;  %v4027_v1 = vld [vmem:[%s4021_s27 + $0x10] sm:$0xf]  ;;  %v4030_v2 = vld [vmem:[%s4021_s27] sm:$0xf] }
  0x16   : > { %v324_v3 = vshrl.u32 %v4024_v0, 16  ;;  %v327_v4 = vshll.u32 %v4024_v0, 16  ;;  %v333_v5 = vshll.u32 %v4027_v1, 16  ;;  %v4036_v6 = vld [vmem:[%s4021_s27 + $0x4] sm:$0xf]  ;;  %v6662_v7 = vshrl.u32 %v4030_v2, 16 }
  0x17   : > { %v6661_v8 = vshll.u32 %v4030_v2, 16  ;;  %v309_v9 = vshll.u32 %v4036_v6, 16  ;;  %v337_v10 = vshrl.u32 %v4027_v1, 16  ;;  %v313_v11 = vshrl.u32 %v4036_v6, 16  ;;  %v4052_v16 = vld [vmem:[%s4021_s27 + $0x14] sm:$0x3] }
  0x18   : > { %v326_v12 = vrot.slane %v324_v3, 4  ;;  %v329_v13 = vrot.slane %v327_v4, 5  ;;  %v302_v14 = vrot.slane %v6662_v7, 4  ;;  %v4057_v18 = vld [vmem:[%s4021_s27 + $0x28] sm:$0xf]  ;;  %v335_v20 = vrot.slane %v333_v5, 5 }
  0x19   : > { %v305_v15 = vrot.slane %v6661_v8, 5  ;;  %v339_v17 = vrot.slane %v337_v10, 4  ;;  %v4062_v21 = vld [vmem:[%s4021_s27 + $0x8] sm:$0x3]  ;;  %v315_v22 = vrot.slane %v313_v11, 4  ;;  %v311_v25 = vrot.slane %v309_v9, 5 }
  0x1a   : > { %v330_v19 = vor.u32 %v329_v13, %v326_v12  ;;  %v6655_v26 = vshll.u32 %v4057_v18, 16  ;;  %v6660_v27 = vshrl.u32 %v4057_v18, 16  ;;  %v4076_v28 = vld [vmem:[%s4021_s27 + $0x24] sm:$0xf]  ;;  %v6654_v31 = vshll.u32 %v4052_v16, 16  ;;  %s3939_s9 = smov 32  }
  0x1b   : > { %v306_v24 = vor.u32 %v305_v15, %v302_v14  ;;  %v340_v30 = vor.u32 %v339_v17, %v335_v20  ;;  %v316_v33 = vor.u32 %v315_v22, %v311_v25  ;;  %v6681_v34 = vshll.u32 %v4062_v21, 16  ;;  %v4090_v38 = vld [vmem:[%s4021_s27 + $0x2c] sm:$0x3]  ;;  %v4101_v44 = vld [vmem:[%s4021_s27 + $0x3c] sm:$0xf]  ;;  %s3940_s10 = smov 36  }
  0x1c   : > { %v331_v29 = vrot.slane %v330_v19, 4  ;;  %v6651_v36 = vshrl.u32 %v4076_v28, 16  ;;  %v383_v39 = vrot.slane %v6655_v26, 5  ;;  %v387_v40 = vrot.slane %v6660_v27, 4  ;;  %v4104_v45 = vld [vmem:[%s4021_s27 + $0x34] sm:$0xf] }
  0x1d   : > { %v307_v32 = vrot.slane %v306_v24, 4  ;;  %v6650_v41 = vshll.u32 %v4076_v28, 16  ;;  %v341_v42 = vrot.slane %v340_v30, 4  ;;  %v345_v43 = vrot.slane %v6654_v31, 5  ;;  %v4113_v50 = vld [vmem:[%s4021_s27 + $0x18] sm:$0xf] }
  0x1e   : > { %v4082_v35 = vsel %vm4067_vm2, %v331_v29, %v335_v20  ;;  %v317_v46 = vrot.slane %v316_v33, 4  ;;  %v321_v47 = vrot.slane %v6681_v34, 5  ;;  %v374_v48 = vrot.slane %v6651_v36, 4  ;;  %v4117_v52 = vld [vmem:[%s4021_s27 + $0x1c] sm:$0xf]  ;;  %s3941_s11 = smov 40  }
  0x1f   : > { %495 = vrot.lane.b32.xlu1 %v4082_v35, %s3931_s28  ;;  %v312_v37 = vsel %vm4067_vm2, %v307_v32, %v311_v25  ;;  %v377_v49 = vrot.slane %v6650_v41, 5  ;;  %v6652_v51 = vshll.u32 %v4090_v38, 16  ;;  %v388_v53 = vor.u32 %v387_v40, %v383_v39  ;;  %v4135_v13 = vld [vmem:[%s4021_s27 + $0x40] sm:$0xf]  ;;  %v4146_v20 = vld [vmem:[%s4021_s27 + $0x38] sm:$0x3] }
  0x20   : > { %491 = vrot.lane.b32.xlu0 %v312_v37, %s3931_s28  ;;  %v6649_v54 = vshrl.u32 %v4101_v44, 16  ;;  %v6648_v55 = vshll.u32 %v4101_v44, 16  ;;  %v4123_v56 = vsel %vm4067_vm2, %v341_v42, %v345_v43  ;;  %v6664_v57 = vshll.u32 %v4104_v45, 16  ;;  %v4158_v29 = vld [vmem:[%s4021_s27 + $0x20] sm:$0x3]  ;;  %s3942_s12 = smov 44  }
  0x21   : > { %v6666_v58 = vshrl.u32 %v4104_v45, 16  ;;  %v6677_v59 = vshrl.u32 %v4113_v50, 16  ;;  %v322_v60 = vsel %vm4067_vm2, %v317_v46, %v321_v47  ;;  %v378_v61 = vor.u32 %v377_v49, %v374_v48  ;;  %v4163_v37 = vld [vmem:[%s4021_s27 + $0x4c] sm:$0xf]  ;;  %v4168_v43 = vld [vmem:[%s4021_s27 + $0x48] sm:$0xf] }
  0x22   : > { %v6675_v62 = vshll.u32 %v4113_v50, 16  ;;  %v6679_v63 = vshll.u32 %v4117_v52, 16  ;;  %v393_v12 = vrot.slane %v6652_v51, 5  ;;  %v389_v15 = vrot.slane %v388_v53, 4  ;;  %v4213_v51 = vld [vmem:[%s4021_s27 + $0x50] sm:$0x3] }
  0x23   : > { %v350_v14 = vrot.slane %v6677_v59, 4  ;;  %v422_v17 = vrot.slane %v6649_v54, 4  ;;  %v425_v19 = vrot.slane %v6648_v55, 5  ;;  %v4153_v24 = vrot.slane %v6664_v57, 5  ;;  %v4182_v55 = vld [vmem:[%s4021_s27 + $0x30] sm:$0xf] }
  0x24   : > { %v353_v22 = vrot.slane %v6675_v62, 5  ;;  %v411_v25 = vrot.slane %v6666_v58, 4  ;;  %v379_v30 = vrot.slane %v378_v61, 4  ;;  %v359_v33 = vrot.slane %v6679_v63, 5  ;;  %v4263_v57 = vld [vmem:[%s4021_s27 + $0x5c] sm:$0x3] }
  0x25   : > { %v6663_v40 = vshll.u32 %v4135_v13, 16  ;;  %v6653_v42 = vshll.u32 %v4146_v20, 16  ;;  %v6680_v46 = vshrl.u32 %v4117_v52, 16  ;;  %v4173_v47 = vsel %vm4067_vm2, %v389_v15, %v393_v12  ;;  %s3943_s13 = smov 48   ;;  %s3944_s14 = smov 52  }
  0x26   : > { %v354_v32 = vor.u32 %v353_v22, %v350_v14  ;;  %v426_v48 = vor.u32 %v425_v19, %v422_v17  ;;  %v6678_v53 = vshll.u32 %v4158_v29, 16  ;;  %v6656_v61 = vshll.u32 %v4163_v37, 16  ;;  %s3945_s22 = smov 56   ;;  %s3946_s23 = smov 60  }
  0x27   : > { %497 = vrot.lane.b32.xlu1 %v4123_v56, %s3931_s28  ;;  %v6657_v14 = vshrl.u32 %v4163_v37, 16  ;;  %v363_v22 = vrot.slane %v6680_v46, 4  ;;  %v4186_v54 = vsel %vm4067_vm2, %v379_v30, %v383_v39  ;;  %v6658_v15 = vshrl.u32 %v4168_v43, 16  ;;  %s3947_s24 = smov 64   ;;  %s3948_s25 = smov 72  }
  0x28   : > { %493 = vrot.lane.b32.xlu0 %v322_v60, %s3931_s28  ;;  %v355_v49 = vrot.slane %v354_v32, 4  ;;  %v412_v60 = vor.u32 %v411_v25, %v4153_v24  ;;  %v6659_v17 = vshll.u32 %v4168_v43, 16  ;;  %v431_v19 = vrot.slane %v6663_v40, 5  ;;  %s3949_s26 = smov 68  }
  0x29   : > { %v364_v25 = vor.u32 %v363_v22, %v359_v33  ;;  %v427_v39 = vrot.slane %v426_v48, 4  ;;  %v417_v30 = vrot.slane %v6653_v42, 5  ;;  %v369_v32 = vrot.slane %v6678_v53, 5 }
  0x2a   : > { %v4190_v12 = vsel %vm4067_vm2, %v355_v49, %v359_v33  ;;  %v6671_v49 = vshrl.u32 %v4182_v55, 16  ;;  %v455_v41 = vrot.slane %v6656_v61, 5  ;;  %v459_v33 = vrot.slane %v6657_v14, 4  ;;  %v4222_v61 = vld [vmem:[%s4021_s27 + $0x58] sm:$0xf] }
  0x2b   : > { %499 = vrot.lane.b32.xlu2 %v4190_v12, %s3931_s28  ;;  %v365_v22 = vrot.slane %v364_v25, 4  ;;  %v6670_v48 = vshll.u32 %v4182_v55, 16  ;;  %v413_v36 = vrot.slane %v412_v60, 4  ;;  %v446_v42 = vrot.slane %v6658_v15, 4 }
  0x2c   : > { %v449_v31 = vrot.slane %v6659_v17, 5  ;;  %v398_v26 = vrot.slane %v6671_v49, 4  ;;  %v6665_v14 = vshrl.u32 %v4135_v13, 16  ;;  %v4233_v15 = vsel %vm4067_vm2, %v427_v39, %v431_v19 }
  0x2d   : > { %v401_v25 = vrot.slane %v6670_v48, 5  ;;  %v4228_v60 = vsel %vm4067_vm2, %v365_v22, %v369_v32  ;;  %6772 = vst [vmem:[#allocation4_spill] sm:$0xff] %v4233_v15  ;;  %v460_v17 = vor.u32 %v459_v33, %v455_v41  ;;  %v6667_v27 = vshll.u32 %v4213_v51, 16  ;;  %v4247_v33 = vld [vmem:[%s4021_s27 + $0x44] sm:$0x3] }
  0x2e   : > { %v4238_v7 = vsel %vm4067_vm2, %v413_v36, %v417_v30  ;;  %v450_v40 = vor.u32 %v449_v31, %v446_v42  ;;  %v6668_v32 = vshll.u32 %v4222_v61, 16  ;;  %v6669_v22 = vshrl.u32 %v4222_v61, 16  ;;  %v4256_v42 = vld [vmem:[%s4021_s27 + $0x54] sm:$0xf] }
  0x2f   : > { %505 = vrot.lane.b32.xlu1 %v4173_v47, %s3931_s28  ;;  %v402_v8 = vor.u32 %v401_v25, %v398_v26  ;;  %v435_v26 = vrot.slane %v6665_v14, 4  ;;  %v461_v31 = vrot.slane %v460_v17, 4  ;;  %v465_v36 = vrot.slane %v6667_v27, 5 }
  0x30   : > { %503 = vrot.lane.b32.xlu0 %v4186_v54, %s3931_s28  ;;  %v451_v30 = vrot.slane %v450_v40, 4  ;;  %v479_v25 = vrot.slane %v6668_v32, 5  ;;  %v6674_v14 = vshll.u32 %v4247_v33, 16  ;;  %v6673_v27 = vshrl.u32 %v4256_v42, 16 }
  0x31   : > { %v403_v39 = vrot.slane %v402_v8, 4  ;;  %v483_v8 = vrot.slane %v6669_v22, 4  ;;  %v436_v58 = vor.u32 %v435_v26, %v431_v19  ;;  %v6672_v40 = vshll.u32 %v4256_v42, 16 }
  0x32   : > { %v4275_v32 = vsel %vm4067_vm2, %v461_v31, %v465_v36  ;;  %v4279_v22 = vsel %vm4067_vm2, %v451_v30, %v455_v41  ;;  %v6676_v49 = vshll.u32 %v4263_v57, 16  ;;  %v441_v19 = vrot.slane %v6674_v14, 5 }
  0x33   : > { %501 = vrot.lane.b32.xlu2 %v4228_v60, %s3931_s28  ;;  %v4269_v17 = vsel %vm4067_vm2, %v403_v39, %v4153_v24  ;;  %6773 = vst [vmem:[#allocation5_spill] sm:$0xff] %v4275_v32  ;;  %v484_v48 = vor.u32 %v483_v8, %v479_v25  ;;  %v437_v24 = vrot.slane %v436_v58, 4  ;;  %v470_v39 = vrot.slane %v6673_v27, 4 }
  0x34   : > { %6774 = vst [vmem:[#allocation6_spill] sm:$0xff] %v4279_v22  ;;  %v473_v41 = vrot.slane %v6672_v40, 5  ;;  %v3641_v26 = vrot.slane %v4030_v2, 9  ;;  %v585_v31 = vrot.slane %v4036_v6, 5  ;;  %v6775_v36 = vmov 0 }
  0x35   : > { %v6776_v36 = vsel %vm4296_vm5, 4294967295, %v6775_v36  ;;  %v485_v58 = vrot.slane %v484_v48, 4  ;;  %v489_v30 = vrot.slane %v6676_v49, 5  ;;  %v4304_v8 = vsel %vm4067_vm2, %v437_v24, %v441_v19 }
  0x36   : > { %6777 = vst [vmem:[#allocation7_spill] sm:$0xff] %v6776_v36  ;;  %v474_v40 = vor.u32 %v473_v41, %v470_v39  ;;  %v586_v27 = vsel %vm4296_vm5, %v3641_v26, %v585_v31  ;;  %v592_v14 = vrot.slane %v4027_v1, 5  ;;  %v595_v19 = vrot.slane %v4052_v16, 5 }
  0x37   : > { %511 = vrot.lane.b32.xlu1 %v4233_v15, %s3931_s28  ;;  %6778 = vst [vmem:[#allocation8_spill] sm:$0xff] %v4304_v8  ;;  %v4311_v62 = vsel %vm4067_vm2, %v485_v58, %v489_v30  ;;  %v3642_v39 = vrot.slane %v4024_v0, 9  ;;  %v599_v58 = vrot.slane %v4117_v52, 5  ;;  %v588_v30 = vrot.slane %v4062_v21, 5 }
  0x38   : > { %509 = vrot.lane.b32.xlu0 %v4238_v7, %s3931_s28  ;;  %6779 = vst [vmem:[#allocation9_spill] sm:$0xff] %v4311_v62  ;;  %v475_v48 = vrot.slane %v474_v40, 4  ;;  %v594_v24 = vrot.slane %v592_v14, 4  ;;  %v587_v40 = vrot.slane %v585_v31, 4  ;;  %v722_v31 = vrot.slane %v324_v3, 5 }
  0x39   : > { %v727_v49 = vrot.slane %v333_v5, 6  ;;  %v711_v59 = vrot.slane %v313_v11, 5  ;;  %v613_v53 = vrot.slane %v4104_v45, 5  ;;  %v716_v46 = vshrl.u32 %v4062_v21, 16 }
  0x3a   : > { %v4322_v41 = vsel %vm4067_vm2, %v475_v48, %v479_v25  ;;  %v4326_v26 = vsel %vm4296_vm5, %v594_v24, %v595_v19  ;;  %v712_v25 = vrot.slane %v309_v9, 6  ;;  %v3644_v48 = vrot.slane %v4076_v28, 9 }
  0x3b   : > { %507 = vrot.lane.b32.xlu2 %v4269_v17, %s3931_s28  ;;  %6780 = vst [vmem:[#allocation10_spill] sm:$0xff] %v4322_v41  ;;  %v606_v24 = vrot.slane %v4057_v18, 5  ;;  %v602_v19 = vrot.slane %v4158_v29, 5  ;;  %v723_v9 = vrot.slane %v327_v4, 6  ;;  %v589_v63 = vsel %vm4296_vm5, %v587_v40, %v588_v30 }
  0x3c   : > { %6781 = vst [vmem:[#allocation11_spill] sm:$0xff] %v4326_v26  ;;  %v4361_v4 = vor.u32 %v712_v25, %v711_v59  ;;  %v718_v40 = vrot.slane %v716_v46, 5 }
  0x3d   : > { %v724_v3 = vor.u32 %v723_v9, %v722_v31  ;;  %v4367_v5 = vsel %vm4296_vm5, %v3644_v48, %v606_v24  ;;  %v615_v48 = vrot.slane %v613_v53, 4  ;;  %v616_v31 = vrot.slane %v4146_v20, 5 }
  0x3e   : > { %6784 = vst [vmem:[#allocation13_spill] sm:$0xff] %v4367_v5  ;;  %v715_v59 = vrot.slane %v4361_v4, 4  ;;  %v3643_v9 = vrot.slane %v4113_v50, 9 }
  0x3f   : > { %517 = vrot.lane.b32.xlu1 %v4275_v32, %s3931_s28 }
  0x40   : > { %515 = vrot.lane.b32.xlu0 %v4279_v22, %s3931_s28 }
  0x43   : > { %513 = vrot.lane.b32.xlu2 %v4304_v8, %s3931_s28 }
  0x47   : > { %639 = vrot.lane.b32.xlu1 %v586_v27, %s3932_s29  ;;  %v4331_v27 = vsel %vm4296_vm5, %v3642_v39, %v592_v14  ;;  %v601_v14 = vrot.slane %v599_v58, 4  ;;  %v726_v39 = vrot.slane %v337_v10, 5  ;;  %v6783_v10 = vshll.u32 %v4062_v21, 16 }
  0x48   : > { %521 = vrot.lane.b32.xlu0 %v4311_v62, %s3931_s28  ;;  %6782 = vst [vmem:[#allocation12_spill] sm:$0xff] %v4331_v27 }
  0x49   : > { %v4359_v34 = vor.u32 %v727_v49, %v726_v39  ;;  %v4376_v30 = vsel %vm4296_vm5, %v601_v14, %v602_v19  ;;  %v725_v49 = vrot.slane %v724_v3, 4  ;;  %v3645_v19 = vrot.slane %v4182_v55, 9 }
  0x4a   : > { %6787 = vst [vmem:[#allocation14_spill] sm:$0xff] %v4376_v30  ;;  %v6790_v39 = vshll.u32 %v4117_v52, 16 }
  0x4b   : > { %519 = vrot.lane.b32.xlu2 %v4322_v41, %s3931_s28  ;;  %v4387_v46 = vsel %vm4370_vm8, %v725_v49, %v4359_v34  ;;  %s3950_s28 = smov 76  }
  0x4c   : > { %6788 = vst [vmem:[#allocation15_spill] sm:$0xff] %v4387_v46  ;;  %v742_v3 = vrot.slane %v6790_v39, 6  ;;  %v4413_v39 = vsel %vm4296_vm5, %v615_v48, %v616_v31  ;;  %v627_v48 = vrot.slane %v4163_v37, 5  ;;  %v6798_v31 = vshrl.u32 %v4182_v55, 16 }
  0x4d   : > { %6795 = vst [vmem:[#allocation17_spill] sm:$0xff] %v4413_v39 }
  0x4f   : > { %645 = vrot.lane.b32.xlu1 %v4326_v26, %s3932_s29  ;;  %v6793_v26 = vshll.u32 %v4113_v50, 16 }
  0x50   : > { %643 = vrot.lane.b32.xlu0 %v4331_v27, %s3932_s29  ;;  %v719_v27 = vrot.slane %v6783_v10, 6  ;;  %v746_v10 = vshrl.u32 %v4158_v29, 16 }
  0x51   : > { %v738_v41 = vrot.slane %v6793_v26, 6 }
  0x52   : > { %v720_v25 = vor.u32 %v719_v27, %v718_v40  ;;  %v6789_v27 = vshrl.u32 %v4117_v52, 16  ;;  %v6791_v40 = vshll.u32 %v4158_v29, 16 }
  0x53   : > { %641 = vrot.lane.b32.xlu2 %v589_v63, %s3932_s29 }
  0x54   : > { %v4394_v63 = vsel %vm4370_vm8, %v715_v59, %v720_v25  ;;  %v741_v14 = vrot.slane %v6789_v27, 5  ;;  %v749_v49 = vrot.slane %v6791_v40, 6  ;;  %v4409_v59 = vsel %vm4296_vm5, %v3643_v9, %v599_v58 }
  0x55   : > { %6794 = vst [vmem:[#allocation16_spill] sm:$0xff] %v4409_v59  ;;  %v748_v25 = vrot.slane %v746_v10, 5  ;;  %v4417_v40 = vsel %vm4296_vm5, %v3645_v19, %v613_v53  ;;  %v609_v58 = vrot.slane %v4090_v38, 5  ;;  %v767_v9 = vrot.slane %v6798_v31, 5 }
  0x56   : > { %v743_v62 = vor.u32 %v742_v3, %v741_v14  ;;  %6796 = vst [vmem:[#allocation18_spill] sm:$0xff] %v4417_v40  ;;  %v3647_v14 = vrot.slane %v4168_v43, 9  ;;  %v6800_v3 = vshrl.u32 %v4104_v45, 16 }
  0x57   : > { %651 = vrot.lane.b32.xlu1 %v4367_v5, %s3932_s29  ;;  %v6792_v5 = vshrl.u32 %v4113_v50, 16  ;;  %v750_v23 = vor.u32 %v749_v49, %v748_v25 }
  0x58   : > { %649 = vrot.lane.b32.xlu0 %v4376_v30, %s3932_s29  ;;  %v745_v8 = vrot.slane %v743_v62, 4  ;;  %v771_v10 = vrot.slane %v6800_v3, 5  ;;  %v4454_v31 = vsel %vm4296_vm5, %v3647_v14, %v627_v48  ;;  %v637_v14 = vrot.slane %v4263_v57, 5 }
  0x59   : > { %v737_v30 = vrot.slane %v6792_v5, 5  ;;  %v620_v5 = vrot.slane %v4135_v13, 5  ;;  %6803 = vst [vmem:[#allocation21_spill] sm:$0xff] %v4454_v31 }
  0x5b   : > { %v739_v27 = vor.u32 %v738_v41, %v737_v30  ;;  %647 = vrot.lane.b32.xlu2 %v4409_v59, %s3932_s29  ;;  %v608_v41 = vrot.slane %v606_v24, 4  ;;  %v4428_v30 = vsel %vm4370_vm8, %v745_v8, %v750_v23  ;;  %v6799_v24 = vshll.u32 %v4182_v55, 16 }
  0x5c   : > { %6797 = vst [vmem:[#allocation19_spill] sm:$0xff] %v4428_v30  ;;  %v622_v23 = vrot.slane %v620_v5, 4  ;;  %v623_v8 = vrot.slane %v4247_v33, 5 }
  0x5d   : > { %v740_v26 = vrot.slane %v739_v27, 4  ;;  %v768_v19 = vrot.slane %v6799_v24, 6  ;;  %v4448_v27 = vsel %vm4296_vm5, %v608_v41, %v609_v58  ;;  %v634_v24 = vrot.slane %v4222_v61, 5 }
  0x5e   : > { %6802 = vst [vmem:[#allocation20_spill] sm:$0xff] %v4448_v27  ;;  %v3646_v58 = vrot.slane %v4101_v44, 9 }
  0x5f   : > { %657 = vrot.lane.b32.xlu1 %v4413_v39, %s3932_s29  ;;  %v4432_v53 = vsel %vm4370_vm8, %v740_v26, %v743_v62  ;;  %v6801_v62 = vshll.u32 %v4104_v45, 16  ;;  %v769_v25 = vor.u32 %v768_v19, %v767_v9  ;;  %v636_v9 = vrot.slane %v634_v24, 4 }
  0x60   : > { %655 = vrot.lane.b32.xlu0 %v4417_v40, %s3932_s29  ;;  %v4459_v40 = vsel %vm4296_vm5, %v622_v23, %v623_v8  ;;  %v6806_v19 = vshrl.u32 %v4135_v13, 16  ;;  %v6807_v23 = vshll.u32 %v4135_v13, 16 }
  0x61   : > { %v772_v49 = vrot.slane %v6801_v62, 6  ;;  %v770_v3 = vrot.slane %v769_v25, 4  ;;  %6804 = vst [vmem:[#allocation22_spill] sm:$0xff] %v4459_v40  ;;  %v791_v62 = vshrl.u32 %v4247_v33, 16  ;;  %v6808_v25 = vshll.u32 %v4247_v33, 16 }
  0x62   : > { %v787_v8 = vrot.slane %v6807_v23, 6 }
  0x63   : > { %v4450_v26 = vor.u32 %v772_v49, %v771_v10  ;;  %653 = vrot.lane.b32.xlu2 %v4448_v27, %s3932_s29  ;;  %v786_v10 = vrot.slane %v6806_v19, 5  ;;  %v3648_v49 = vrot.slane %v4256_v42, 9  ;;  %v793_v27 = vrot.slane %v791_v62, 5 }
  0x64   : > { %v4490_v19 = vsel %vm4296_vm5, %v636_v9, %v637_v14  ;;  %v630_v14 = vrot.slane %v4213_v51, 5  ;;  %v6814_v9 = vshll.u32 %v4030_v2, 16 }
  0x65   : > { %v4466_v41 = vsel %vm4370_vm8, %v770_v3, %v4450_v26  ;;  %v794_v3 = vrot.slane %v6808_v25, 6  ;;  %6810 = vst [vmem:[#allocation25_spill] sm:$0xff] %v4490_v19  ;;  %v4495_v59 = vsel %vm4296_vm5, %v3648_v49, %v634_v24 }
  0x66   : > { %6805 = vst [vmem:[#allocation23_spill] sm:$0xff] %v4466_v41  ;;  %v708_v24 = vrot.slane %v6814_v9, 6  ;;  %v6819_v9 = vshll.u32 %v4057_v18, 16 }
  0x67   : > { %663 = vrot.lane.b32.xlu1 %v4454_v31, %s3932_s29  ;;  %v4482_v31 = vor.u32 %v787_v8, %v786_v10  ;;  %v795_v39 = vor.u32 %v794_v3, %v793_v27  ;;  %6811 = vst [vmem:[#allocation26_spill] sm:$0xff] %v4495_v59  ;;  %v3933_v8 = vmov 0  }
  0x68   : > { %661 = vrot.lane.b32.xlu0 %v4459_v40, %s3932_s29  ;;  %v4486_v40 = vsel %vm4296_vm5, %v3646_v58, %v620_v5  ;;  %v629_v5 = vrot.slane %v627_v48, 4  ;;  %v6813_v58 = vshrl.u32 %v4030_v2, 16  ;;  %226 = vst.msk [vmem:[#allocation2 + $0x8] sm:$0xf] %vm223_vm9, %v3933_v8  ;;  %v6816_v48 = vshll.u32 %v4256_v42, 16 }
  0x69   : > { %6809 = vst [vmem:[#allocation24_spill] sm:$0xff] %v4486_v40  ;;  %v790_v23 = vrot.slane %v4482_v31, 4 }
  0x6a   : > { %v707_v27 = vrot.slane %v6813_v58, 5  ;;  %v4519_v49 = vrot.slane %v6816_v48, 6  ;;  %282 = vst.msk [vmem:[#allocation2 + $0x8] sm:$0xf] %vm279_vm10, %v4024_v0  ;;  %v4525_v25 = vsel %vm4296_vm5, %v629_v5, %v630_v14  ;;  %v731_v14 = vshrl.u32 %v4052_v16, 16 }
  0x6b   : > { %659 = vrot.lane.b32.xlu2 %v4486_v40, %s3932_s29  ;;  %v4501_v10 = vsel %vm4370_vm8, %v790_v23, %v795_v39  ;;  %v6815_v39 = vshrl.u32 %v4256_v42, 16  ;;  %6817 = vst [vmem:[#allocation28_spill] sm:$0xff] %v4525_v25  ;;  %v6818_v58 = vshrl.u32 %v4057_v18, 16 }
  0x6c   : > { %6812 = vst [vmem:[#allocation27_spill] sm:$0xff] %v4501_v10  ;;  %v709_v3 = vor.u32 %v708_v24, %v707_v27  ;;  %v757_v24 = vrot.slane %v6819_v9, 6 }
  0x6d   : > { %v4515_v62 = vrot.slane %v6815_v39, 5  ;;  %224 = vst.msk [vmem:[#allocation2] sm:$0xf] %vm223_vm9, %v3933_v8  ;;  %v756_v27 = vrot.slane %v6818_v58, 5  ;;  %v761_v39 = vshrl.u32 %v4090_v38, 16 }
  0x6e   : > { %225 = vst.msk [vmem:[#allocation2 + $0x4] sm:$0xf] %vm223_vm9, %v3933_v8  ;;  %v710_v5 = vrot.slane %v709_v3, 4  ;;  %v733_v3 = vrot.slane %v731_v14, 5  ;;  %v6822_v14 = vshrl.u32 %v4076_v28, 16 }
  0x6f   : > { %669 = vrot.lane.b32.xlu1 %v4490_v19, %s3932_s29  ;;  %227 = vst.msk [vmem:[#allocation2 + $0xc] sm:$0xf] %vm223_vm9, %v3933_v8  ;;  %v758_v58 = vor.u32 %v757_v24, %v756_v27  ;;  %v763_v9 = vrot.slane %v761_v39, 5  ;;  %v6823_v24 = vshll.u32 %v4076_v28, 16 }
  0x70   : > { %667 = vrot.lane.b32.xlu0 %v4495_v59, %s3932_s29  ;;  %228 = vst.msk [vmem:[#allocation2 + $0x10] sm:$0xf] %vm223_vm9, %v3933_v8  ;;  %v714_v48 = vsel %vm4370_vm8, %v710_v5, %v4361_v4  ;;  %v730_v4 = vrot.slane %v4359_v34, 4  ;;  %v752_v27 = vrot.slane %v6822_v14, 5  ;;  %v6825_v34 = vshll.u32 %v4101_v44, 16 }
  0x71   : > { %229 = vst.msk [vmem:[#allocation2 + $0x14] sm:$0xf] %vm223_vm9, %v3933_v8  ;;  %v760_v39 = vrot.slane %v758_v58, 4 }
  0x72   : > { %230 = vst.msk [vmem:[#allocation2 + $0x18] sm:$0xf] %vm223_vm9, %v3933_v8 }
  0x73   : > { %665 = vrot.lane.b32.xlu2 %v4525_v25, %s3932_s29  ;;  %231 = vst.msk [vmem:[#allocation2 + $0x1c] sm:$0xf] %vm223_vm9, %v3933_v8  ;;  %s3951_s29 = smov 80  }
  0x74   : > { %232 = vst.msk [vmem:[#allocation2 + $0x20] sm:$0xf] %vm223_vm9, %v3933_v8 }
  0x75   : > { %233 = vst.msk [vmem:[#allocation2 + $0x24] sm:$0xf] %vm223_vm9, %v3933_v8 }
  0x76   : > { %234 = vst.msk [vmem:[#allocation2 + $0x28] sm:$0xf] %vm223_vm9, %v3933_v8 }
  0x77   : > { %831 = vrot.lane.b32.xlu1 %v4387_v46, %s3934_s30  ;;  %v6821_v46 = vshll.u32 %v4090_v38, 16  ;;  %235 = vst.msk [vmem:[#allocation2 + $0x2c] sm:$0xf] %vm223_vm9, %v3933_v8 }
  0x78   : > { %829 = vrot.lane.b32.xlu0 %v4394_v63, %s3934_s30  ;;  %v6820_v63 = vshll.u32 %v4052_v16, 16  ;;  %236 = vst.msk [vmem:[#allocation2 + $0x30] sm:$0xf] %vm223_vm9, %v3933_v8 }
  0x79   : > { %v764_v25 = vrot.slane %v6821_v46, 6  ;;  %237 = vst.msk [vmem:[#allocation2 + $0x34] sm:$0xf] %vm223_vm9, %v3933_v8  ;;  %v753_v46 = vrot.slane %v6823_v24, 6 }
  0x7a   : > { %v734_v23 = vrot.slane %v6820_v63, 6  ;;  %238 = vst.msk [vmem:[#allocation2 + $0x38] sm:$0xf] %vm223_vm9, %v3933_v8  ;;  %v6824_v63 = vshrl.u32 %v4101_v44, 16 }
  0x7b   : > { %827 = vrot.lane.b32.xlu2 %v714_v48, %s3934_s30  ;;  %v765_v48 = vor.u32 %v764_v25, %v763_v9  ;;  %239 = vst.msk [vmem:[#allocation2 + $0x3c] sm:$0xf] %vm223_vm9, %v3933_v8  ;;  %v754_v14 = vor.u32 %v753_v46, %v752_v27  ;;  %v6827_v27 = vshrl.u32 %v4163_v37, 16  ;;  %v6828_v46 = vshll.u32 %v4163_v37, 16 }
  0x7c   : > { %v735_v5 = vor.u32 %v734_v23, %v733_v3  ;;  %v783_v23 = vrot.slane %v6825_v34, 6  ;;  %280 = vst.msk [vmem:[#allocation2] sm:$0xf] %vm279_vm10, %v4030_v2  ;;  %vm1380_vm9 = vcmask 322848  }
  0x7d   : > { %281 = vst.msk [vmem:[#allocation2 + $0x4] sm:$0xf] %vm279_vm10, %v4036_v6  ;;  %v4589_v25 = vsel %vm4370_vm8, %v760_v39, %v765_v48  ;;  %v755_v8 = vrot.slane %v754_v14, 4  ;;  %v801_v24 = vrot.slane %v6827_v27, 5  ;;  %v802_v39 = vrot.slane %v6828_v46, 6 }
  0x7e   : > { %v4581_v3 = vsel %vm4370_vm8, %v730_v4, %v735_v5  ;;  %283 = vst.msk [vmem:[#allocation2 + $0xc] sm:$0xf] %vm279_vm10, %v4027_v1  ;;  %v776_v4 = vshrl.u32 %v4146_v20, 16  ;;  %v806_v48 = vshrl.u32 %v4213_v51, 16  ;;  %v6832_v46 = vshll.u32 %v4222_v61, 16 }
  0x7f   : > { %837 = vrot.lane.b32.xlu1 %v4428_v30, %s3934_s30  ;;  %v782_v30 = vrot.slane %v6824_v63, 5  ;;  %6826 = vst [vmem:[#allocation29_spill] sm:$0xff] %v4589_v25  ;;  %v4619_v63 = vsel %vm4370_vm8, %v755_v8, %v758_v58  ;;  %v803_v58 = vor.u32 %v802_v39, %v801_v24  ;;  %v6835_v24 = vshrl.u32 %v4168_v43, 16 }
  0x80   : > { %835 = vrot.lane.b32.xlu0 %v4432_v53, %s3934_s30  ;;  %284 = vst.msk [vmem:[#allocation2 + $0x10] sm:$0xf] %vm279_vm10, %v4113_v50  ;;  %v778_v34 = vrot.slane %v776_v4, 5  ;;  %v808_v8 = vrot.slane %v806_v48, 5  ;;  %v6834_v4 = vshll.u32 %v4213_v51, 16  ;;  %v6836_v48 = vshll.u32 %v4168_v43, 16 }
  0x81   : > { %v784_v9 = vor.u32 %v783_v23, %v782_v30  ;;  %285 = vst.msk [vmem:[#allocation2 + $0x14] sm:$0xf] %vm279_vm10, %v4117_v52  ;;  %v6830_v23 = vshll.u32 %v4146_v20, 16  ;;  %v797_v39 = vrot.slane %v6835_v24, 5 }
  0x82   : > { %286 = vst.msk [vmem:[#allocation2 + $0x18] sm:$0xf] %vm279_vm10, %v4076_v28 }
  0x83   : > { %833 = vrot.lane.b32.xlu2 %v4581_v3, %s3934_s30  ;;  %287 = vst.msk [vmem:[#allocation2 + $0x1c] sm:$0xf] %vm279_vm10, %v4057_v18  ;;  %v785_v5 = vrot.slane %v784_v9, 4  ;;  %v779_v14 = vrot.slane %v6830_v23, 6  ;;  %v6831_v9 = vshrl.u32 %v4222_v61, 16  ;;  %v809_v23 = vrot.slane %v6834_v4, 6 }
  0x84   : > { %288 = vst.msk [vmem:[#allocation2 + $0x20] sm:$0xf] %vm279_vm10, %v4182_v55 }
  0x85   : > { %v500_v30 = vpop.permute.xlu2 %499  ;;  %289 = vst.msk [vmem:[#allocation2 + $0x24] sm:$0xf] %vm279_vm10, %v4104_v45  ;;  %v816_v27 = vrot.slane %v6831_v9, 5  ;;  %v798_v9 = vrot.slane %v6836_v48, 6 }
  0x86   : > { %290 = vst.msk [vmem:[#allocation2 + $0x28] sm:$0xf] %vm279_vm10, %v4101_v44 }
  0x87   : > { %843 = vrot.lane.b32.xlu1 %v4466_v41, %s3934_s30  ;;  %6829 = vst [vmem:[#allocation30_spill] sm:$0xff] %v4619_v63  ;;  %v4632_v41 = vsel %vm4370_vm8, %v785_v5, %v4482_v31  ;;  %v775_v31 = vrot.slane %v4450_v26, 4  ;;  %v780_v5 = vor.u32 %v779_v14, %v778_v34  ;;  %v805_v34 = vrot.slane %v803_v58, 4 }
  0x88   : > { %841 = vrot.lane.b32.xlu0 %v4589_v25, %s3934_s30  ;;  %291 = vst.msk [vmem:[#allocation2 + $0x2c] sm:$0xf] %vm279_vm10, %v4135_v13  ;;  %v817_v25 = vrot.slane %v6832_v46, 6  ;;  %v6837_v46 = vor.u32 %v4519_v49, %v4515_v62  ;;  %v810_v14 = vor.u32 %v809_v23, %v808_v8  ;;  %v897_v49 = vrot.slane %v4036_v6, 6 }
  0x89   : > { %6833 = vst [vmem:[#allocation31_spill] sm:$0xff] %v4632_v41  ;;  %v4663_v48 = vsel %vm4370_vm8, %v775_v31, %v780_v5  ;;  %v900_v6 = vrot.slane %v4062_v21, 6  ;;  %v3649_v5 = vrot.slane %v4030_v2, 10 }
  0x8a   : > { %292 = vst.msk [vmem:[#allocation2 + $0x30] sm:$0xf] %vm279_vm10, %v4168_v43  ;;  %v815_v4 = vrot.slane %v6837_v46, 4 }
  0x8b   : > { %293 = vst.msk [vmem:[#allocation2 + $0x34] sm:$0xf] %vm279_vm10, %v4163_v37  ;;  %839 = vrot.lane.b32.xlu2 %v4619_v63, %s3934_s30  ;;  %v898_v2 = vsel %vm4683_vm14, %v3649_v5, %v897_v49  ;;  %v3650_v5 = vrot.slane %v4024_v0, 10 }
  0x8c   : > { %294 = vst.msk [vmem:[#allocation2 + $0x38] sm:$0xf] %vm279_vm10, %v4256_v42 }
  0x8d   : > { %295 = vst.msk [vmem:[#allocation2 + $0x3c] sm:$0xf] %vm279_vm10, %v4222_v61  ;;  %v502_v63 = vpop.permute.xlu2 %501  ;;  %vm1447_vm10 = vcmask 355648  }
  0x8e   : > { %544 = vst.msk [vmem:[#allocation2 + $0x10] sm:$0xf] %vm539_vm11, %v500_v30 }
  0x8f   : > { %849 = vrot.lane.b32.xlu1 %v4501_v10, %s3934_s30  ;;  %v818_v10 = vor.u32 %v817_v25, %v816_v27  ;;  %545 = vst.msk [vmem:[#allocation2 + $0x14] sm:$0xf] %vm539_vm11, %v502_v63  ;;  %v4673_v25 = vsel %vm4370_vm8, %v805_v34, %v810_v14  ;;  %v821_v27 = vshrl.u32 %v4263_v57, 16  ;;  %v899_v63 = vrot.slane %v897_v49, 4 }
  0x90   : > { %847 = vrot.lane.b32.xlu0 %v4632_v41, %s3934_s30  ;;  %v799_v41 = vor.u32 %v798_v9, %v797_v39  ;;  %6838 = vst [vmem:[#allocation32_spill] sm:$0xff] %v4673_v25  ;;  %v6842_v9 = vshll.u32 %v4263_v57, 16  ;;  %v3651_v14 = vrot.slane %v4113_v50, 10  ;;  %v907_v49 = vrot.slane %v4052_v16, 6 }
  0x91   : > { %v496_v26 = vpop.permute.xlu1 %495  ;;  %v4667_v62 = vsel %vm4370_vm8, %v815_v4, %v818_v10  ;;  %v823_v21 = vrot.slane %v821_v27, 5  ;;  %v901_v4 = vsel %vm4683_vm14, %v899_v63, %v900_v6 }
  0x92   : > { %542 = vst.msk [vmem:[#allocation2 + $0x8] sm:$0xf] %vm539_vm11, %v496_v26  ;;  %v492_v24 = vpop.permute.xlu0 %491  ;;  %v800_v30 = vrot.slane %v799_v41, 4  ;;  %v824_v46 = vrot.slane %v6842_v9, 6  ;;  %v904_v26 = vrot.slane %v4027_v1, 6 }
  0x93   : > { %540 = vst.msk [vmem:[#allocation2] sm:$0xf] %vm539_vm11, %v492_v24  ;;  %845 = vrot.lane.b32.xlu2 %v4663_v48, %s3934_s30  ;;  %v911_v24 = vrot.slane %v4117_v52, 6 }
  0x94   : > { %v4693_v39 = vsel %vm4370_vm8, %v800_v30, %v803_v58  ;;  %v820_v58 = vrot.slane %v818_v10, 4  ;;  %v825_v34 = vor.u32 %v824_v46, %v823_v21  ;;  %v906_v63 = vrot.slane %v904_v26, 4 }
  0x95   : > { %v508_v8 = vpop.permute.xlu2 %507  ;;  %6841 = vst [vmem:[#allocation33_spill] sm:$0xff] %v4693_v39  ;;  %v921_v21 = vrot.slane %v4090_v38, 6 }
  0x96   : > { %548 = vst.msk [vmem:[#allocation2 + $0x20] sm:$0xf] %vm539_vm11, %v508_v8  ;;  %v4714_v10 = vsel %vm4370_vm8, %v820_v58, %v825_v34  ;;  %v4718_v8 = vsel %vm4683_vm14, %v3651_v14, %v911_v24  ;;  %v4723_v16 = vsel %vm4683_vm14, %v906_v63, %v907_v49  ;;  %v4739_v58 = vsel %vm4683_vm14, %v3650_v5, %v904_v26 }
  0x97   : > { %855 = vrot.lane.b32.xlu1 %v4667_v62, %s3934_s30  ;;  %v925_v14 = vrot.slane %v4104_v45, 6  ;;  %v914_v26 = vrot.slane %v4158_v29, 6  ;;  %v932_v63 = vrot.slane %v4135_v13, 6  ;;  %v928_v5 = vrot.slane %v4146_v20, 6 }
  0x98   : > { %853 = vrot.lane.b32.xlu0 %v4673_v25, %s3934_s30 }
  0x99   : > { %v498_v23 = vpop.permute.xlu1 %497 }
  0x9a   : > { %543 = vst.msk [vmem:[#allocation2 + $0xc] sm:$0xf] %vm539_vm11, %v498_v23  ;;  %v494_v41 = vpop.permute.xlu0 %493  ;;  %v918_v23 = vrot.slane %v4057_v18, 6 }
  0x9b   : > { %541 = vst.msk [vmem:[#allocation2 + $0x4] sm:$0xf] %vm539_vm11, %v494_v41  ;;  %851 = vrot.lane.b32.xlu2 %v4693_v39, %s3934_s30 }
  0x9c   : > { %v920_v41 = vrot.slane %v918_v23, 4 }
  0x9d   : > { %v514_v30 = vpop.permute.xlu2 %513 }
  0x9e   : > { %551 = vst.msk [vmem:[#allocation2 + $0x2c] sm:$0xf] %vm539_vm11, %v514_v30  ;;  %v4743_v34 = vsel %vm4683_vm14, %v920_v41, %v921_v21  ;;  %v913_v30 = vrot.slane %v911_v24, 4  ;;  %v939_v21 = vrot.slane %v4163_v37, 6 }
  0x9f   : > { %953 = vrot.lane.b32.xlu1 %v901_v4, %s3935_s5  ;;  %v3652_v4 = vrot.slane %v4076_v28, 10 }
  0xa0   : > { %951 = vrot.lane.b32.xlu0 %v898_v2, %s3935_s5  ;;  %v4765_v29 = vsel %vm4683_vm14, %v913_v30, %v914_v26  ;;  %v3655_v26 = vrot.slane %v4168_v43, 10 }
  0xa1   : > { %v506_v27 = vpop.permute.xlu1 %505  ;;  %v4747_v38 = vsel %vm4683_vm14, %v3652_v4, %v918_v23  ;;  %v927_v23 = vrot.slane %v925_v14, 4  ;;  %v942_v4 = vrot.slane %v4213_v51, 6 }
  0xa2   : > { %547 = vst.msk [vmem:[#allocation2 + $0x1c] sm:$0xf] %vm539_vm11, %v506_v27  ;;  %v504_v6 = vpop.permute.xlu0 %503  ;;  %v3654_v27 = vrot.slane %v4101_v44, 10  ;;  %v4798_v51 = vsel %vm4683_vm14, %v3655_v26, %v939_v21 }
  0xa3   : > { %546 = vst.msk [vmem:[#allocation2 + $0x18] sm:$0xf] %vm539_vm11, %v504_v6  ;;  %857 = vrot.lane.b32.xlu2 %v4714_v10, %s3934_s30  ;;  %v4774_v20 = vsel %vm4683_vm14, %v927_v23, %v928_v5  ;;  %v946_v23 = vrot.slane %v4222_v61, 6  ;;  %v934_v5 = vrot.slane %v932_v63, 4  ;;  %s3952_s30 = smov 84  }
  0xa4   : > { %v4769_v24 = vsel %vm4683_vm14, %v3654_v27, %v932_v63 }
  0xa5   : > { %v520_v9 = vpop.permute.xlu2 %519 }
  0xa6   : > { %554 = vst.msk [vmem:[#allocation2 + $0x38] sm:$0xf] %vm539_vm11, %v520_v9  ;;  %v3653_v9 = vrot.slane %v4182_v55, 10 }
  0xa7   : > { %959 = vrot.lane.b32.xlu1 %v4718_v8, %s3935_s5 }
  0xa8   : > { %957 = vrot.lane.b32.xlu0 %v4723_v16, %s3935_s5 }
  0xa9   : > { %v512_v46 = vpop.permute.xlu1 %511 }
  0xaa   : > { %550 = vst.msk [vmem:[#allocation2 + $0x28] sm:$0xf] %vm539_vm11, %v512_v46  ;;  %v510_v2 = vpop.permute.xlu0 %509  ;;  %v941_v46 = vrot.slane %v939_v21, 4  ;;  %v949_v21 = vrot.slane %v4263_v57, 6  ;;  %v3656_v57 = vrot.slane %v4256_v42, 10 }
  0xab   : > { %549 = vst.msk [vmem:[#allocation2 + $0x24] sm:$0xf] %vm539_vm11, %v510_v2  ;;  %955 = vrot.lane.b32.xlu2 %v4739_v58, %s3935_s5 }
  0xad   : > { %v642_v49 = vpop.permute.xlu2 %641 }
  0xae   : > { %689 = vst.msk [vmem:[#allocation2 + $0x4] sm:$0xf] %vm687_vm15, %v642_v49  ;;  %v4790_v49 = vsel %vm4683_vm14, %v3653_v9, %v925_v14  ;;  %v935_v14 = vrot.slane %v4247_v33, 6 }
  0xaf   : > { %965 = vrot.lane.b32.xlu1 %v4743_v34, %s3935_s5 }
  0xb0   : > { %963 = vrot.lane.b32.xlu0 %v4747_v38, %s3935_s5  ;;  %v4814_v63 = vsel %vm4683_vm14, %v934_v5, %v935_v14 }
  0xb1   : > { %v518_v6 = vpop.permute.xlu1 %517 }
  0xb2   : > { %553 = vst.msk [vmem:[#allocation2 + $0x34] sm:$0xf] %vm539_vm11, %v518_v6  ;;  %v516_v41 = vpop.permute.xlu0 %515  ;;  %v4794_v6 = vsel %vm4683_vm14, %v941_v46, %v942_v4  ;;  %v948_v46 = vrot.slane %v946_v23, 4 }
  0xb3   : > { %552 = vst.msk [vmem:[#allocation2 + $0x30] sm:$0xf] %vm539_vm11, %v516_v41  ;;  %961 = vrot.lane.b32.xlu2 %v4765_v29, %s3935_s5 }
  0xb4   : > { %v4818_v33 = vsel %vm4683_vm14, %v948_v46, %v949_v21 }
  0xb5   : > { %v648_v2 = vpop.permute.xlu2 %647 }
  0xb6   : > { %692 = vst.msk [vmem:[#allocation2 + $0x10] sm:$0xf] %vm687_vm15, %v648_v2 }
  0xb7   : > { %971 = vrot.lane.b32.xlu1 %v4769_v24, %s3935_s5 }
  0xb8   : > { %969 = vrot.lane.b32.xlu0 %v4774_v20, %s3935_s5 }
  0xb9   : > { %v640_v30 = vpop.permute.xlu1 %639 }
  0xba   : > { %688 = vst.msk [vmem:[#allocation2] sm:$0xf] %vm687_vm15, %v640_v30  ;;  %v522_v27 = vpop.permute.xlu0 %521 }
  0xbb   : > { %555 = vst.msk [vmem:[#allocation2 + $0x3c] sm:$0xf] %vm539_vm11, %v522_v27  ;;  %967 = vrot.lane.b32.xlu2 %v4790_v49, %s3935_s5  ;;  %v4832_v27 = vsel %vm4683_vm14, %v3656_v57, %v946_v23  ;;  %vm1536_vm11 = vcmask 388448  }
  0xbd   : > { %v654_v41 = vpop.permute.xlu2 %653 }
  0xbe   : > { %695 = vst.msk [vmem:[#allocation2 + $0x1c] sm:$0xf] %vm687_vm15, %v654_v41 }
  0xbf   : > { %977 = vrot.lane.b32.xlu1 %v4794_v6, %s3935_s5 }
  0xc0   : > { %975 = vrot.lane.b32.xlu0 %v4798_v51, %s3935_s5 }
  0xc1   : > { %v646_v9 = vpop.permute.xlu1 %645 }
  0xc2   : > { %691 = vst.msk [vmem:[#allocation2 + $0xc] sm:$0xf] %vm687_vm15, %v646_v9  ;;  %v644_v4 = vpop.permute.xlu0 %643 }
  0xc3   : > { %690 = vst.msk [vmem:[#allocation2 + $0x8] sm:$0xf] %vm687_vm15, %v644_v4  ;;  %973 = vrot.lane.b32.xlu2 %v4814_v63, %s3935_s5 }
  0xc5   : > { %v660_v2 = vpop.permute.xlu2 %659 }
  0xc6   : > { %698 = vst.msk [vmem:[#allocation2 + $0x28] sm:$0xf] %vm687_vm15, %v660_v2 }
  0xc7   : > { %1018 = vrot.lane.b32.xlu1 %v4024_v0, %s3936_s6 }
  0xc8   : > { %981 = vrot.lane.b32.xlu0 %v4818_v33, %s3935_s5 }
  0xc9   : > { %v652_v30 = vpop.permute.xlu1 %651 }
  0xca   : > { %694 = vst.msk [vmem:[#allocation2 + $0x18] sm:$0xf] %vm687_vm15, %v652_v30  ;;  %v650_v26 = vpop.permute.xlu0 %649  ;;  %v4871_v30 = vld [vmem:[%s4021_s27 + $0x64] sm:$0xf] }
  0xcb   : > { %693 = vst.msk [vmem:[#allocation2 + $0x14] sm:$0xf] %vm687_vm15, %v650_v26  ;;  %979 = vrot.lane.b32.xlu2 %v4832_v27, %s3935_s5  ;;  %v4874_v26 = vld [vmem:[%s4021_s27 + $0x60] sm:$0xf]  ;;  %s3953_s5 = smov 88  }
  0xcd   : > { %v666_v0 = vpop.permute.xlu2 %665 }
  0xce   : > { %701 = vst.msk [vmem:[#allocation2 + $0x34] sm:$0xf] %vm687_vm15, %v666_v0 }
  0xcf   : > { %1024 = vrot.lane.b32.xlu1 %v4117_v52, %s3936_s6 }
  0xd0   : > { %1022 = vrot.lane.b32.xlu0 %v4113_v50, %s3936_s6 }
  0xd1   : > { %v658_v5 = vpop.permute.xlu1 %657 }
  0xd2   : > { %697 = vst.msk [vmem:[#allocation2 + $0x24] sm:$0xf] %vm687_vm15, %v658_v5  ;;  %v656_v14 = vpop.permute.xlu0 %655 }
  0xd3   : > { %696 = vst.msk [vmem:[#allocation2 + $0x20] sm:$0xf] %vm687_vm15, %v656_v14  ;;  %1020 = vrot.lane.b32.xlu2 %v4027_v1, %s3936_s6 }
  0xd5   : > { %v828_v23 = vpop.permute.xlu2 %827 }
  0xd6   : > { %876 = vst.msk [vmem:[#allocation2] sm:$0xf] %vm875_vm0, %v828_v23 }
  0xd7   : > { %1030 = vrot.lane.b32.xlu1 %v4182_v55, %s3936_s6 }
  0xd8   : > { %1028 = vrot.lane.b32.xlu0 %v4057_v18, %s3936_s6 }
  0xd9   : > { %v664_v41 = vpop.permute.xlu1 %663 }
  0xda   : > { %700 = vst.msk [vmem:[#allocation2 + $0x30] sm:$0xf] %vm687_vm15, %v664_v41  ;;  %v662_v9 = vpop.permute.xlu0 %661 }
  0xdb   : > { %699 = vst.msk [vmem:[#allocation2 + $0x2c] sm:$0xf] %vm687_vm15, %v662_v9  ;;  %1026 = vrot.lane.b32.xlu2 %v4076_v28, %s3936_s6 }
  0xdd   : > { %v834_v1 = vpop.permute.xlu2 %833 }
  0xde   : > { %879 = vst.msk [vmem:[#allocation2 + $0xc] sm:$0xf] %vm875_vm0, %v834_v1 }
  0xdf   : > { %1036 = vrot.lane.b32.xlu1 %v4135_v13, %s3936_s6 }
  0xe0   : > { %1034 = vrot.lane.b32.xlu0 %v4101_v44, %s3936_s6 }
  0xe1   : > { %v670_v46 = vpop.permute.xlu1 %669 }
  0xe2   : > { %703 = vst.msk [vmem:[#allocation2 + $0x3c] sm:$0xf] %vm687_vm15, %v670_v46  ;;  %v668_v21 = vpop.permute.xlu0 %667 }
  0xe3   : > { %702 = vst.msk [vmem:[#allocation2 + $0x38] sm:$0xf] %vm687_vm15, %v668_v21  ;;  %1032 = vrot.lane.b32.xlu2 %v4104_v45, %s3936_s6  ;;  %v6724_v21 = vshrl.u32 %v4874_v26, 16  ;;  %vm1761_vm15 = vcmask 486848  }
  0xe5   : > { %v840_v4 = vpop.permute.xlu2 %839 }
  0xe6   : > { %882 = vst.msk [vmem:[#allocation2 + $0x18] sm:$0xf] %vm875_vm0, %v840_v4  ;;  %v6723_v4 = vshll.u32 %v4874_v26, 16 }
  0xe7   : > { %1042 = vrot.lane.b32.xlu1 %v4256_v42, %s3936_s6 }
  0xe8   : > { %1040 = vrot.lane.b32.xlu0 %v4163_v37, %s3936_s6 }
  0xe9   : > { %v832_v57 = vpop.permute.xlu1 %831 }
  0xea   : > { %878 = vst.msk [vmem:[#allocation2 + $0x8] sm:$0xf] %vm875_vm0, %v832_v57  ;;  %v830_v2 = vpop.permute.xlu0 %829  ;;  %v1086_v57 = vrot.slane %v6724_v21, 4 }
  0xeb   : > { %877 = vst.msk [vmem:[#allocation2 + $0x4] sm:$0xf] %vm875_vm0, %v830_v2  ;;  %1038 = vrot.lane.b32.xlu2 %v4168_v43, %s3936_s6  ;;  %v1089_v2 = vrot.slane %v6723_v4, 5 }
  0xed   : > { %v846_v0 = vpop.permute.xlu2 %845 }
  0xee   : > { %885 = vst.msk [vmem:[#allocation2 + $0x24] sm:$0xf] %vm875_vm0, %v846_v0 }
  0xef   : > { %1048 = vrot.lane.b32.xlu1 %v4871_v30, %s3936_s6 }
  0xf0   : > { %1046 = vrot.lane.b32.xlu0 %v4874_v26, %s3936_s6 }
  0xf1   : > { %v838_v5 = vpop.permute.xlu1 %837 }
  0xf2   : > { %881 = vst.msk [vmem:[#allocation2 + $0x14] sm:$0xf] %vm875_vm0, %v838_v5  ;;  %v836_v14 = vpop.permute.xlu0 %835 }
  0xf3   : > { %880 = vst.msk [vmem:[#allocation2 + $0x10] sm:$0xf] %vm875_vm0, %v836_v14  ;;  %1044 = vrot.lane.b32.xlu2 %v4222_v61, %s3936_s6  ;;  %v1090_v14 = vor.u32 %v1089_v2, %v1086_v57  ;;  %s3954_s6 = smov 92  }
  0xf5   : > { %v852_v23 = vpop.permute.xlu2 %851 }
  0xf6   : > { %888 = vst.msk [vmem:[#allocation2 + $0x30] sm:$0xf] %vm875_vm0, %v852_v23  ;;  %v6725_v23 = vshll.u32 %v4871_v30, 16 }
  0xf7   : > { %1111 = vrot.lane.b32.xlu1 %v4190_v12, %s3937_s7 }
  0xf8   : > { %1109 = vrot.lane.b32.xlu0 %v4123_v56, %s3937_s7 }
  0xf9   : > { %v844_v41 = vpop.permute.xlu1 %843 }
  0xfa   : > { %884 = vst.msk [vmem:[#allocation2 + $0x20] sm:$0xf] %vm875_vm0, %v844_v41  ;;  %v842_v9 = vpop.permute.xlu0 %841  ;;  %v1091_v41 = vrot.slane %v1090_v14, 4  ;;  %v6846_v14 = vld [vmem:[#allocation9_spill] sm:$0xff] }
  0xfb   : > { %883 = vst.msk [vmem:[#allocation2 + $0x1c] sm:$0xf] %vm875_vm0, %v842_v9  ;;  %1107 = vrot.lane.b32.xlu2 %v4082_v35, %s3937_s7  ;;  %v1095_v9 = vrot.slane %v6725_v23, 5  ;;  %v6847_v23 = vld [vmem:[#allocation10_spill] sm:$0xff] }
  0xfd   : > { %v858_v1 = vpop.permute.xlu2 %857  ;;  %v4933_v2 = vsel %vm4067_vm2, %v1091_v41, %v1095_v9 }
  0xfe   : > { %891 = vst.msk [vmem:[#allocation2 + $0x3c] sm:$0xf] %vm875_vm0, %v858_v1 }
  0xff   : > { %1117 = vrot.lane.b32.xlu1 %v4173_v47, %s3937_s7  ;;  %6844 = vst [vmem:[#allocation34_spill] sm:$0xff] %v4933_v2 }
 0x100   : > { %1115 = vrot.lane.b32.xlu0 %v4186_v54, %s3937_s7 }
 0x101   : > { %v850_v56 = vpop.permute.xlu1 %849 }
 0x102   : > { %887 = vst.msk [vmem:[#allocation2 + $0x2c] sm:$0xf] %vm875_vm0, %v850_v56  ;;  %v848_v46 = vpop.permute.xlu0 %847 }
 0x103   : > { %886 = vst.msk [vmem:[#allocation2 + $0x28] sm:$0xf] %vm875_vm0, %v848_v46  ;;  %1113 = vrot.lane.b32.xlu2 %v4228_v60, %s3937_s7 }
 0x105   : > { %v956_v35 = vpop.permute.xlu2 %955 }
 0x106   : > { %1002 = vst.msk [vmem:[#allocation2 + $0x8] sm:$0xf] %vm999_vm1, %v956_v35  ;;  %v6726_v35 = vshrl.u32 %v4871_v30, 16 }
 0x107   : > { %1123 = vrot.lane.b32.xlu1 %v4233_v15, %s3937_s7 }
 0x108   : > { %1121 = vrot.lane.b32.xlu0 %v4238_v7, %s3937_s7 }
 0x109   : > { %v856_v0 = vpop.permute.xlu1 %855 }
 0x10a   : > { %890 = vst.msk [vmem:[#allocation2 + $0x38] sm:$0xf] %vm875_vm0, %v856_v0  ;;  %v854_v5 = vpop.permute.xlu0 %853  ;;  %v6845_v0 = vld [vmem:[#allocation8_spill] sm:$0xff] }
 0x10b   : > { %889 = vst.msk [vmem:[#allocation2 + $0x34] sm:$0xf] %vm875_vm0, %v854_v5  ;;  %1119 = vrot.lane.b32.xlu2 %v4269_v17, %s3937_s7  ;;  %v1099_v5 = vrot.slane %v6726_v35, 4  ;;  %v6848_v35 = vld [vmem:[#allocation11_spill] sm:$0xff]  ;;  %vm1828_vm0 = vcmask 519648  }
 0x10d   : > { %v962_v1 = vpop.permute.xlu2 %961  ;;  %v1100_v4 = vor.u32 %v1099_v5, %v1095_v9 }
 0x10e   : > { %1005 = vst.msk [vmem:[#allocation2 + $0x14] sm:$0xf] %vm999_vm1, %v962_v1 }
 0x10f   : > { %1129 = vrot.lane.b32.xlu1 %v4275_v32, %s3937_s7 }
 0x110   : > { %1127 = vrot.lane.b32.xlu0 %v4279_v22, %s3937_s7 }
 0x111   : > { %v954_v56 = vpop.permute.xlu1 %953 }
 0x112   : > { %1001 = vst.msk [vmem:[#allocation2 + $0x4] sm:$0xf] %vm999_vm1, %v954_v56  ;;  %v952_v46 = vpop.permute.xlu0 %951  ;;  %v4944_v56 = vld [vmem:[%s4021_s27 + $0x68] sm:$0x3] }
 0x113   : > { %1000 = vst.msk [vmem:[#allocation2] sm:$0xf] %vm999_vm1, %v952_v46  ;;  %1125 = vrot.lane.b32.xlu2 %v6845_v0, %s3937_s7  ;;  %v6729_v21 = vshll.u32 %v4944_v56, 16 }
 0x115   : > { %v968_v1 = vpop.permute.xlu2 %967 }
 0x116   : > { %1008 = vst.msk [vmem:[#allocation2 + $0x20] sm:$0xf] %vm999_vm1, %v968_v1  ;;  %v6849_v1 = vld [vmem:[#allocation12_spill] sm:$0xff] }
 0x117   : > { %1135 = vrot.lane.b32.xlu1 %v4933_v2, %s3937_s7  ;;  %v1105_v2 = vrot.slane %v6729_v21, 5 }
 0x118   : > { %1133 = vrot.lane.b32.xlu0 %v6846_v14, %s3937_s7  ;;  %v1101_v14 = vrot.slane %v1100_v4, 4  ;;  %v6851_v4 = vld [vmem:[#allocation13_spill] sm:$0xff] }
 0x119   : > { %v960_v46 = vpop.permute.xlu1 %959 }
 0x11a   : > { %1004 = vst.msk [vmem:[#allocation2 + $0x10] sm:$0xf] %vm999_vm1, %v960_v46  ;;  %v958_v41 = vpop.permute.xlu0 %957  ;;  %v4963_v5 = vsel %vm4067_vm2, %v1101_v14, %v1105_v2  ;;  %v6853_v2 = vld [vmem:[#allocation16_spill] sm:$0xff]  ;;  %v6854_v14 = vld [vmem:[#allocation17_spill] sm:$0xff] }
 0x11b   : > { %1003 = vst.msk [vmem:[#allocation2 + $0xc] sm:$0xf] %vm999_vm1, %v958_v41  ;;  %1131 = vrot.lane.b32.xlu2 %v6847_v23, %s3937_s7 }
 0x11c   : > { %6850 = vst [vmem:[#allocation11_spill] sm:$0xff] %v4963_v5 }
 0x11d   : > { %v974_v46 = vpop.permute.xlu2 %973 }
 0x11e   : > { %1011 = vst.msk [vmem:[#allocation2 + $0x2c] sm:$0xf] %vm999_vm1, %v974_v46  ;;  %v6855_v46 = vld [vmem:[#allocation18_spill] sm:$0xff] }
 0x11f   : > { %1182 = vrot.lane.b32.xlu1 %v6848_v35, %s3938_s8  ;;  %v6852_v35 = vld [vmem:[#allocation14_spill] sm:$0xff] }
 0x120   : > { %1180 = vrot.lane.b32.xlu0 %v6849_v1, %s3938_s8 }
 0x121   : > { %v966_v0 = vpop.permute.xlu1 %965 }
 0x122   : > { %1007 = vst.msk [vmem:[#allocation2 + $0x1c] sm:$0xf] %vm999_vm1, %v966_v0  ;;  %v964_v9 = vpop.permute.xlu0 %963 }
 0x123   : > { %1006 = vst.msk [vmem:[#allocation2 + $0x18] sm:$0xf] %vm999_vm1, %v964_v9  ;;  %1137 = vrot.lane.b32.xlu2 %v4963_v5, %s3937_s7  ;;  %s3955_s7 = smov 96  }
 0x125   : > { %v980_v41 = vpop.permute.xlu2 %979 }
 0x126   : > { %1014 = vst.msk [vmem:[#allocation2 + $0x38] sm:$0xf] %vm999_vm1, %v980_v41 }
 0x127   : > { %1188 = vrot.lane.b32.xlu1 %v6851_v4, %s3938_s8 }
 0x128   : > { %1186 = vrot.lane.b32.xlu0 %v6852_v35, %s3938_s8 }
 0x129   : > { %v972_v1 = vpop.permute.xlu1 %971 }
 0x12a   : > { %1010 = vst.msk [vmem:[#allocation2 + $0x28] sm:$0xf] %vm999_vm1, %v972_v1  ;;  %v970_v0 = vpop.permute.xlu0 %969  ;;  %v6856_v1 = vld [vmem:[#allocation20_spill] sm:$0xff] }
 0x12b   : > { %1009 = vst.msk [vmem:[#allocation2 + $0x24] sm:$0xf] %vm999_vm1, %v970_v0  ;;  %1184 = vrot.lane.b32.xlu2 %v6853_v2, %s3938_s8  ;;  %v6857_v0 = vld [vmem:[#allocation21_spill] sm:$0xff] }
 0x12d   : > { %v1021_v9 = vpop.permute.xlu2 %1020 }
 0x12e   : > { %1068 = vst.msk [vmem:[#allocation2 + $0x4] sm:$0xf] %vm1066_vm3, %v1021_v9 }
 0x12f   : > { %1194 = vrot.lane.b32.xlu1 %v6854_v14, %s3938_s8  ;;  %v6858_v14 = vld [vmem:[#allocation22_spill] sm:$0xff] }
 0x130   : > { %1192 = vrot.lane.b32.xlu0 %v6855_v46, %s3938_s8 }
 0x131   : > { %v978_v21 = vpop.permute.xlu1 %977 }
 0x132   : > { %1013 = vst.msk [vmem:[#allocation2 + $0x34] sm:$0xf] %vm999_vm1, %v978_v21  ;;  %v976_v41 = vpop.permute.xlu0 %975  ;;  %v1175_v21 = vrot.slane %v4871_v30, 5 }
 0x133   : > { %1012 = vst.msk [vmem:[#allocation2 + $0x30] sm:$0xf] %vm999_vm1, %v976_v41  ;;  %1190 = vrot.lane.b32.xlu2 %v6856_v1, %s3938_s8 }
 0x135   : > { %v1027_v2 = vpop.permute.xlu2 %1026 }
 0x136   : > { %1071 = vst.msk [vmem:[#allocation2 + $0x10] sm:$0xf] %vm1066_vm3, %v1027_v2  ;;  %v1178_v2 = vrot.slane %v4944_v56, 5 }
 0x137   : > { %1200 = vrot.lane.b32.xlu1 %v6857_v0, %s3938_s8  ;;  %v1177_v0 = vrot.slane %v1175_v21, 4 }
 0x138   : > { %1198 = vrot.lane.b32.xlu0 %v6858_v14, %s3938_s8 }
 0x139   : > { %v1019_v46 = vpop.permute.xlu1 %1018 }
 0x13a   : > { %1067 = vst.msk [vmem:[#allocation2] sm:$0xf] %vm1066_vm3, %v1019_v46  ;;  %v982_v9 = vpop.permute.xlu0 %981 }
 0x13b   : > { %1015 = vst.msk [vmem:[#allocation2 + $0x3c] sm:$0xf] %vm999_vm1, %v982_v9  ;;  %1196 = vrot.lane.b32.xlu2 %v4486_v40, %s3938_s8  ;;  %v5005_v9 = vsel %vm4296_vm5, %v1177_v0, %v1178_v2  ;;  %v3657_v40 = vrot.slane %v4874_v26, 9  ;;  %v6863_v2 = vshll.u32 %v4871_v30, 16  ;;  %vm1917_vm1 = vcmask 552448  }
 0x13c   : > { %6859 = vst [vmem:[#allocation12_spill] sm:$0xff] %v5005_v9 }
 0x13d   : > { %v1033_v41 = vpop.permute.xlu2 %1032  ;;  %v1250_v1 = vrot.slane %v6863_v2, 6  ;;  %v6865_v2 = vld [vmem:[#allocation19_spill] sm:$0xff] }
 0x13e   : > { %1074 = vst.msk [vmem:[#allocation2 + $0x1c] sm:$0xf] %vm1066_vm3, %v1033_v41 }
 0x13f   : > { %1206 = vrot.lane.b32.xlu1 %v4490_v19, %s3938_s8  ;;  %v6860_v19 = vld [vmem:[#allocation28_spill] sm:$0xff] }
 0x140   : > { %1204 = vrot.lane.b32.xlu0 %v4495_v59, %s3938_s8  ;;  %v6861_v59 = vld [vmem:[#allocation15_spill] sm:$0xff] }
 0x141   : > { %v1025_v14 = vpop.permute.xlu1 %1024 }
 0x142   : > { %1070 = vst.msk [vmem:[#allocation2 + $0xc] sm:$0xf] %vm1066_vm3, %v1025_v14  ;;  %v1023_v46 = vpop.permute.xlu0 %1022 }
 0x143   : > { %1069 = vst.msk [vmem:[#allocation2 + $0x8] sm:$0xf] %vm1066_vm3, %v1023_v46  ;;  %1202 = vrot.lane.b32.xlu2 %v6860_v19, %s3938_s8  ;;  %v6862_v46 = vshrl.u32 %v4871_v30, 16  ;;  %v1254_v19 = vshrl.u32 %v4944_v56, 16 }
 0x145   : > { %v1039_v14 = vpop.permute.xlu2 %1038  ;;  %v1249_v0 = vrot.slane %v6862_v46, 5  ;;  %v1256_v4 = vrot.slane %v1254_v19, 5 }
 0x146   : > { %1077 = vst.msk [vmem:[#allocation2 + $0x28] sm:$0xf] %vm1066_vm3, %v1039_v14  ;;  %v6864_v14 = vshll.u32 %v4944_v56, 16 }
 0x147   : > { %1260 = vrot.lane.b32.xlu1 %v6861_v59, %s3939_s9  ;;  %v1251_v35 = vor.u32 %v1250_v1, %v1249_v0 }
 0x148   : > { %1210 = vrot.lane.b32.xlu0 %v5005_v9, %s3938_s8  ;;  %v5024_v9 = vsel %vm4296_vm5, %v3657_v40, %v1175_v21  ;;  %v1257_v5 = vrot.slane %v6864_v14, 6  ;;  %v6870_v14 = vld [vmem:[#allocation31_spill] sm:$0xff] }
 0x149   : > { %v1031_v41 = vpop.permute.xlu1 %1030  ;;  %v1253_v46 = vrot.slane %v1251_v35, 4 }
 0x14a   : > { %1073 = vst.msk [vmem:[#allocation2 + $0x18] sm:$0xf] %vm1066_vm3, %v1031_v41  ;;  %v1029_v59 = vpop.permute.xlu0 %1028  ;;  %v1258_v23 = vor.u32 %v1257_v5, %v1256_v4  ;;  %v6866_v4 = vld [vmem:[#allocation23_spill] sm:$0xff] }
 0x14b   : > { %1072 = vst.msk [vmem:[#allocation2 + $0x14] sm:$0xf] %vm1066_vm3, %v1029_v59  ;;  %1208 = vrot.lane.b32.xlu2 %v5024_v9, %s3938_s8  ;;  %v6868_v59 = vld [vmem:[#allocation30_spill] sm:$0xff] }
 0x14c   : > { %v5034_v41 = vsel %vm4370_vm8, %v1253_v46, %v1258_v23  ;;  %v6867_v23 = vld [vmem:[#allocation29_spill] sm:$0xff] }
 0x14d   : > { %v1045_v40 = vpop.permute.xlu2 %1044 }
 0x14e   : > { %1080 = vst.msk [vmem:[#allocation2 + $0x34] sm:$0xf] %vm1066_vm3, %v1045_v40 }
 0x14f   : > { %1266 = vrot.lane.b32.xlu1 %v6865_v2, %s3939_s9 }
 0x150   : > { %1264 = vrot.lane.b32.xlu0 %v4432_v53, %s3939_s9 }
 0x151   : > { %v1037_v19 = vpop.permute.xlu1 %1036 }
 0x152   : > { %1076 = vst.msk [vmem:[#allocation2 + $0x24] sm:$0xf] %vm1066_vm3, %v1037_v19  ;;  %v1035_v5 = vpop.permute.xlu0 %1034  ;;  %v6871_v19 = vshrl.u32 %v4874_v26, 16 }
 0x153   : > { %1075 = vst.msk [vmem:[#allocation2 + $0x20] sm:$0xf] %vm1066_vm3, %v1035_v5  ;;  %1262 = vrot.lane.b32.xlu2 %v4581_v3, %s3939_s9  ;;  %v6869_v3 = vld [vmem:[#allocation27_spill] sm:$0xff] }
 0x154   : > { %v1245_v5 = vrot.slane %v6871_v19, 5 }
 0x155   : > { %v1108_v1 = vpop.permute.xlu2 %1107 }
 0x156   : > { %1156 = vst.msk [vmem:[#allocation2] sm:$0xf] %vm1155_vm4, %v1108_v1  ;;  %v6872_v1 = vshll.u32 %v4874_v26, 16 }
 0x157   : > { %1272 = vrot.lane.b32.xlu1 %v6866_v4, %s3939_s9 }
 0x158   : > { %1270 = vrot.lane.b32.xlu0 %v6867_v23, %s3939_s9 }
 0x159   : > { %v1043_v21 = vpop.permute.xlu1 %1042 }
 0x15a   : > { %1079 = vst.msk [vmem:[#allocation2 + $0x30] sm:$0xf] %vm1066_vm3, %v1043_v21  ;;  %v1041_v0 = vpop.permute.xlu0 %1040  ;;  %v1246_v21 = vrot.slane %v6872_v1, 6 }
 0x15b   : > { %1078 = vst.msk [vmem:[#allocation2 + $0x2c] sm:$0xf] %vm1066_vm3, %v1041_v0  ;;  %1268 = vrot.lane.b32.xlu2 %v6868_v59, %s3939_s9 }
 0x15c   : > { %v1247_v59 = vor.u32 %v1246_v21, %v1245_v5 }
 0x15d   : > { %v1114_v46 = vpop.permute.xlu2 %1113 }
 0x15e   : > { %1159 = vst.msk [vmem:[#allocation2 + $0xc] sm:$0xf] %vm1155_vm4, %v1114_v46 }
 0x15f   : > { %1278 = vrot.lane.b32.xlu1 %v6869_v3, %s3939_s9 }
 0x160   : > { %1276 = vrot.lane.b32.xlu0 %v6870_v14, %s3939_s9  ;;  %v1248_v14 = vrot.slane %v1247_v59, 4 }
 0x161   : > { %v1049_v40 = vpop.permute.xlu1 %1048 }
 0x162   : > { %1082 = vst.msk [vmem:[#allocation2 + $0x3c] sm:$0xf] %vm1066_vm3, %v1049_v40  ;;  %v1047_v0 = vpop.permute.xlu0 %1046  ;;  %v5074_v5 = vsel %vm4370_vm8, %v1248_v14, %v1251_v35 }
 0x163   : > { %1081 = vst.msk [vmem:[#allocation2 + $0x38] sm:$0xf] %vm1066_vm3, %v1047_v0  ;;  %1274 = vrot.lane.b32.xlu2 %v4663_v48, %s3939_s9  ;;  %vm1990_vm3 = vcmask 585248  }
 0x165   : > { %v1120_v46 = vpop.permute.xlu2 %1119 }
 0x166   : > { %1162 = vst.msk [vmem:[#allocation2 + $0x18] sm:$0xf] %vm1155_vm4, %v1120_v46 }
 0x167   : > { %1284 = vrot.lane.b32.xlu1 %v4667_v62, %s3939_s9 }
 0x168   : > { %1282 = vrot.lane.b32.xlu0 %v4673_v25, %s3939_s9 }
 0x169   : > { %v1112_v19 = vpop.permute.xlu1 %1111 }
 0x16a   : > { %1158 = vst.msk [vmem:[#allocation2 + $0x8] sm:$0xf] %vm1155_vm4, %v1112_v19  ;;  %v1110_v40 = vpop.permute.xlu0 %1109 }
 0x16b   : > { %1157 = vst.msk [vmem:[#allocation2 + $0x4] sm:$0xf] %vm1155_vm4, %v1110_v40  ;;  %1280 = vrot.lane.b32.xlu2 %v4693_v39, %s3939_s9 }
 0x16d   : > { %v1126_v59 = vpop.permute.xlu2 %1125 }
 0x16e   : > { %1165 = vst.msk [vmem:[#allocation2 + $0x24] sm:$0xf] %vm1155_vm4, %v1126_v59 }
 0x16f   : > { %1290 = vrot.lane.b32.xlu1 %v5034_v41, %s3939_s9 }
 0x170   : > { %1288 = vrot.lane.b32.xlu0 %v5074_v5, %s3939_s9 }
 0x171   : > { %v1118_v1 = vpop.permute.xlu1 %1117 }
 0x172   : > { %1161 = vst.msk [vmem:[#allocation2 + $0x14] sm:$0xf] %vm1155_vm4, %v1118_v1  ;;  %v1116_v21 = vpop.permute.xlu0 %1115  ;;  %v3658_v1 = vrot.slane %v4874_v26, 10 }
 0x173   : > { %1160 = vst.msk [vmem:[#allocation2 + $0x10] sm:$0xf] %vm1155_vm4, %v1116_v21  ;;  %1286 = vrot.lane.b32.xlu2 %v4714_v10, %s3939_s9  ;;  %v1327_v21 = vrot.slane %v4871_v30, 6 }
 0x175   : > { %v1132_v35 = vpop.permute.xlu2 %1131 }
 0x176   : > { %1168 = vst.msk [vmem:[#allocation2 + $0x30] sm:$0xf] %vm1155_vm4, %v1132_v35 }
 0x177   : > { %1336 = vrot.lane.b32.xlu1 %v4718_v8, %s3940_s10 }
 0x178   : > { %1334 = vrot.lane.b32.xlu0 %v4723_v16, %s3940_s10 }
 0x179   : > { %v1124_v14 = vpop.permute.xlu1 %1123 }
 0x17a   : > { %1164 = vst.msk [vmem:[#allocation2 + $0x20] sm:$0xf] %vm1155_vm4, %v1124_v14  ;;  %v1122_v0 = vpop.permute.xlu0 %1121 }
 0x17b   : > { %1163 = vst.msk [vmem:[#allocation2 + $0x1c] sm:$0xf] %vm1155_vm4, %v1122_v0  ;;  %1332 = vrot.lane.b32.xlu2 %v4739_v58, %s3940_s10 }
 0x17d   : > { %v1138_v46 = vpop.permute.xlu2 %1137 }
 0x17e   : > { %1171 = vst.msk [vmem:[#allocation2 + $0x3c] sm:$0xf] %vm1155_vm4, %v1138_v46  ;;  %v5125_v46 = vsel %vm4683_vm14, %v3658_v1, %v1327_v21 }
 0x17f   : > { %1342 = vrot.lane.b32.xlu1 %v4743_v34, %s3940_s10 }
 0x180   : > { %1340 = vrot.lane.b32.xlu0 %v4747_v38, %s3940_s10 }
 0x181   : > { %v1130_v16 = vpop.permute.xlu1 %1129 }
 0x182   : > { %1167 = vst.msk [vmem:[#allocation2 + $0x2c] sm:$0xf] %vm1155_vm4, %v1130_v16  ;;  %v1128_v19 = vpop.permute.xlu0 %1127 }
 0x183   : > { %1166 = vst.msk [vmem:[#allocation2 + $0x28] sm:$0xf] %vm1155_vm4, %v1128_v19  ;;  %1338 = vrot.lane.b32.xlu2 %v4765_v29, %s3940_s10 }
 0x185   : > { %v1185_v58 = vpop.permute.xlu2 %1184 }
 0x186   : > { %1231 = vst.msk [vmem:[#allocation2 + $0x8] sm:$0xf] %vm1228_vm6, %v1185_v58 }
 0x187   : > { %1348 = vrot.lane.b32.xlu1 %v4769_v24, %s3940_s10 }
 0x188   : > { %1346 = vrot.lane.b32.xlu0 %v4774_v20, %s3940_s10 }
 0x189   : > { %v1136_v40 = vpop.permute.xlu1 %1135 }
 0x18a   : > { %1170 = vst.msk [vmem:[#allocation2 + $0x38] sm:$0xf] %vm1155_vm4, %v1136_v40  ;;  %v1134_v59 = vpop.permute.xlu0 %1133  ;;  %v1329_v40 = vrot.slane %v1327_v21, 4 }
 0x18b   : > { %1169 = vst.msk [vmem:[#allocation2 + $0x34] sm:$0xf] %vm1155_vm4, %v1134_v59  ;;  %1344 = vrot.lane.b32.xlu2 %v4790_v49, %s3940_s10  ;;  %v1330_v59 = vrot.slane %v4944_v56, 6  ;;  %vm6767_vm4 = vcmask 618048  }
 0x18d   : > { %v1191_v35 = vpop.permute.xlu2 %1190 }
 0x18e   : > { %1234 = vst.msk [vmem:[#allocation2 + $0x14] sm:$0xf] %vm1228_vm6, %v1191_v35 }
 0x18f   : > { %1354 = vrot.lane.b32.xlu1 %v4794_v6, %s3940_s10 }
 0x190   : > { %1352 = vrot.lane.b32.xlu0 %v4798_v51, %s3940_s10 }
 0x191   : > { %v1183_v14 = vpop.permute.xlu1 %1182 }
 0x192   : > { %1230 = vst.msk [vmem:[#allocation2 + $0x4] sm:$0xf] %vm1228_vm6, %v1183_v14  ;;  %v1181_v0 = vpop.permute.xlu0 %1180 }
 0x193   : > { %1229 = vst.msk [vmem:[#allocation2] sm:$0xf] %vm1228_vm6, %v1181_v0  ;;  %1350 = vrot.lane.b32.xlu2 %v4814_v63, %s3940_s10  ;;  %v5148_v0 = vsel %vm4683_vm14, %v1329_v40, %v1330_v59 }
 0x195   : > { %v1197_v16 = vpop.permute.xlu2 %1196 }
 0x196   : > { %1237 = vst.msk [vmem:[#allocation2 + $0x20] sm:$0xf] %vm1228_vm6, %v1197_v16 }
 0x197   : > { %1360 = vrot.lane.b32.xlu1 %v5125_v46, %s3940_s10 }
 0x198   : > { %1358 = vrot.lane.b32.xlu0 %v4818_v33, %s3940_s10 }
 0x199   : > { %v1189_v19 = vpop.permute.xlu1 %1188 }
 0x19a   : > { %1233 = vst.msk [vmem:[#allocation2 + $0x10] sm:$0xf] %vm1228_vm6, %v1189_v19  ;;  %v1187_v58 = vpop.permute.xlu0 %1186 }
 0x19b   : > { %1232 = vst.msk [vmem:[#allocation2 + $0xc] sm:$0xf] %vm1228_vm6, %v1187_v58  ;;  %1356 = vrot.lane.b32.xlu2 %v4832_v27, %s3940_s10 }
 0x19d   : > { %v1203_v1 = vpop.permute.xlu2 %1202 }
 0x19e   : > { %1240 = vst.msk [vmem:[#allocation2 + $0x2c] sm:$0xf] %vm1228_vm6, %v1203_v1 }
 0x19f   : > { %1401 = vrot.lane.b32.xlu1 %v4117_v52, %s3941_s11 }
 0x1a0   : > { %1399 = vrot.lane.b32.xlu0 %v4113_v50, %s3941_s11 }
 0x1a1   : > { %v1195_v35 = vpop.permute.xlu1 %1194 }
 0x1a2   : > { %1236 = vst.msk [vmem:[#allocation2 + $0x1c] sm:$0xf] %vm1228_vm6, %v1195_v35  ;;  %v1193_v14 = vpop.permute.xlu0 %1192 }
 0x1a3   : > { %1235 = vst.msk [vmem:[#allocation2 + $0x18] sm:$0xf] %vm1228_vm6, %v1193_v14  ;;  %1362 = vrot.lane.b32.xlu2 %v5148_v0, %s3940_s10 }
 0x1a5   : > { %v1209_v50 = vpop.permute.xlu2 %1208 }
 0x1a6   : > { %1243 = vst.msk [vmem:[#allocation2 + $0x38] sm:$0xf] %vm1228_vm6, %v1209_v50  ;;  %v5187_v50 = vld [vmem:[%s4021_s27 + $0x70] sm:$0xf] }
 0x1a7   : > { %1407 = vrot.lane.b32.xlu1 %v4182_v55, %s3941_s11 }
 0x1a8   : > { %1405 = vrot.lane.b32.xlu0 %v4057_v18, %s3941_s11 }
 0x1a9   : > { %v1201_v52 = vpop.permute.xlu1 %1200 }
 0x1aa   : > { %1239 = vst.msk [vmem:[#allocation2 + $0x28] sm:$0xf] %vm1228_vm6, %v1201_v52  ;;  %v1199_v56 = vpop.permute.xlu0 %1198 }
 0x1ab   : > { %1238 = vst.msk [vmem:[#allocation2 + $0x24] sm:$0xf] %vm1228_vm6, %v1199_v56  ;;  %1403 = vrot.lane.b32.xlu2 %v4076_v28, %s3941_s11  ;;  %v5199_v56 = vld [vmem:[%s4021_s27 + $0x6c] sm:$0xf] }
 0x1ad   : > { %v1263_v21 = vpop.permute.xlu2 %1262 }
 0x1ae   : > { %1310 = vst.msk [vmem:[#allocation2 + $0x4] sm:$0xf] %vm1308_vm7, %v1263_v21 }
 0x1af   : > { %1413 = vrot.lane.b32.xlu1 %v4135_v13, %s3941_s11 }
 0x1b0   : > { %1411 = vrot.lane.b32.xlu0 %v4101_v44, %s3941_s11 }
 0x1b1   : > { %v1207_v16 = vpop.permute.xlu1 %1206 }
 0x1b2   : > { %1242 = vst.msk [vmem:[#allocation2 + $0x34] sm:$0xf] %vm1228_vm6, %v1207_v16  ;;  %v1205_v19 = vpop.permute.xlu0 %1204 }
 0x1b3   : > { %1241 = vst.msk [vmem:[#allocation2 + $0x30] sm:$0xf] %vm1228_vm6, %v1205_v19  ;;  %1409 = vrot.lane.b32.xlu2 %v4104_v45, %s3941_s11 }
 0x1b5   : > { %v1269_v58 = vpop.permute.xlu2 %1268 }
 0x1b6   : > { %1313 = vst.msk [vmem:[#allocation2 + $0x10] sm:$0xf] %vm1308_vm7, %v1269_v58 }
 0x1b7   : > { %1419 = vrot.lane.b32.xlu1 %v4256_v42, %s3941_s11 }
 0x1b8   : > { %1417 = vrot.lane.b32.xlu0 %v4163_v37, %s3941_s11 }
 0x1b9   : > { %v1261_v40 = vpop.permute.xlu1 %1260 }
 0x1ba   : > { %1309 = vst.msk [vmem:[#allocation2] sm:$0xf] %vm1308_vm7, %v1261_v40  ;;  %v1211_v59 = vpop.permute.xlu0 %1210 }
 0x1bb   : > { %1244 = vst.msk [vmem:[#allocation2 + $0x3c] sm:$0xf] %vm1228_vm6, %v1211_v59  ;;  %1415 = vrot.lane.b32.xlu2 %v4168_v43, %s3941_s11  ;;  %v6740_v59 = vshll.u32 %v5187_v50, 16  ;;  %vm6768_vm6 = vcmask 650848  }
 0x1bd   : > { %v1275_v1 = vpop.permute.xlu2 %1274 }
 0x1be   : > { %1316 = vst.msk [vmem:[#allocation2 + $0x1c] sm:$0xf] %vm1308_vm7, %v1275_v1  ;;  %v6742_v1 = vshrl.u32 %v5199_v56, 16 }
 0x1bf   : > { %1425 = vrot.lane.b32.xlu1 %v4871_v30, %s3941_s11 }
 0x1c0   : > { %1423 = vrot.lane.b32.xlu0 %v4874_v26, %s3941_s11 }
 0x1c1   : > { %v1267_v35 = vpop.permute.xlu1 %1266 }
 0x1c2   : > { %1312 = vst.msk [vmem:[#allocation2 + $0xc] sm:$0xf] %vm1308_vm7, %v1267_v35  ;;  %v1265_v14 = vpop.permute.xlu0 %1264  ;;  %v6745_v35 = vshll.u32 %v5199_v56, 16 }
 0x1c3   : > { %1311 = vst.msk [vmem:[#allocation2 + $0x8] sm:$0xf] %vm1308_vm7, %v1265_v14  ;;  %1421 = vrot.lane.b32.xlu2 %v4222_v61, %s3941_s11 }
 0x1c5   : > { %v1281_v30 = vpop.permute.xlu2 %1280 }
 0x1c6   : > { %1319 = vst.msk [vmem:[#allocation2 + $0x28] sm:$0xf] %vm1308_vm7, %v1281_v30  ;;  %v1476_v30 = vrot.slane %v6740_v59, 5 }
 0x1c7   : > { %1488 = vrot.lane.b32.xlu1 %v4190_v12, %s3942_s12 }
 0x1c8   : > { %1429 = vrot.lane.b32.xlu0 %v5187_v50, %s3941_s11 }
 0x1c9   : > { %v1273_v26 = vpop.permute.xlu1 %1272 }
 0x1ca   : > { %1315 = vst.msk [vmem:[#allocation2 + $0x18] sm:$0xf] %vm1308_vm7, %v1273_v26  ;;  %v1271_v52 = vpop.permute.xlu0 %1270 }
 0x1cb   : > { %1314 = vst.msk [vmem:[#allocation2 + $0x14] sm:$0xf] %vm1308_vm7, %v1271_v52  ;;  %1427 = vrot.lane.b32.xlu2 %v5199_v56, %s3941_s11 }
 0x1cd   : > { %v1287_v12 = vpop.permute.xlu2 %1286 }
 0x1ce   : > { %1322 = vst.msk [vmem:[#allocation2 + $0x34] sm:$0xf] %vm1308_vm7, %v1287_v12  ;;  %v5235_v12 = vld [vmem:[%s4021_s27 + $0x74] sm:$0x3] }
 0x1cf   : > { %1494 = vrot.lane.b32.xlu1 %v4173_v47, %s3942_s12 }
 0x1d0   : > { %1492 = vrot.lane.b32.xlu0 %v4186_v54, %s3942_s12 }
 0x1d1   : > { %v1279_v21 = vpop.permute.xlu1 %1278 }
 0x1d2   : > { %1318 = vst.msk [vmem:[#allocation2 + $0x24] sm:$0xf] %vm1308_vm7, %v1279_v21  ;;  %v1277_v16 = vpop.permute.xlu0 %1276  ;;  %v1467_v21 = vrot.slane %v6742_v1, 4  ;;  %v6875_v1 = vld [vmem:[#allocation9_spill] sm:$0xff] }
 0x1d3   : > { %1317 = vst.msk [vmem:[#allocation2 + $0x20] sm:$0xf] %vm1308_vm7, %v1277_v16  ;;  %1490 = vrot.lane.b32.xlu2 %v4228_v60, %s3942_s12  ;;  %v6741_v60 = vshrl.u32 %v5187_v50, 16  ;;  %v1470_v16 = vrot.slane %v6745_v35, 5 }
 0x1d5   : > { %v1333_v19 = vpop.permute.xlu2 %1332  ;;  %v1480_v26 = vrot.slane %v6741_v60, 4  ;;  %v1471_v59 = vor.u32 %v1470_v16, %v1467_v21  ;;  %v6873_v60 = vld [vmem:[#allocation8_spill] sm:$0xff] }
 0x1d6   : > { %1381 = vst.msk [vmem:[#allocation2] sm:$0xf] %vm1380_vm9, %v1333_v19 }
 0x1d7   : > { %1500 = vrot.lane.b32.xlu1 %v4233_v15, %s3942_s12  ;;  %v1556_v15 = vrot.slane %v5187_v50, 5 }
 0x1d8   : > { %1498 = vrot.lane.b32.xlu0 %v4238_v7, %s3942_s12 }
 0x1d9   : > { %v1285_v58 = vpop.permute.xlu1 %1284 }
 0x1da   : > { %1321 = vst.msk [vmem:[#allocation2 + $0x30] sm:$0xf] %vm1308_vm7, %v1285_v58  ;;  %v1283_v40 = vpop.permute.xlu0 %1282  ;;  %v1481_v58 = vor.u32 %v1480_v26, %v1476_v30 }
 0x1db   : > { %1320 = vst.msk [vmem:[#allocation2 + $0x2c] sm:$0xf] %vm1308_vm7, %v1283_v40  ;;  %1496 = vrot.lane.b32.xlu2 %v4269_v17, %s3942_s12  ;;  %v6748_v40 = vshll.u32 %v5235_v12, 16 }
 0x1dd   : > { %v1339_v14 = vpop.permute.xlu2 %1338 }
 0x1de   : > { %1384 = vst.msk [vmem:[#allocation2 + $0xc] sm:$0xf] %vm1380_vm9, %v1339_v14  ;;  %v6874_v14 = vld [vmem:[#allocation34_spill] sm:$0xff] }
 0x1df   : > { %1506 = vrot.lane.b32.xlu1 %v4275_v32, %s3942_s12 }
 0x1e0   : > { %1504 = vrot.lane.b32.xlu0 %v4279_v22, %s3942_s12  ;;  %v1482_v22 = vrot.slane %v1481_v58, 4  ;;  %v6878_v58 = vld [vmem:[#allocation10_spill] sm:$0xff] }
 0x1e1   : > { %v1291_v52 = vpop.permute.xlu1 %1290 }
 0x1e2   : > { %1324 = vst.msk [vmem:[#allocation2 + $0x3c] sm:$0xf] %vm1308_vm7, %v1291_v52  ;;  %v1289_v19 = vpop.permute.xlu0 %1288  ;;  %v1486_v52 = vrot.slane %v6748_v40, 5  ;;  %v6884_v40 = vld [vmem:[#allocation18_spill] sm:$0xff] }
 0x1e3   : > { %1323 = vst.msk [vmem:[#allocation2 + $0x38] sm:$0xf] %vm1308_vm7, %v1289_v19  ;;  %1502 = vrot.lane.b32.xlu2 %v6873_v60, %s3942_s12  ;;  %v1472_v19 = vrot.slane %v1471_v59, 4  ;;  %vm2209_vm7 = vcmask 683648  }
 0x1e4   : > { %v5257_v21 = vsel %vm4067_vm2, %v1482_v22, %v1486_v52  ;;  %v6881_v52 = vld [vmem:[#allocation14_spill] sm:$0xff] }
 0x1e5   : > { %v1345_v35 = vpop.permute.xlu2 %1344  ;;  %6876 = vst [vmem:[#allocation15_spill] sm:$0xff] %v5257_v21  ;;  %v5261_v16 = vsel %vm4067_vm2, %v1472_v19, %v1476_v30  ;;  %v6880_v30 = vld [vmem:[#allocation13_spill] sm:$0xff] }
 0x1e6   : > { %1387 = vst.msk [vmem:[#allocation2 + $0x18] sm:$0xf] %vm1380_vm9, %v1345_v35  ;;  %v6879_v35 = vld [vmem:[#allocation11_spill] sm:$0xff] }
 0x1e7   : > { %1512 = vrot.lane.b32.xlu1 %v6874_v14, %s3942_s12  ;;  %6877 = vst [vmem:[#allocation19_spill] sm:$0xff] %v5261_v16 }
 0x1e8   : > { %1510 = vrot.lane.b32.xlu0 %v6875_v1, %s3942_s12 }
 0x1e9   : > { %v1337_v32 = vpop.permute.xlu1 %1336 }
 0x1ea   : > { %1383 = vst.msk [vmem:[#allocation2 + $0x8] sm:$0xf] %vm1380_vm9, %v1337_v32  ;;  %v1335_v26 = vpop.permute.xlu0 %1334 }
 0x1eb   : > { %1382 = vst.msk [vmem:[#allocation2 + $0x4] sm:$0xf] %vm1380_vm9, %v1335_v26  ;;  %1508 = vrot.lane.b32.xlu2 %v6878_v58, %s3942_s12 }
 0x1ed   : > { %v1351_v32 = vpop.permute.xlu2 %1350 }
 0x1ee   : > { %1390 = vst.msk [vmem:[#allocation2 + $0x24] sm:$0xf] %vm1380_vm9, %v1351_v32 }
 0x1ef   : > { %1518 = vrot.lane.b32.xlu1 %v5257_v21, %s3942_s12 }
 0x1f0   : > { %1516 = vrot.lane.b32.xlu0 %v5261_v16, %s3942_s12 }
 0x1f1   : > { %v1343_v59 = vpop.permute.xlu1 %1342 }
 0x1f2   : > { %1386 = vst.msk [vmem:[#allocation2 + $0x14] sm:$0xf] %vm1380_vm9, %v1343_v59  ;;  %v1341_v22 = vpop.permute.xlu0 %1340  ;;  %v6882_v59 = vld [vmem:[#allocation16_spill] sm:$0xff] }
 0x1f3   : > { %1385 = vst.msk [vmem:[#allocation2 + $0x10] sm:$0xf] %vm1380_vm9, %v1341_v22  ;;  %1514 = vrot.lane.b32.xlu2 %v6879_v35, %s3942_s12  ;;  %v6883_v22 = vld [vmem:[#allocation17_spill] sm:$0xff]  ;;  %v6893_v35 = vld [vmem:[#allocation12_spill] sm:$0xff] }
 0x1f5   : > { %v1357_v19 = vpop.permute.xlu2 %1356 }
 0x1f6   : > { %1393 = vst.msk [vmem:[#allocation2 + $0x30] sm:$0xf] %vm1380_vm9, %v1357_v19 }
 0x1f7   : > { %1565 = vrot.lane.b32.xlu1 %v6880_v30, %s3943_s13 }
 0x1f8   : > { %1563 = vrot.lane.b32.xlu0 %v6881_v52, %s3943_s13 }
 0x1f9   : > { %v1349_v26 = vpop.permute.xlu1 %1348 }
 0x1fa   : > { %1389 = vst.msk [vmem:[#allocation2 + $0x20] sm:$0xf] %vm1380_vm9, %v1349_v26  ;;  %v1347_v32 = vpop.permute.xlu0 %1346  ;;  %v6885_v26 = vld [vmem:[#allocation20_spill] sm:$0xff] }
 0x1fb   : > { %1388 = vst.msk [vmem:[#allocation2 + $0x1c] sm:$0xf] %vm1380_vm9, %v1347_v32  ;;  %1561 = vrot.lane.b32.xlu2 %v6882_v59, %s3943_s13  ;;  %v6886_v32 = vld [vmem:[#allocation21_spill] sm:$0xff]  ;;  %v6887_v59 = vld [vmem:[#allocation22_spill] sm:$0xff] }
 0x1fd   : > { %v1363_v57 = vpop.permute.xlu2 %1362 }
 0x1fe   : > { %1396 = vst.msk [vmem:[#allocation2 + $0x3c] sm:$0xf] %vm1380_vm9, %v1363_v57 }
 0x1ff   : > { %1571 = vrot.lane.b32.xlu1 %v6883_v22, %s3943_s13 }
 0x200   : > { %1569 = vrot.lane.b32.xlu0 %v6884_v40, %s3943_s13 }
 0x201   : > { %v1355_v52 = vpop.permute.xlu1 %1354 }
 0x202   : > { %1392 = vst.msk [vmem:[#allocation2 + $0x2c] sm:$0xf] %vm1380_vm9, %v1355_v52  ;;  %v1353_v19 = vpop.permute.xlu0 %1352  ;;  %v6888_v52 = vld [vmem:[#allocation24_spill] sm:$0xff] }
 0x203   : > { %1391 = vst.msk [vmem:[#allocation2 + $0x28] sm:$0xf] %vm1380_vm9, %v1353_v19  ;;  %1567 = vrot.lane.b32.xlu2 %v6885_v26, %s3943_s13  ;;  %v6889_v19 = vld [vmem:[#allocation25_spill] sm:$0xff] }
 0x205   : > { %v1404_v21 = vpop.permute.xlu2 %1403 }
 0x206   : > { %1450 = vst.msk [vmem:[#allocation2 + $0x8] sm:$0xf] %vm1447_vm10, %v1404_v21 }
 0x207   : > { %1577 = vrot.lane.b32.xlu1 %v6886_v32, %s3943_s13  ;;  %v6890_v32 = vld [vmem:[#allocation26_spill] sm:$0xff] }
 0x208   : > { %1575 = vrot.lane.b32.xlu0 %v6887_v59, %s3943_s13  ;;  %v3659_v59 = vrot.slane %v5199_v56, 9 }
 0x209   : > { %v1361_v16 = vpop.permute.xlu1 %1360 }
 0x20a   : > { %1395 = vst.msk [vmem:[#allocation2 + $0x38] sm:$0xf] %vm1380_vm9, %v1361_v16  ;;  %v1359_v57 = vpop.permute.xlu0 %1358 }
 0x20b   : > { %1394 = vst.msk [vmem:[#allocation2 + $0x34] sm:$0xf] %vm1380_vm9, %v1359_v57  ;;  %1573 = vrot.lane.b32.xlu2 %v6888_v52, %s3943_s13  ;;  %v5312_v57 = vsel %vm4296_vm5, %v3659_v59, %v1556_v15  ;;  %v6892_v52 = vld [vmem:[#allocation28_spill] sm:$0xff]  ;;  %v1558_v59 = vrot.slane %v1556_v15, 4  ;;  %vm2298_vm9 = vcmask 716448  }
 0x20c   : > { %6891 = vst [vmem:[#allocation23_spill] sm:$0xff] %v5312_v57 }
 0x20d   : > { %v1410_v60 = vpop.permute.xlu2 %1409 }
 0x20e   : > { %1453 = vst.msk [vmem:[#allocation2 + $0x14] sm:$0xf] %vm1447_vm10, %v1410_v60 }
 0x20f   : > { %1583 = vrot.lane.b32.xlu1 %v6889_v19, %s3943_s13 }
 0x210   : > { %1581 = vrot.lane.b32.xlu0 %v6890_v32, %s3943_s13 }
 0x211   : > { %v1402_v21 = vpop.permute.xlu1 %1401 }
 0x212   : > { %1449 = vst.msk [vmem:[#allocation2 + $0x4] sm:$0xf] %vm1447_vm10, %v1402_v21  ;;  %v1400_v16 = vpop.permute.xlu0 %1399 }
 0x213   : > { %1448 = vst.msk [vmem:[#allocation2] sm:$0xf] %vm1447_vm10, %v1400_v16  ;;  %1579 = vrot.lane.b32.xlu2 %v6892_v52, %s3943_s13  ;;  %v1559_v16 = vrot.slane %v5235_v12, 5 }
 0x215   : > { %v1416_v14 = vpop.permute.xlu2 %1415 }
 0x216   : > { %1456 = vst.msk [vmem:[#allocation2 + $0x20] sm:$0xf] %vm1447_vm10, %v1416_v14 }
 0x217   : > { %1589 = vrot.lane.b32.xlu1 %v5312_v57, %s3943_s13 }
 0x218   : > { %1587 = vrot.lane.b32.xlu0 %v6893_v35, %s3943_s13 }
 0x219   : > { %v1408_v60 = vpop.permute.xlu1 %1407 }
 0x21a   : > { %1452 = vst.msk [vmem:[#allocation2 + $0x10] sm:$0xf] %vm1447_vm10, %v1408_v60  ;;  %v1406_v21 = vpop.permute.xlu0 %1405 }
 0x21b   : > { %1451 = vst.msk [vmem:[#allocation2 + $0xc] sm:$0xf] %vm1447_vm10, %v1406_v21  ;;  %1585 = vrot.lane.b32.xlu2 %v5024_v9, %s3943_s13  ;;  %v5335_v21 = vsel %vm4296_vm5, %v1558_v59, %v1559_v16  ;;  %v6896_v59 = vld [vmem:[#allocation31_spill] sm:$0xff] }
 0x21c   : > { %6894 = vst [vmem:[#allocation29_spill] sm:$0xff] %v5335_v21 }
 0x21d   : > { %v1422_v52 = vpop.permute.xlu2 %1421 }
 0x21e   : > { %1459 = vst.msk [vmem:[#allocation2 + $0x2c] sm:$0xf] %vm1447_vm10, %v1422_v52  ;;  %v6895_v52 = vld [vmem:[#allocation30_spill] sm:$0xff] }
 0x21f   : > { %1643 = vrot.lane.b32.xlu1 %v6865_v2, %s3944_s14 }
 0x220   : > { %1641 = vrot.lane.b32.xlu0 %v4432_v53, %s3944_s14 }
 0x221   : > { %v1414_v14 = vpop.permute.xlu1 %1413 }
 0x222   : > { %1455 = vst.msk [vmem:[#allocation2 + $0x1c] sm:$0xf] %vm1447_vm10, %v1414_v14  ;;  %v1412_v60 = vpop.permute.xlu0 %1411 }
 0x223   : > { %1454 = vst.msk [vmem:[#allocation2 + $0x18] sm:$0xf] %vm1447_vm10, %v1412_v60  ;;  %1591 = vrot.lane.b32.xlu2 %v5335_v21, %s3943_s13 }
 0x225   : > { %v1428_v15 = vpop.permute.xlu2 %1427 }
 0x226   : > { %1462 = vst.msk [vmem:[#allocation2 + $0x38] sm:$0xf] %vm1447_vm10, %v1428_v15 }
 0x227   : > { %1649 = vrot.lane.b32.xlu1 %v6866_v4, %s3944_s14 }
 0x228   : > { %1647 = vrot.lane.b32.xlu0 %v6867_v23, %s3944_s14 }
 0x229   : > { %v1420_v53 = vpop.permute.xlu1 %1419 }
 0x22a   : > { %1458 = vst.msk [vmem:[#allocation2 + $0x28] sm:$0xf] %vm1447_vm10, %v1420_v53  ;;  %v1418_v2 = vpop.permute.xlu0 %1417 }
 0x22b   : > { %1457 = vst.msk [vmem:[#allocation2 + $0x24] sm:$0xf] %vm1447_vm10, %v1418_v2  ;;  %1645 = vrot.lane.b32.xlu2 %v6895_v52, %s3944_s14  ;;  %v6897_v2 = vshrl.u32 %v5187_v50, 16 }
 0x22d   : > { %v1491_v16 = vpop.permute.xlu2 %1490 }
 0x22e   : > { %1538 = vst.msk [vmem:[#allocation2 + $0x4] sm:$0xf] %vm1536_vm11, %v1491_v16  ;;  %v1630_v16 = vrot.slane %v6897_v2, 5 }
 0x22f   : > { %1655 = vrot.lane.b32.xlu1 %v6869_v3, %s3944_s14 }
 0x230   : > { %1653 = vrot.lane.b32.xlu0 %v6896_v59, %s3944_s14 }
 0x231   : > { %v1426_v14 = vpop.permute.xlu1 %1425 }
 0x232   : > { %1461 = vst.msk [vmem:[#allocation2 + $0x34] sm:$0xf] %vm1447_vm10, %v1426_v14  ;;  %v1424_v60 = vpop.permute.xlu0 %1423  ;;  %v6898_v14 = vshll.u32 %v5187_v50, 16 }
 0x233   : > { %1460 = vst.msk [vmem:[#allocation2 + $0x30] sm:$0xf] %vm1447_vm10, %v1424_v60  ;;  %1651 = vrot.lane.b32.xlu2 %v4663_v48, %s3944_s14  ;;  %v1635_v60 = vshrl.u32 %v5235_v12, 16 }
 0x234   : > { %v1631_v36 = vrot.slane %v6898_v14, 6  ;;  %v6901_v14 = vshll.u32 %v5199_v56, 16 }
 0x235   : > { %v1497_v15 = vpop.permute.xlu2 %1496  ;;  %v1637_v3 = vrot.slane %v1635_v60, 5 }
 0x236   : > { %1541 = vst.msk [vmem:[#allocation2 + $0x10] sm:$0xf] %vm1536_vm11, %v1497_v15  ;;  %v1632_v21 = vor.u32 %v1631_v36, %v1630_v16  ;;  %v6900_v15 = vshrl.u32 %v5199_v56, 16 }
 0x237   : > { %1661 = vrot.lane.b32.xlu1 %v4667_v62, %s3944_s14 }
 0x238   : > { %1659 = vrot.lane.b32.xlu0 %v4673_v25, %s3944_s14  ;;  %v6899_v25 = vshll.u32 %v5235_v12, 16  ;;  %v1626_v2 = vrot.slane %v6900_v15, 5  ;;  %v1634_v16 = vrot.slane %v1632_v21, 4 }
 0x239   : > { %v1489_v53 = vpop.permute.xlu1 %1488 }
 0x23a   : > { %1537 = vst.msk [vmem:[#allocation2] sm:$0xf] %vm1536_vm11, %v1489_v53  ;;  %v1430_v57 = vpop.permute.xlu0 %1429  ;;  %v1638_v59 = vrot.slane %v6899_v25, 6  ;;  %v1627_v53 = vrot.slane %v6901_v14, 6 }
 0x23b   : > { %1463 = vst.msk [vmem:[#allocation2 + $0x3c] sm:$0xf] %vm1447_vm10, %v1430_v57  ;;  %1657 = vrot.lane.b32.xlu2 %v4693_v39, %s3944_s14  ;;  %vm2371_vm10 = vcmask 749248  }
 0x23c   : > { %v1639_v60 = vor.u32 %v1638_v59, %v1637_v3  ;;  %v1628_v39 = vor.u32 %v1627_v53, %v1626_v2 }
 0x23d   : > { %v1503_v36 = vpop.permute.xlu2 %1502 }
 0x23e   : > { %1544 = vst.msk [vmem:[#allocation2 + $0x1c] sm:$0xf] %vm1536_vm11, %v1503_v36  ;;  %v5386_v15 = vsel %vm4370_vm8, %v1634_v16, %v1639_v60  ;;  %v1629_v3 = vrot.slane %v1628_v39, 4 }
 0x23f   : > { %1667 = vrot.lane.b32.xlu1 %v5034_v41, %s3944_s14 }
 0x240   : > { %1665 = vrot.lane.b32.xlu0 %v5074_v5, %s3944_s14  ;;  %v5399_v53 = vsel %vm4370_vm8, %v1629_v3, %v1632_v21  ;;  %v1708_v3 = vrot.slane %v5187_v50, 6 }
 0x241   : > { %v1495_v57 = vpop.permute.xlu1 %1494 }
 0x242   : > { %1540 = vst.msk [vmem:[#allocation2 + $0xc] sm:$0xf] %vm1536_vm11, %v1495_v57  ;;  %v1493_v25 = vpop.permute.xlu0 %1492 }
 0x243   : > { %1539 = vst.msk [vmem:[#allocation2 + $0x8] sm:$0xf] %vm1536_vm11, %v1493_v25  ;;  %1663 = vrot.lane.b32.xlu2 %v4714_v10, %s3944_s14 }
 0x245   : > { %v1509_v59 = vpop.permute.xlu2 %1508 }
 0x246   : > { %1547 = vst.msk [vmem:[#allocation2 + $0x28] sm:$0xf] %vm1536_vm11, %v1509_v59  ;;  %v1710_v59 = vrot.slane %v1708_v3, 4 }
 0x247   : > { %1713 = vrot.lane.b32.xlu1 %v4718_v8, %s3945_s22 }
 0x248   : > { %1671 = vrot.lane.b32.xlu0 %v5386_v15, %s3944_s14 }
 0x249   : > { %v1501_v14 = vpop.permute.xlu1 %1500 }
 0x24a   : > { %1543 = vst.msk [vmem:[#allocation2 + $0x18] sm:$0xf] %vm1536_vm11, %v1501_v14  ;;  %v1499_v2 = vpop.permute.xlu0 %1498  ;;  %v1711_v14 = vrot.slane %v5235_v12, 6 }
 0x24b   : > { %1542 = vst.msk [vmem:[#allocation2 + $0x14] sm:$0xf] %vm1536_vm11, %v1499_v2  ;;  %1669 = vrot.lane.b32.xlu2 %v5399_v53, %s3944_s14 }
 0x24d   : > { %v1515_v39 = vpop.permute.xlu2 %1514 }
 0x24e   : > { %1550 = vst.msk [vmem:[#allocation2 + $0x34] sm:$0xf] %vm1536_vm11, %v1515_v39 }
 0x24f   : > { %1719 = vrot.lane.b32.xlu1 %v4743_v34, %s3945_s22 }
 0x250   : > { %1717 = vrot.lane.b32.xlu0 %v4747_v38, %s3945_s22 }
 0x251   : > { %v1507_v8 = vpop.permute.xlu1 %1506 }
 0x252   : > { %1546 = vst.msk [vmem:[#allocation2 + $0x24] sm:$0xf] %vm1536_vm11, %v1507_v8  ;;  %v1505_v36 = vpop.permute.xlu0 %1504  ;;  %v3660_v8 = vrot.slane %v5199_v56, 10 }
 0x253   : > { %1545 = vst.msk [vmem:[#allocation2 + $0x20] sm:$0xf] %vm1536_vm11, %v1505_v36  ;;  %1715 = vrot.lane.b32.xlu2 %v4765_v29, %s3945_s22 }
 0x255   : > { %v1562_v21 = vpop.permute.xlu2 %1561 }
 0x256   : > { %1610 = vst.msk [vmem:[#allocation2] sm:$0xf] %vm1609_vm12, %v1562_v21  ;;  %v5442_v21 = vsel %vm4683_vm14, %v1710_v59, %v1711_v14 }
 0x257   : > { %1725 = vrot.lane.b32.xlu1 %v4769_v24, %s3945_s22 }
 0x258   : > { %1723 = vrot.lane.b32.xlu0 %v4774_v20, %s3945_s22 }
 0x259   : > { %v1513_v57 = vpop.permute.xlu1 %1512 }
 0x25a   : > { %1549 = vst.msk [vmem:[#allocation2 + $0x30] sm:$0xf] %vm1536_vm11, %v1513_v57  ;;  %v1511_v16 = vpop.permute.xlu0 %1510  ;;  %v5446_v57 = vsel %vm4683_vm14, %v3660_v8, %v1708_v3  ;;  %v5487_v8 = vld [vmem:[%s4021_s27 + $0x64] sm:$0xf] }
 0x25b   : > { %1548 = vst.msk [vmem:[#allocation2 + $0x2c] sm:$0xf] %vm1536_vm11, %v1511_v16  ;;  %1721 = vrot.lane.b32.xlu2 %v4790_v49, %s3945_s22 }
 0x25d   : > { %v1568_v29 = vpop.permute.xlu2 %1567 }
 0x25e   : > { %1613 = vst.msk [vmem:[#allocation2 + $0xc] sm:$0xf] %vm1609_vm12, %v1568_v29 }
 0x25f   : > { %1731 = vrot.lane.b32.xlu1 %v4794_v6, %s3945_s22 }
 0x260   : > { %1729 = vrot.lane.b32.xlu0 %v4798_v51, %s3945_s22 }
 0x261   : > { %v1519_v60 = vpop.permute.xlu1 %1518 }
 0x262   : > { %1552 = vst.msk [vmem:[#allocation2 + $0x3c] sm:$0xf] %vm1536_vm11, %v1519_v60  ;;  %v1517_v25 = vpop.permute.xlu0 %1516 }
 0x263   : > { %1551 = vst.msk [vmem:[#allocation2 + $0x38] sm:$0xf] %vm1536_vm11, %v1517_v25  ;;  %1727 = vrot.lane.b32.xlu2 %v4814_v63, %s3945_s22  ;;  %vm2451_vm11 = vcmask 782048  }
 0x265   : > { %v1574_v2 = vpop.permute.xlu2 %1573 }
 0x266   : > { %1616 = vst.msk [vmem:[#allocation2 + $0x18] sm:$0xf] %vm1609_vm12, %v1574_v2 }
 0x267   : > { %1737 = vrot.lane.b32.xlu1 %v5125_v46, %s3945_s22 }
 0x268   : > { %1735 = vrot.lane.b32.xlu0 %v4818_v33, %s3945_s22 }
 0x269   : > { %v1566_v39 = vpop.permute.xlu1 %1565 }
 0x26a   : > { %1612 = vst.msk [vmem:[#allocation2 + $0x8] sm:$0xf] %vm1609_vm12, %v1566_v39  ;;  %v1564_v36 = vpop.permute.xlu0 %1563 }
 0x26b   : > { %1611 = vst.msk [vmem:[#allocation2 + $0x4] sm:$0xf] %vm1609_vm12, %v1564_v36  ;;  %1733 = vrot.lane.b32.xlu2 %v4832_v27, %s3945_s22  ;;  %v5492_v36 = vld [vmem:[%s4021_s27 + $0x60] sm:$0xf] }
 0x26d   : > { %v1580_v12 = vpop.permute.xlu2 %1579 }
 0x26e   : > { %1619 = vst.msk [vmem:[#allocation2 + $0x24] sm:$0xf] %vm1609_vm12, %v1580_v12 }
 0x26f   : > { %1743 = vrot.lane.b32.xlu1 %v5442_v21, %s3945_s22 }
 0x270   : > { %1741 = vrot.lane.b32.xlu0 %v5446_v57, %s3945_s22 }
 0x271   : > { %v1572_v16 = vpop.permute.xlu1 %1571 }
 0x272   : > { %1615 = vst.msk [vmem:[#allocation2 + $0x14] sm:$0xf] %vm1609_vm12, %v1572_v16  ;;  %v1570_v29 = vpop.permute.xlu0 %1569 }
 0x273   : > { %1614 = vst.msk [vmem:[#allocation2 + $0x10] sm:$0xf] %vm1609_vm12, %v1570_v29  ;;  %1739 = vrot.lane.b32.xlu2 %v5148_v0, %s3945_s22 }
 0x275   : > { %v1586_v60 = vpop.permute.xlu2 %1585 }
 0x276   : > { %1622 = vst.msk [vmem:[#allocation2 + $0x30] sm:$0xf] %vm1609_vm12, %v1586_v60 }
 0x277   : > { %1784 = vrot.lane.b32.xlu1 %v4182_v55, %s3946_s23 }
 0x278   : > { %1782 = vrot.lane.b32.xlu0 %v4057_v18, %s3946_s23 }
 0x279   : > { %v1578_v25 = vpop.permute.xlu1 %1577 }
 0x27a   : > { %1618 = vst.msk [vmem:[#allocation2 + $0x20] sm:$0xf] %vm1609_vm12, %v1578_v25  ;;  %v1576_v3 = vpop.permute.xlu0 %1575 }
 0x27b   : > { %1617 = vst.msk [vmem:[#allocation2 + $0x1c] sm:$0xf] %vm1609_vm12, %v1576_v3  ;;  %1780 = vrot.lane.b32.xlu2 %v4076_v28, %s3946_s23 }
 0x27d   : > { %v1592_v59 = vpop.permute.xlu2 %1591 }
 0x27e   : > { %1625 = vst.msk [vmem:[#allocation2 + $0x3c] sm:$0xf] %vm1609_vm12, %v1592_v59 }
 0x27f   : > { %1790 = vrot.lane.b32.xlu1 %v4135_v13, %s3946_s23 }
 0x280   : > { %1788 = vrot.lane.b32.xlu0 %v4101_v44, %s3946_s23 }
 0x281   : > { %v1584_v18 = vpop.permute.xlu1 %1583 }
 0x282   : > { %1621 = vst.msk [vmem:[#allocation2 + $0x2c] sm:$0xf] %vm1609_vm12, %v1584_v18  ;;  %v1582_v14 = vpop.permute.xlu0 %1581 }
 0x283   : > { %1620 = vst.msk [vmem:[#allocation2 + $0x28] sm:$0xf] %vm1609_vm12, %v1582_v14  ;;  %1786 = vrot.lane.b32.xlu2 %v4104_v45, %s3946_s23 }
 0x285   : > { %v1646_v28 = vpop.permute.xlu2 %1645 }
 0x286   : > { %1692 = vst.msk [vmem:[#allocation2 + $0x8] sm:$0xf] %vm1689_vm13, %v1646_v28 }
 0x287   : > { %1796 = vrot.lane.b32.xlu1 %v4256_v42, %s3946_s23 }
 0x288   : > { %1794 = vrot.lane.b32.xlu0 %v4163_v37, %s3946_s23 }
 0x289   : > { %v1590_v2 = vpop.permute.xlu1 %1589 }
 0x28a   : > { %1624 = vst.msk [vmem:[#allocation2 + $0x38] sm:$0xf] %vm1609_vm12, %v1590_v2  ;;  %v1588_v39 = vpop.permute.xlu0 %1587 }
 0x28b   : > { %1623 = vst.msk [vmem:[#allocation2 + $0x34] sm:$0xf] %vm1609_vm12, %v1588_v39  ;;  %1792 = vrot.lane.b32.xlu2 %v4168_v43, %s3946_s23  ;;  %vm2523_vm12 = vcmask 814848  }
 0x28d   : > { %v1652_v12 = vpop.permute.xlu2 %1651 }
 0x28e   : > { %1695 = vst.msk [vmem:[#allocation2 + $0x14] sm:$0xf] %vm1689_vm13, %v1652_v12 }
 0x28f   : > { %1802 = vrot.lane.b32.xlu1 %v5487_v8, %s3946_s23 }
 0x290   : > { %1800 = vrot.lane.b32.xlu0 %v5492_v36, %s3946_s23 }
 0x291   : > { %v1644_v16 = vpop.permute.xlu1 %1643 }
 0x292   : > { %1691 = vst.msk [vmem:[#allocation2 + $0x4] sm:$0xf] %vm1689_vm13, %v1644_v16  ;;  %v1642_v29 = vpop.permute.xlu0 %1641 }
 0x293   : > { %1690 = vst.msk [vmem:[#allocation2] sm:$0xf] %vm1689_vm13, %v1642_v29  ;;  %1798 = vrot.lane.b32.xlu2 %v4222_v61, %s3946_s23 }
 0x295   : > { %v1658_v60 = vpop.permute.xlu2 %1657 }
 0x296   : > { %1698 = vst.msk [vmem:[#allocation2 + $0x20] sm:$0xf] %vm1689_vm13, %v1658_v60 }
 0x297   : > { %1871 = vrot.lane.b32.xlu1 %v4173_v47, %s3947_s24 }
 0x298   : > { %1869 = vrot.lane.b32.xlu0 %v4186_v54, %s3947_s24 }
 0x299   : > { %v1650_v25 = vpop.permute.xlu1 %1649 }
 0x29a   : > { %1694 = vst.msk [vmem:[#allocation2 + $0x10] sm:$0xf] %vm1689_vm13, %v1650_v25  ;;  %v1648_v3 = vpop.permute.xlu0 %1647 }
 0x29b   : > { %1693 = vst.msk [vmem:[#allocation2 + $0xc] sm:$0xf] %vm1689_vm13, %v1648_v3  ;;  %1804 = vrot.lane.b32.xlu2 %v5199_v56, %s3946_s23 }
 0x29d   : > { %v1664_v54 = vpop.permute.xlu2 %1663 }
 0x29e   : > { %1701 = vst.msk [vmem:[#allocation2 + $0x2c] sm:$0xf] %vm1689_vm13, %v1664_v54 }
 0x29f   : > { %2022 = vrot.lane.b32.xlu1 %v6895_v52, %s3948_s25 }
 0x2a0   : > { %1944 = vrot.lane.b32.xlu0 %v6885_v26, %s3949_s26 }
 0x2a1   : > { %v1656_v47 = vpop.permute.xlu1 %1655 }
 0x2a2   : > { %1697 = vst.msk [vmem:[#allocation2 + $0x1c] sm:$0xf] %vm1689_vm13, %v1656_v47  ;;  %v1654_v59 = vpop.permute.xlu0 %1653 }
 0x2a3   : > { %1696 = vst.msk [vmem:[#allocation2 + $0x18] sm:$0xf] %vm1689_vm13, %v1654_v59  ;;  %1942 = vrot.lane.b32.xlu2 %v6880_v30, %s3949_s26  ;;  %v6902_v59 = vld [vmem:[#allocation34_spill] sm:$0xff] }
 0x2a5   : > { %v1670_v26 = vpop.permute.xlu2 %1669 }
 0x2a6   : > { %1704 = vst.msk [vmem:[#allocation2 + $0x38] sm:$0xf] %vm1689_vm13, %v1670_v26 }
 0x2a7   : > { %2096 = vrot.lane.b32.xlu1 %v4743_v34, %s3950_s28 }
 0x2a8   : > { %2094 = vrot.lane.b32.xlu0 %v4747_v38, %s3950_s28 }
 0x2a9   : > { %v1662_v52 = vpop.permute.xlu1 %1661 }
 0x2aa   : > { %1700 = vst.msk [vmem:[#allocation2 + $0x28] sm:$0xf] %vm1689_vm13, %v1662_v52  ;;  %v1660_v18 = vpop.permute.xlu0 %1659 }
 0x2ab   : > { %1699 = vst.msk [vmem:[#allocation2 + $0x24] sm:$0xf] %vm1689_vm13, %v1660_v18  ;;  %2024 = vrot.lane.b32.xlu2 %v6867_v23, %s3948_s25 }
 0x2ad   : > { %v1716_v34 = vpop.permute.xlu2 %1715 }
 0x2ae   : > { %1763 = vst.msk [vmem:[#allocation2 + $0x4] sm:$0xf] %vm1761_vm15, %v1716_v34 }
 0x2af   : > { %2161 = vrot.lane.b32.xlu1 %v4182_v55, %s3951_s29 }
 0x2b0   : > { %1887 = vrot.lane.b32.xlu0 %v6875_v1, %s3947_s24 }
 0x2b1   : > { %v1668_v38 = vpop.permute.xlu1 %1667 }
 0x2b2   : > { %1703 = vst.msk [vmem:[#allocation2 + $0x34] sm:$0xf] %vm1689_vm13, %v1668_v38  ;;  %v1666_v30 = vpop.permute.xlu0 %1665  ;;  %v6903_v38 = vld [vmem:[#allocation11_spill] sm:$0xff] }
 0x2b3   : > { %1702 = vst.msk [vmem:[#allocation2 + $0x30] sm:$0xf] %vm1689_vm13, %v1666_v30  ;;  %1885 = vrot.lane.b32.xlu2 %v6878_v58, %s3947_s24 }
 0x2b5   : > { %v1722_v55 = vpop.permute.xlu2 %1721 }
 0x2b6   : > { %1766 = vst.msk [vmem:[#allocation2 + $0x10] sm:$0xf] %vm1761_vm15, %v1722_v55 }
 0x2b7   : > { %1960 = vrot.lane.b32.xlu1 %v6889_v19, %s3949_s26 }
 0x2b8   : > { %1958 = vrot.lane.b32.xlu0 %v6890_v32, %s3949_s26 }
 0x2b9   : > { %v1714_v23 = vpop.permute.xlu1 %1713 }
 0x2ba   : > { %1762 = vst.msk [vmem:[#allocation2] sm:$0xf] %vm1761_vm15, %v1714_v23  ;;  %v1672_v14 = vpop.permute.xlu0 %1671 }
 0x2bb   : > { %1705 = vst.msk [vmem:[#allocation2 + $0x3c] sm:$0xf] %vm1689_vm13, %v1672_v14  ;;  %2163 = vrot.lane.b32.xlu2 %v4104_v45, %s3951_s29  ;;  %vm3473_vm13 = vcmask 1043456  }
 0x2bd   : > { %v1728_v28 = vpop.permute.xlu2 %1727 }
 0x2be   : > { %1769 = vst.msk [vmem:[#allocation2 + $0x1c] sm:$0xf] %vm1761_vm15, %v1728_v28 }
 0x2bf   : > { %2038 = vrot.lane.b32.xlu1 %v4667_v62, %s3948_s25 }
 0x2c0   : > { %2252 = vrot.lane.b32.xlu0 %v4238_v7, %s3952_s30 }
 0x2c1   : > { %v1720_v2 = vpop.permute.xlu1 %1719 }
 0x2c2   : > { %1765 = vst.msk [vmem:[#allocation2 + $0xc] sm:$0xf] %vm1761_vm15, %v1720_v2  ;;  %v1718_v39 = vpop.permute.xlu0 %1717 }
 0x2c3   : > { %1764 = vst.msk [vmem:[#allocation2 + $0x8] sm:$0xf] %vm1761_vm15, %v1718_v39  ;;  %2250 = vrot.lane.b32.xlu2 %v4269_v17, %s3952_s30 }
 0x2c5   : > { %v1734_v45 = vpop.permute.xlu2 %1733 }
 0x2c6   : > { %1772 = vst.msk [vmem:[#allocation2 + $0x28] sm:$0xf] %vm1761_vm15, %v1734_v45 }
 0x2c7   : > { %2325 = vrot.lane.b32.xlu1 %v6883_v22, %s3953_s5 }
 0x2c8   : > { %2323 = vrot.lane.b32.xlu0 %v6884_v40, %s3953_s5 }
 0x2c9   : > { %v1726_v12 = vpop.permute.xlu1 %1725 }
 0x2ca   : > { %1768 = vst.msk [vmem:[#allocation2 + $0x18] sm:$0xf] %vm1761_vm15, %v1726_v12  ;;  %v1724_v16 = vpop.permute.xlu0 %1723 }
 0x2cb   : > { %1767 = vst.msk [vmem:[#allocation2 + $0x14] sm:$0xf] %vm1761_vm15, %v1724_v16  ;;  %2040 = vrot.lane.b32.xlu2 %v4714_v10, %s3948_s25  ;;  %v3775_v16 = vld [vmem:[%s6644_s1 + $0x38] sm:$0xff] }
 0x2cc   : > { %2672 = vmatpush.bf16.msra.mxu0 %v3775_v16  ;;  %3777 = vmatpush.bf16.msra.mxu2 %v3775_v16 }
 0x2cd   : > { %v1740_v29 = vpop.permute.xlu2 %1739 }
 0x2ce   : > { %1775 = vst.msk [vmem:[#allocation2 + $0x34] sm:$0xf] %vm1761_vm15, %v1740_v29 }
 0x2cf   : > { %2403 = vrot.lane.b32.xlu1 %v6866_v4, %s3954_s6 }
 0x2d0   : > { %2112 = vrot.lane.b32.xlu0 %v4818_v33, %s3950_s28 }
 0x2d1   : > { %v1732_v60 = vpop.permute.xlu1 %1731 }
 0x2d2   : > { %1771 = vst.msk [vmem:[#allocation2 + $0x24] sm:$0xf] %vm1761_vm15, %v1732_v60  ;;  %v1730_v25 = vpop.permute.xlu0 %1729 }
 0x2d3   : > { %1770 = vst.msk [vmem:[#allocation2 + $0x20] sm:$0xf] %vm1761_vm15, %v1730_v25  ;;  %2110 = vrot.lane.b32.xlu2 %v4832_v27, %s3950_s28 }
 0x2d5   : > { %v1781_v3 = vpop.permute.xlu2 %1780 }
 0x2d6   : > { %1829 = vst.msk [vmem:[#allocation2] sm:$0xf] %vm1828_vm0, %v1781_v3  ;;  %v6906_v3 = vld [vmem:[#allocation22_spill] sm:$0xff] }
 0x2d7   : > { %2179 = vrot.lane.b32.xlu1 %v5487_v8, %s3951_s29 }
 0x2d8   : > { %2177 = vrot.lane.b32.xlu0 %v5492_v36, %s3951_s29 }
 0x2d9   : > { %v1738_v54 = vpop.permute.xlu1 %1737 }
 0x2da   : > { %1774 = vst.msk [vmem:[#allocation2 + $0x30] sm:$0xf] %vm1761_vm15, %v1738_v54  ;;  %v1736_v47 = vpop.permute.xlu0 %1735  ;;  %v3772_v54 = vld [vmem:[%s6644_s1 + $0x20] sm:$0xff] }
 0x2db   : > { %1773 = vst.msk [vmem:[#allocation2 + $0x2c] sm:$0xf] %vm1761_vm15, %v1736_v47  ;;  %2405 = vrot.lane.b32.xlu2 %v4663_v48, %s3954_s6  ;;  %v6907_v47 = vld [vmem:[#allocation24_spill] sm:$0xff] }
 0x2dd   : > { %v1787_v8 = vpop.permute.xlu2 %1786 }
 0x2de   : > { %1832 = vst.msk [vmem:[#allocation2 + $0xc] sm:$0xf] %vm1828_vm0, %v1787_v8 }
 0x2df   : > { %2266 = vrot.lane.b32.xlu1 %v6902_v59, %s3952_s30 }
 0x2e0   : > { %2477 = vrot.lane.b32.xlu0 %v4774_v20, %s3955_s7 }
 0x2e1   : > { %v1744_v36 = vpop.permute.xlu1 %1743 }
 0x2e2   : > { %1777 = vst.msk [vmem:[#allocation2 + $0x3c] sm:$0xf] %vm1761_vm15, %v1744_v36  ;;  %v1742_v26 = vpop.permute.xlu0 %1741 }
 0x2e3   : > { %1776 = vst.msk [vmem:[#allocation2 + $0x38] sm:$0xf] %vm1761_vm15, %v1742_v26  ;;  %2475 = vrot.lane.b32.xlu2 %v4790_v49, %s3955_s7  ;;  %v3771_v26 = vld [vmem:[%s6644_s1 + $0x18] sm:$0xff] }
 0x2e5   : > { %v1793_v52 = vpop.permute.xlu2 %1792 }
 0x2e6   : > { %1835 = vst.msk [vmem:[#allocation2 + $0x18] sm:$0xf] %vm1828_vm0, %v1793_v52  ;;  %v6908_v52 = vld [vmem:[#allocation31_spill] sm:$0xff] }
 0x2e7   : > { %2341 = vrot.lane.b32.xlu1 %v6893_v35, %s3953_s5 }
 0x2e8   : > { %2339 = vrot.lane.b32.xlu0 %v5024_v9, %s3953_s5 }
 0x2e9   : > { %v1785_v18 = vpop.permute.xlu1 %1784 }
 0x2ea   : > { %1831 = vst.msk [vmem:[#allocation2 + $0x8] sm:$0xf] %vm1828_vm0, %v1785_v18  ;;  %v1783_v34 = vpop.permute.xlu0 %1782  ;;  %v3770_v18 = vld [vmem:[%s6644_s1 + $0x10] sm:$0xff] }
 0x2eb   : > { %1830 = vst.msk [vmem:[#allocation2 + $0x4] sm:$0xf] %vm1828_vm0, %v1783_v34  ;;  %2268 = vrot.lane.b32.xlu2 %v6903_v38, %s3952_s30 }
 0x2ed   : > { %v1799_v30 = vpop.permute.xlu2 %1798 }
 0x2ee   : > { %1838 = vst.msk [vmem:[#allocation2 + $0x24] sm:$0xf] %vm1828_vm0, %v1799_v30 }
 0x2ef   : > { %2491 = vrot.lane.b32.xlu1 %v5125_v46, %s3955_s7 }
 0x2f0   : > { %2421 = vrot.lane.b32.xlu0 %v5034_v41, %s3954_s6 }
 0x2f1   : > { %v1791_v55 = vpop.permute.xlu1 %1790 }
 0x2f2   : > { %1834 = vst.msk [vmem:[#allocation2 + $0x14] sm:$0xf] %vm1828_vm0, %v1791_v55  ;;  %v1789_v23 = vpop.permute.xlu0 %1788 }
 0x2f3   : > { %1833 = vst.msk [vmem:[#allocation2 + $0x10] sm:$0xf] %vm1828_vm0, %v1789_v23  ;;  %2419 = vrot.lane.b32.xlu2 %v5074_v5, %s3954_s6 }
 0x2f5   : > { %v1805_v14 = vpop.permute.xlu2 %1804 }
 0x2f6   : > { %1841 = vst.msk [vmem:[#allocation2 + $0x30] sm:$0xf] %vm1828_vm0, %v1805_v14 }
 0x2f7   : > { %1875 = vrot.lane.b32.xlu1 %v4238_v7, %s3947_s24 }
 0x2f8   : > { %1873 = vrot.lane.b32.xlu0 %v4269_v17, %s3947_s24 }
 0x2f9   : > { %v1797_v28 = vpop.permute.xlu1 %1796 }
 0x2fa   : > { %1837 = vst.msk [vmem:[#allocation2 + $0x20] sm:$0xf] %vm1828_vm0, %v1797_v28  ;;  %v1795_v2 = vpop.permute.xlu0 %1794 }
 0x2fb   : > { %1836 = vst.msk [vmem:[#allocation2 + $0x1c] sm:$0xf] %vm1828_vm0, %v1795_v2  ;;  %2493 = vrot.lane.b32.xlu2 %v5148_v0, %s3955_s7 }
 0x2fd   : > { %v1943_v7 = vpop.permute.xlu2 %1942 }
 0x2ff   : > { %2026 = vrot.lane.b32.xlu1 %v6866_v4, %s3948_s25 }
 0x300   : > { %1948 = vrot.lane.b32.xlu0 %v6883_v22, %s3949_s26 }
 0x301   : > { %v1803_v17 = vpop.permute.xlu1 %1802 }
 0x302   : > { %1840 = vst.msk [vmem:[#allocation2 + $0x2c] sm:$0xf] %vm1828_vm0, %v1803_v17  ;;  %v1801_v39 = vpop.permute.xlu0 %1800  ;;  %v6912_v17 = vld [vmem:[#allocation23_spill] sm:$0xff] }
 0x303   : > { %1839 = vst.msk [vmem:[#allocation2 + $0x28] sm:$0xf] %vm1828_vm0, %v1801_v39  ;;  %1946 = vrot.lane.b32.xlu2 %v6884_v40, %s3949_s26 }
 0x305   : > { %v2025_v4 = vpop.permute.xlu2 %2024 }
 0x307   : > { %2100 = vrot.lane.b32.xlu1 %v4774_v20, %s3950_s28 }
 0x308   : > { %2098 = vrot.lane.b32.xlu0 %v4790_v49, %s3950_s28 }
 0x309   : > { %v1872_v45 = vpop.permute.xlu1 %1871 }
 0x30a   : > { %1919 = vst.msk [vmem:[#allocation2 + $0x4] sm:$0xf] %vm1917_vm1, %v1872_v45  ;;  %v1870_v22 = vpop.permute.xlu0 %1869 }
 0x30b   : > { %1918 = vst.msk [vmem:[#allocation2] sm:$0xf] %vm1917_vm1, %v1870_v22  ;;  %2028 = vrot.lane.b32.xlu2 %v4663_v48, %s3948_s25  ;;  %v6913_v22 = vld [vmem:[#allocation15_spill] sm:$0xff] }
 0x30c   : > { %1991 = vst.msk [vmem:[#allocation2] sm:$0xf] %vm1990_vm3, %v1943_v7  ;;  %v6911_v7 = vld [vmem:[#allocation29_spill] sm:$0xff] }
 0x30d   : > { %v1886_v20 = vpop.permute.xlu2 %1885 }
 0x30e   : > { %1926 = vst.msk [vmem:[#allocation2 + $0x20] sm:$0xf] %vm1917_vm1, %v1886_v20 }
 0x30f   : > { %2165 = vrot.lane.b32.xlu1 %v4101_v44, %s3951_s29 }
 0x310   : > { %1891 = vrot.lane.b32.xlu0 %v6903_v38, %s3947_s24 }
 0x311   : > { %v2023_v49 = vpop.permute.xlu1 %2022 }
 0x312   : > { %2071 = vst.msk [vmem:[#allocation2] sm:$0xf] %vm6767_vm4, %v2023_v49  ;;  %v1945_v40 = vpop.permute.xlu0 %1944 }
 0x313   : > { %1992 = vst.msk [vmem:[#allocation2 + $0x4] sm:$0xf] %vm1990_vm3, %v1945_v40  ;;  %1889 = vrot.lane.b32.xlu2 %v6902_v59, %s3947_s24 }
 0x314   : > { %2072 = vst.msk [vmem:[#allocation2 + $0x4] sm:$0xf] %vm6767_vm4, %v2025_v4 }
 0x315   : > { %v2164_v44 = vpop.permute.xlu2 %2163 }
 0x317   : > { %1964 = vrot.lane.b32.xlu1 %v6893_v35, %s3949_s26  ;;  %v6904_v35 = vld [vmem:[#allocation8_spill] sm:$0xff] }
 0x318   : > { %1962 = vrot.lane.b32.xlu0 %v5024_v9, %s3949_s26  ;;  %v3774_v9 = vld [vmem:[%s6644_s1 + $0x30] sm:$0xff] }
 0x319   : > { %v2097_v48 = vpop.permute.xlu1 %2096  ;;  %2673 = vmatpush.bf16.msra.mxu0 %v3774_v9  ;;  %3778 = vmatpush.bf16.msra.mxu2 %v3774_v9 }
 0x31a   : > { %2144 = vst.msk [vmem:[#allocation2 + $0x4] sm:$0xf] %vm6768_vm6, %v2097_v48  ;;  %v2095_v12 = vpop.permute.xlu0 %2094 }
 0x31b   : > { %2143 = vst.msk [vmem:[#allocation2] sm:$0xf] %vm6768_vm6, %v2095_v12  ;;  %2167 = vrot.lane.b32.xlu2 %v4135_v13, %s3951_s29  ;;  %v3773_v13 = vld [vmem:[%s6644_s1 + $0x28] sm:$0xff] }
 0x31c   : > { %2211 = vst.msk [vmem:[#allocation2 + $0x4] sm:$0xf] %vm2209_vm7, %v2164_v44 }
 0x31d   : > { %v2251_v29 = vpop.permute.xlu2 %2250  ;;  %2674 = vmatpush.bf16.msra.mxu0 %v3773_v13  ;;  %3779 = vmatpush.bf16.msra.mxu2 %v3773_v13 }
 0x31f   : > { %2042 = vrot.lane.b32.xlu1 %v5074_v5, %s3948_s25  ;;  %v6905_v5 = vld [vmem:[#allocation4_spill] sm:$0xff] }
 0x320   : > { %2256 = vrot.lane.b32.xlu0 %v6904_v35, %s3952_s30 }
 0x321   : > { %v2162_v60 = vpop.permute.xlu1 %2161  ;;  %2675 = vmatpush.bf16.msra.mxu0 %v3772_v54  ;;  %3780 = vmatpush.bf16.msra.mxu2 %v3772_v54 }
 0x322   : > { %2210 = vst.msk [vmem:[#allocation2] sm:$0xf] %vm2209_vm7, %v2162_v60  ;;  %v1888_v25 = vpop.permute.xlu0 %1887  ;;  %v3889_v60 = vld [vmem:[%s4021_s27 + $0x70] sm:$0xf] }
 0x323   : > { %1927 = vst.msk [vmem:[#allocation2 + $0x24] sm:$0xf] %vm1917_vm1, %v1888_v25  ;;  %2254 = vrot.lane.b32.xlu2 %v6905_v5, %s3952_s30 }
 0x324   : > { %2299 = vst.msk [vmem:[#allocation2] sm:$0xf] %vm2298_vm9, %v2251_v29 }
 0x325   : > { %v2041_v59 = vpop.permute.xlu2 %2040  ;;  %2676 = vmatpush.bf16.msra.mxu0 %v3771_v26  ;;  %3781 = vmatpush.bf16.msra.mxu2 %v3771_v26  ;;  %v6915_v26 = vld [vmem:[#allocation6_spill] sm:$0xff] }
 0x327   : > { %2329 = vrot.lane.b32.xlu1 %v6906_v3, %s3953_s5 }
 0x328   : > { %2327 = vrot.lane.b32.xlu0 %v6907_v47, %s3953_s5 }
 0x329   : > { %v1961_v8 = vpop.permute.xlu1 %1960  ;;  %2677 = vmatpush.bf16.msra.mxu0 %v3770_v18  ;;  %3782 = vmatpush.bf16.msra.mxu2 %v3770_v18 }
 0x32a   : > { %2000 = vst.msk [vmem:[#allocation2 + $0x24] sm:$0xf] %vm1990_vm3, %v1961_v8  ;;  %v1959_v36 = vpop.permute.xlu0 %1958 }
 0x32b   : > { %1999 = vst.msk [vmem:[#allocation2 + $0x20] sm:$0xf] %vm1990_vm3, %v1959_v36  ;;  %2044 = vrot.lane.b32.xlu2 %v5034_v41, %s3948_s25  ;;  %v3769_v41 = vld [vmem:[%s6644_s1 + $0x8] sm:$0xff] }
 0x32c   : > { %2080 = vst.msk [vmem:[#allocation2 + $0x24] sm:$0xf] %vm6767_vm4, %v2041_v59 }
 0x32d   : > { %v2111_v34 = vpop.permute.xlu2 %2110  ;;  %2678 = vmatpush.bf16.msra.mxu0 %v3769_v41  ;;  %3783 = vmatpush.bf16.msra.mxu2 %v3769_v41 }
 0x32f   : > { %2407 = vrot.lane.b32.xlu1 %v6908_v52, %s3954_s6 }
 0x330   : > { %2116 = vrot.lane.b32.xlu0 %v5148_v0, %s3950_s28  ;;  %v3768_v0 = vld [vmem:[%s6644_s1] sm:$0xff] }
 0x331   : > { %v2039_v38 = vpop.permute.xlu1 %2038  ;;  %2679 = vmatpush.bf16.msra.mxu0 %v3768_v0  ;;  %3784 = vmatpush.bf16.msra.mxu2 %v3768_v0 }
 0x332   : > { %2079 = vst.msk [vmem:[#allocation2 + $0x20] sm:$0xf] %vm6767_vm4, %v2039_v38  ;;  %v2253_v30 = vpop.permute.xlu0 %2252 }
 0x333   : > { %2300 = vst.msk [vmem:[#allocation2 + $0x4] sm:$0xf] %vm2298_vm9, %v2253_v30  ;;  %2114 = vrot.lane.b32.xlu2 %v5125_v46, %s3950_s28  ;;  %v6909_v46 = vld [vmem:[#allocation27_spill] sm:$0xff] }
 0x334   : > { %2151 = vst.msk [vmem:[#allocation2 + $0x20] sm:$0xf] %vm6768_vm6, %v2111_v34 }
 0x335   : > { %v2406_v55 = vpop.permute.xlu2 %2405 }
 0x337   : > { %2183 = vrot.lane.b32.xlu1 %v5187_v50, %s3951_s29  ;;  %v6910_v50 = vld [vmem:[#allocation19_spill] sm:$0xff] }
 0x338   : > { %2181 = vrot.lane.b32.xlu0 %v5199_v56, %s3951_s29 }
 0x339   : > { %v2326_v23 = vpop.permute.xlu1 %2325 }
 0x33a   : > { %2373 = vst.msk [vmem:[#allocation2 + $0x4] sm:$0xf] %vm2371_vm10, %v2326_v23  ;;  %v2324_v14 = vpop.permute.xlu0 %2323  ;;  %v5814_v23 = vld [vmem:[%s4021_s27 + $0x78] sm:$0xf] }
 0x33b   : > { %2372 = vst.msk [vmem:[#allocation2] sm:$0xf] %vm2371_vm10, %v2324_v14  ;;  %2409 = vrot.lane.b32.xlu2 %v6909_v46, %s3954_s6  ;;  %v6918_v14 = vld [vmem:[#allocation32_spill] sm:$0xff] }
 0x33c   : > { %2453 = vst.msk [vmem:[#allocation2 + $0x4] sm:$0xf] %vm2451_vm11, %v2406_v55  ;;  %v5810_v55 = vld [vmem:[%s4021_s27 + $0x7c] sm:$0xf] }
 0x33d   : > { %v2476_v56 = vpop.permute.xlu2 %2475 }
 0x33f   : > { %2270 = vrot.lane.b32.xlu1 %v6910_v50, %s3952_s30 }
 0x340   : > { %2481 = vrot.lane.b32.xlu0 %v4814_v63, %s3955_s7 }
 0x341   : > { %v2404_v28 = vpop.permute.xlu1 %2403 }
 0x342   : > { %2452 = vst.msk [vmem:[#allocation2] sm:$0xf] %vm2451_vm11, %v2404_v28  ;;  %v2113_v2 = vpop.permute.xlu0 %2112 }
 0x343   : > { %2152 = vst.msk [vmem:[#allocation2 + $0x24] sm:$0xf] %vm6768_vm6, %v2113_v2  ;;  %2479 = vrot.lane.b32.xlu2 %v4769_v24, %s3955_s7 }
 0x344   : > { %2524 = vst.msk [vmem:[#allocation2] sm:$0xf] %vm2523_vm12, %v2476_v56 }
 0x345   : > { %v2269_v39 = vpop.permute.xlu2 %2268 }
 0x347   : > { %2345 = vrot.lane.b32.xlu1 %v6911_v7, %s3953_s5 }
 0x348   : > { %2343 = vrot.lane.b32.xlu0 %v6912_v17, %s3953_s5 }
 0x349   : > { %v2180_v4 = vpop.permute.xlu1 %2179 }
 0x34a   : > { %2219 = vst.msk [vmem:[#allocation2 + $0x24] sm:$0xf] %vm2209_vm7, %v2180_v4  ;;  %v2178_v45 = vpop.permute.xlu0 %2177  ;;  %v1846_v4 = vshrl.u32 %v5814_v23, 16 }
 0x34b   : > { %2218 = vst.msk [vmem:[#allocation2 + $0x20] sm:$0xf] %vm2209_vm7, %v2178_v45  ;;  %2272 = vrot.lane.b32.xlu2 %v6913_v22, %s3952_s30  ;;  %v1849_v45 = vshll.u32 %v5814_v23, 16 }
 0x34c   : > { %2308 = vst.msk [vmem:[#allocation2 + $0x24] sm:$0xf] %vm2298_vm9, %v2269_v39 }
 0x34d   : > { %v2420_v20 = vpop.permute.xlu2 %2419 }
 0x34f   : > { %2495 = vrot.lane.b32.xlu1 %v5446_v57, %s3955_s7 }
 0x350   : > { %2425 = vrot.lane.b32.xlu0 %v5386_v15, %s3954_s6 }
 0x351   : > { %v2267_v49 = vpop.permute.xlu1 %2266 }
 0x352   : > { %2307 = vst.msk [vmem:[#allocation2 + $0x20] sm:$0xf] %vm2298_vm9, %v2267_v49  ;;  %v2478_v40 = vpop.permute.xlu0 %2477  ;;  %v1848_v49 = vrot.slane %v1846_v4, 4 }
 0x353   : > { %2525 = vst.msk [vmem:[#allocation2 + $0x4] sm:$0xf] %vm2523_vm12, %v2478_v40  ;;  %2423 = vrot.lane.b32.xlu2 %v5399_v53, %s3954_s6  ;;  %v1851_v40 = vrot.slane %v1849_v45, 5 }
 0x355   : > { %v2494_v44 = vpop.permute.xlu2 %2493 }
 0x357   : > { %1879 = vrot.lane.b32.xlu1 %v6904_v35, %s3947_s24 }
 0x358   : > { %1877 = vrot.lane.b32.xlu0 %v6905_v5, %s3947_s24 }
 0x359   : > { %v2342_v48 = vpop.permute.xlu1 %2341 }
 0x35a   : > { %2381 = vst.msk [vmem:[#allocation2 + $0x24] sm:$0xf] %vm2371_vm10, %v2342_v48  ;;  %v2340_v12 = vpop.permute.xlu0 %2339  ;;  %v3760_v16 = vld [vmem:[#allocation2] sm:$0xff] }
 0x35b   : > { %2380 = vst.msk [vmem:[#allocation2 + $0x20] sm:$0xf] %vm2371_vm10, %v2340_v12  ;;  %2680 = vmatmul.bf16.vlgmr.msra.gmra.mxu0 %v3760_v16  ;;  %2497 = vrot.lane.b32.xlu2 %v5442_v21, %s3955_s7 }
 0x35c   : > { %2460 = vst.msk [vmem:[#allocation2 + $0x20] sm:$0xf] %vm2451_vm11, %v2420_v20  ;;  %v3661_v20 = vrot.slane %v5814_v23, 9 }
 0x35d   : > { %v1947_v9 = vpop.permute.xlu2 %1946 }
 0x35f   : > { %2030 = vrot.lane.b32.xlu1 %v6908_v52, %s3948_s25 }
 0x360   : > { %1952 = vrot.lane.b32.xlu0 %v6906_v3, %s3949_s26 }
 0x361   : > { %v2492_v35 = vpop.permute.xlu1 %2491 }
 0x362   : > { %2532 = vst.msk [vmem:[#allocation2 + $0x20] sm:$0xf] %vm2523_vm12, %v2492_v35  ;;  %v2422_v29 = vpop.permute.xlu0 %2421 }
 0x363   : > { %2461 = vst.msk [vmem:[#allocation2 + $0x24] sm:$0xf] %vm2451_vm11, %v2422_v29  ;;  %1950 = vrot.lane.b32.xlu2 %v6907_v47, %s3949_s26 }
 0x364   : > { %2533 = vst.msk [vmem:[#allocation2 + $0x24] sm:$0xf] %vm2523_vm12, %v2494_v44  ;;  %v1937_v44 = vrot.slane %v5810_v55, 5 }
 0x365   : > { %v2029_v25 = vpop.permute.xlu2 %2028 }
 0x367   : > { %2102 = vrot.lane.b32.xlu1 %v4769_v24, %s3950_s28 }
 0x368   : > { %1806 = vrot.lane.b32.xlu0 %v3889_v60, %s3946_s23 }
 0x369   : > { %v1876_v13 = vpop.permute.xlu1 %1875 }
 0x36a   : > { %1921 = vst.msk [vmem:[#allocation2 + $0xc] sm:$0xf] %vm1917_vm1, %v1876_v13  ;;  %v1874_v5 = vpop.permute.xlu0 %1873  ;;  %v2008_v13 = vrot.slane %v1849_v45, 6 }
 0x36b   : > { %1920 = vst.msk [vmem:[#allocation2 + $0x8] sm:$0xf] %vm1917_vm1, %v1874_v5  ;;  %v3764_v3 = vld [vmem:[#allocation2 + $0x20] sm:$0xff]  ;;  %2032 = vrot.lane.b32.xlu2 %v6909_v46, %s3948_s25 }
 0x36c   : > { %1993 = vst.msk [vmem:[#allocation2 + $0x8] sm:$0xf] %vm1990_vm3, %v1947_v9  ;;  %2700 = vmatmul.bf16.vlgmr.msra.gmra.mxu2 %v3764_v3  ;;  %v1852_v3 = vor.u32 %v1851_v40, %v1848_v49  ;;  %v3662_v40 = vrot.slane %v5814_v23, 10 }
 0x36d   : > { %v1890_v24 = vpop.permute.xlu2 %1889 }
 0x36e   : > { %1928 = vst.msk [vmem:[#allocation2 + $0x28] sm:$0xf] %vm1917_vm1, %v1890_v24 }
 0x36f   : > { %1895 = vrot.lane.b32.xlu1 %v6913_v22, %s3947_s24  ;;  %v6919_v22 = vld [vmem:[#allocation33_spill] sm:$0xff] }
 0x370   : > { %1893 = vrot.lane.b32.xlu0 %v6910_v50, %s3947_s24 }
 0x371   : > { %v2027_v54 = vpop.permute.xlu1 %2026 }
 0x372   : > { %2073 = vst.msk [vmem:[#allocation2 + $0x8] sm:$0xf] %vm6767_vm4, %v2027_v54  ;;  %v1949_v47 = vpop.permute.xlu0 %1948  ;;  %v5847_v54 = vsel %vm4296_vm5, %v3661_v20, %v1937_v44 }
 0x373   : > { %1994 = vst.msk [vmem:[#allocation2 + $0xc] sm:$0xf] %vm1990_vm3, %v1949_v47  ;;  %2104 = vrot.lane.b32.xlu2 %v4814_v63, %s3950_s28  ;;  %v6914_v63 = vld [vmem:[#allocation5_spill] sm:$0xff] }
 0x374   : > { %2074 = vst.msk [vmem:[#allocation2 + $0xc] sm:$0xf] %vm6767_vm4, %v2029_v25  ;;  %v2007_v25 = vrot.slane %v1846_v4, 5 }
 0x375   : > { %v2168_v59 = vpop.permute.xlu2 %2167 }
 0x377   : > { %1966 = vrot.lane.b32.xlu1 %v6912_v17, %s3949_s26 }
 0x378   : > { %2171 = vrot.lane.b32.xlu0 %v4163_v37, %s3951_s29 }
 0x379   : > { %v2101_v8 = vpop.permute.xlu1 %2100 }
 0x37a   : > { %2146 = vst.msk [vmem:[#allocation2 + $0xc] sm:$0xf] %vm6768_vm6, %v2101_v8  ;;  %v2099_v36 = vpop.permute.xlu0 %2098 }
 0x37b   : > { %2145 = vst.msk [vmem:[#allocation2 + $0x8] sm:$0xf] %vm6768_vm6, %v2099_v36  ;;  %2169 = vrot.lane.b32.xlu2 %v4168_v43, %s3951_s29  ;;  %v6916_v43 = vld [vmem:[#allocation21_spill] sm:$0xff] }
 0x37c   : > { %2213 = vst.msk [vmem:[#allocation2 + $0xc] sm:$0xf] %vm2209_vm7, %v2168_v59 }
 0x37d   : > { %v2255_v52 = vpop.permute.xlu2 %2254 }
 0x37f   : > { %2260 = vrot.lane.b32.xlu1 %v6914_v63, %s3952_s30 }
 0x380   : > { %2258 = vrot.lane.b32.xlu0 %v6915_v26, %s3952_s30 }
 0x381   : > { %v2166_v37 = vpop.permute.xlu1 %2165 }
 0x382   : > { %2212 = vst.msk [vmem:[#allocation2 + $0x8] sm:$0xf] %vm2209_vm7, %v2166_v37  ;;  %v1892_v18 = vpop.permute.xlu0 %1891  ;;  %v2009_v37 = vor.u32 %v2008_v13, %v2007_v25 }
 0x383   : > { %1929 = vst.msk [vmem:[#allocation2 + $0x2c] sm:$0xf] %vm1917_vm1, %v1892_v18  ;;  %1968 = vrot.lane.b32.xlu2 %v6911_v7, %s3949_s26  ;;  %v5827_v7 = vld [vmem:[%s4021_s27 + $0x80] sm:$0x3]  ;;  %v1853_v18 = vrot.slane %v1852_v3, 4 }
 0x384   : > { %2301 = vst.msk [vmem:[#allocation2 + $0x8] sm:$0xf] %vm2298_vm9, %v2255_v52  ;;  %v1865_v39 = vshll.u32 %v5827_v7, 16  ;;  %v2016_v9 = vshrl.u32 %v5827_v7, 16  ;;  %v2092_v4 = vrot.slane %v5827_v7, 6 }
 0x385   : > { %v2045_v34 = vpop.permute.xlu2 %2044 }
 0x386   : > { %v1867_v60 = vrot.slane %v1865_v39, 5  ;;  %v2018_v59 = vrot.slane %v2016_v9, 5  ;;  %v2019_v8 = vrot.slane %v1865_v39, 6 }
 0x387   : > { %2331 = vrot.lane.b32.xlu1 %v6916_v43, %s3953_s5 }
 0x388   : > { %2048 = vrot.lane.b32.xlu0 %v5386_v15, %s3948_s25 }
 0x389   : > { %v1965_v38 = vpop.permute.xlu1 %1964 }
 0x38a   : > { %2002 = vst.msk [vmem:[#allocation2 + $0x2c] sm:$0xf] %vm1990_vm3, %v1965_v38  ;;  %v1963_v30 = vpop.permute.xlu0 %1962  ;;  %v2020_v38 = vor.u32 %v2019_v8, %v2018_v59 }
 0x38b   : > { %2001 = vst.msk [vmem:[#allocation2 + $0x28] sm:$0xf] %vm1990_vm3, %v1963_v30  ;;  %2046 = vrot.lane.b32.xlu2 %v5399_v53, %s3948_s25  ;;  %v1855_v53 = vshll.u32 %v5810_v55, 16 }
 0x38c   : > { %2082 = vst.msk [vmem:[#allocation2 + $0x2c] sm:$0xf] %vm6767_vm4, %v2045_v34 }
 0x38d   : > { %v2115_v15 = vpop.permute.xlu2 %2114  ;;  %v1857_v56 = vrot.slane %v1855_v53, 5  ;;  %v2012_v16 = vrot.slane %v1855_v53, 6 }
 0x38f   : > { %2120 = vrot.lane.b32.xlu1 %v5442_v21, %s3950_s28  ;;  %v1859_v21 = vshrl.u32 %v5810_v55, 16  ;;  %v5864_v53 = vsel %vm4067_vm2, %v1853_v18, %v1857_v56 }
 0x390   : > { %2118 = vrot.lane.b32.xlu0 %v5446_v57, %s3950_s28  ;;  %v6917_v57 = vld [vmem:[#allocation28_spill] sm:$0xff] }
 0x391   : > { %v2043_v41 = vpop.permute.xlu1 %2042  ;;  %v1861_v28 = vrot.slane %v1859_v21, 4  ;;  %v2011_v12 = vrot.slane %v1859_v21, 5 }
 0x392   : > { %2081 = vst.msk [vmem:[#allocation2 + $0x28] sm:$0xf] %vm6767_vm4, %v2043_v41  ;;  %v2257_v0 = vpop.permute.xlu0 %2256  ;;  %v2010_v41 = vrot.slane %v2009_v37, 4 }
 0x393   : > { %2302 = vst.msk [vmem:[#allocation2 + $0xc] sm:$0xf] %vm2298_vm9, %v2257_v0  ;;  %2333 = vrot.lane.b32.xlu2 %v6917_v57, %s3953_s5  ;;  %v1862_v17 = vor.u32 %v1861_v28, %v1857_v56  ;;  %v2013_v47 = vor.u32 %v2012_v16, %v2011_v12  ;;  %v1939_v56 = vrot.slane %v1937_v44, 4  ;;  %v1940_v28 = vrot.slane %v5827_v7, 5 }
 0x394   : > { %2153 = vst.msk [vmem:[#allocation2 + $0x28] sm:$0xf] %vm6768_vm6, %v2115_v15 }
 0x395   : > { %v2410_v46 = vpop.permute.xlu2 %2409  ;;  %v1863_v29 = vrot.slane %v1862_v17, 4  ;;  %v2015_v34 = vrot.slane %v2013_v47, 4  ;;  %v1941_v20 = vsel %vm4296_vm5, %v1939_v56, %v1940_v28 }
 0x397   : > { %2185 = vrot.lane.b32.xlu1 %v5814_v23, %s3951_s29  ;;  %v5852_v52 = vsel %vm4067_vm2, %v1863_v29, %v1867_v60  ;;  %v5868_v21 = vsel %vm4370_vm8, %v2015_v34, %v2020_v38 }
 0x398   : > { %2413 = vrot.lane.b32.xlu0 %v6918_v14, %s3954_s6 }
 0x399   : > { %v2330_v50 = vpop.permute.xlu1 %2329 }
 0x39a   : > { %2375 = vst.msk [vmem:[#allocation2 + $0xc] sm:$0xf] %vm2371_vm10, %v2330_v50  ;;  %v2328_v2 = vpop.permute.xlu0 %2327  ;;  %v2089_v50 = vrot.slane %v5810_v55, 6 }
 0x39b   : > { %2374 = vst.msk [vmem:[#allocation2 + $0x8] sm:$0xf] %vm2371_vm10, %v2328_v2  ;;  %2411 = vrot.lane.b32.xlu2 %v6919_v22, %s3954_s6 }
 0x39c   : > { %2455 = vst.msk [vmem:[#allocation2 + $0xc] sm:$0xf] %vm2451_vm11, %v2410_v46  ;;  %v5873_v46 = vsel %vm4370_vm8, %v2010_v41, %v2013_v47  ;;  %v2091_v39 = vrot.slane %v2089_v50, 4  ;;  %v5902_v16 = vsel %vm4683_vm14, %v3662_v40, %v2089_v50 }
 0x39d   : > { %v2480_v48 = vpop.permute.xlu2 %2479 }
 0x39e   : > { %v5890_v49 = vsel %vm4683_vm14, %v2091_v39, %v2092_v4 }
 0x39f   : > { %2485 = vrot.lane.b32.xlu1 %v4794_v6, %s3955_s7 }
 0x3a0   : > { %2483 = vrot.lane.b32.xlu0 %v4798_v51, %s3955_s7 }
 0x3a1   : > { %v2408_v35 = vpop.permute.xlu1 %2407 }
 0x3a2   : > { %2454 = vst.msk [vmem:[#allocation2 + $0x8] sm:$0xf] %vm2451_vm11, %v2408_v35  ;;  %v2117_v5 = vpop.permute.xlu0 %2116 }
 0x3a3   : > { %2154 = vst.msk [vmem:[#allocation2 + $0x2c] sm:$0xf] %vm6768_vm6, %v2117_v5  ;;  %2187 = vrot.lane.b32.xlu2 %v5810_v55, %s3951_s29 }
 0x3a4   : > { %2526 = vst.msk [vmem:[#allocation2 + $0x8] sm:$0xf] %vm2523_vm12, %v2480_v48 }
 0x3a5   : > { %v2273_v30 = vpop.permute.xlu2 %2272 }
 0x3a7   : > { %2347 = vrot.lane.b32.xlu1 %v5847_v54, %s3953_s5 }
 0x3a8   : > { %2276 = vrot.lane.b32.xlu0 %v5852_v52, %s3952_s30 }
 0x3a9   : > { %v2184_v15 = vpop.permute.xlu1 %2183 }
 0x3aa   : > { %2221 = vst.msk [vmem:[#allocation2 + $0x2c] sm:$0xf] %vm2209_vm7, %v2184_v15  ;;  %v2182_v0 = vpop.permute.xlu0 %2181 }
 0x3ab   : > { %2220 = vst.msk [vmem:[#allocation2 + $0x28] sm:$0xf] %vm2209_vm7, %v2182_v0  ;;  %2274 = vrot.lane.b32.xlu2 %v5864_v53, %s3952_s30 }
 0x3ac   : > { %2310 = vst.msk [vmem:[#allocation2 + $0x2c] sm:$0xf] %vm2298_vm9, %v2273_v30 }
 0x3ad   : > { %v2424_v2 = vpop.permute.xlu2 %2423 }
 0x3af   : > { %2429 = vrot.lane.b32.xlu1 %v5868_v21, %s3954_s6 }
 0x3b0   : > { %2427 = vrot.lane.b32.xlu0 %v5873_v46, %s3954_s6 }
 0x3b1   : > { %v2271_v17 = vpop.permute.xlu1 %2270 }
 0x3b2   : > { %2309 = vst.msk [vmem:[#allocation2 + $0x28] sm:$0xf] %vm2298_vm9, %v2271_v17  ;;  %v2482_v45 = vpop.permute.xlu0 %2481 }
 0x3b3   : > { %2527 = vst.msk [vmem:[#allocation2 + $0xc] sm:$0xf] %vm2523_vm12, %v2482_v45  ;;  %2349 = vrot.lane.b32.xlu2 %v1941_v20, %s3953_s5 }
 0x3b5   : > { %v2498_v7 = vpop.permute.xlu2 %2497 }
 0x3b7   : > { %1881 = vrot.lane.b32.xlu1 %v6915_v26, %s3947_s24 }
 0x3b8   : > { %2501 = vrot.lane.b32.xlu0 %v5890_v49, %s3955_s7 }
 0x3b9   : > { %v2346_v44 = vpop.permute.xlu1 %2345 }
 0x3ba   : > { %2383 = vst.msk [vmem:[#allocation2 + $0x2c] sm:$0xf] %vm2371_vm10, %v2346_v44  ;;  %v2344_v48 = vpop.permute.xlu0 %2343  ;;  %v3761_v12 = vld [vmem:[#allocation2 + $0x8] sm:$0xff] }
 0x3bb   : > { %2382 = vst.msk [vmem:[#allocation2 + $0x28] sm:$0xf] %vm2371_vm10, %v2344_v48  ;;  %2685 = vmatmul.bf16.gmra.mxu0 %v3761_v12  ;;  %2499 = vrot.lane.b32.xlu2 %v5902_v16, %s3955_s7 }
 0x3bc   : > { %2462 = vst.msk [vmem:[#allocation2 + $0x28] sm:$0xf] %vm2451_vm11, %v2424_v2 }
 0x3bd   : > { %v1951_v26 = vpop.permute.xlu2 %1950 }
 0x3bf   : > { %1956 = vrot.lane.b32.xlu1 %v6917_v57, %s3949_s26 }
 0x3c0   : > { %1954 = vrot.lane.b32.xlu0 %v6916_v43, %s3949_s26 }
 0x3c1   : > { %v2496_v9 = vpop.permute.xlu1 %2495 }
 0x3c2   : > { %2534 = vst.msk [vmem:[#allocation2 + $0x28] sm:$0xf] %vm2523_vm12, %v2496_v9  ;;  %v2426_v35 = vpop.permute.xlu0 %2425 }
 0x3c3   : > { %2463 = vst.msk [vmem:[#allocation2 + $0x2c] sm:$0xf] %vm2451_vm11, %v2426_v35  ;;  %1883 = vrot.lane.b32.xlu2 %v6914_v63, %s3947_s24 }
 0x3c4   : > { %2535 = vst.msk [vmem:[#allocation2 + $0x2c] sm:$0xf] %vm2523_vm12, %v2498_v7 }
 0x3c5   : > { %v2033_v57 = vpop.permute.xlu2 %2032 }
 0x3c7   : > { %1808 = vrot.lane.b32.xlu1 %v5814_v23, %s3946_s23 }
 0x3c8   : > { %2036 = vrot.lane.b32.xlu0 %v6918_v14, %s3948_s25 }
 0x3c9   : > { %v1880_v43 = vpop.permute.xlu1 %1879 }
 0x3ca   : > { %1923 = vst.msk [vmem:[#allocation2 + $0x14] sm:$0xf] %vm1917_vm1, %v1880_v43  ;;  %v1878_v29 = vpop.permute.xlu0 %1877 }
 0x3cb   : > { %1922 = vst.msk [vmem:[#allocation2 + $0x10] sm:$0xf] %vm1917_vm1, %v1878_v29  ;;  %v3765_v60 = vld [vmem:[#allocation2 + $0x28] sm:$0xff]  ;;  %2034 = vrot.lane.b32.xlu2 %v6919_v22, %s3948_s25  ;;  %v5936_v22 = vld [vmem:[%s6646_s3] ss:$0 sm:$0xff] }
 0x3cc   : > { %1995 = vst.msk [vmem:[#allocation2 + $0x10] sm:$0xf] %vm1990_vm3, %v1951_v26  ;;  %2705 = vmatmul.bf16.gmra.mxu2 %v3765_v60  ;;  %v6002_v26 = vld [vmem:[%s4021_s27 + $0x84] sm:$0xf] }
 0x3cd   : > { %v2105_v63 = vpop.permute.xlu2 %2104 }
 0x3cf   : > { %2108 = vrot.lane.b32.xlu1 %v4794_v6, %s3950_s28 }
 0x3d0   : > { %2106 = vrot.lane.b32.xlu0 %v4798_v51, %s3950_s28 }
 0x3d1   : > { %v2031_v23 = vpop.permute.xlu1 %2030 }
 0x3d2   : > { %2075 = vst.msk [vmem:[#allocation2 + $0x10] sm:$0xf] %vm6767_vm4, %v2031_v23  ;;  %v1953_v14 = vpop.permute.xlu0 %1952  ;;  %v2230_v23 = vshll.u32 %v6002_v26, 16 }
 0x3d3   : > { %1996 = vst.msk [vmem:[#allocation2 + $0x14] sm:$0xf] %vm1990_vm3, %v1953_v14  ;;  %1810 = vrot.lane.b32.xlu2 %v5810_v55, %s3946_s23 }
 0x3d4   : > { %2076 = vst.msk [vmem:[#allocation2 + $0x14] sm:$0xf] %vm6767_vm4, %v2033_v57 }
 0x3d5   : > { %2148 = vst.msk [vmem:[#allocation2 + $0x14] sm:$0xf] %vm6768_vm6, %v2105_v63  ;;  %v2170_v6 = vpop.permute.xlu2 %2169 }
 0x3d7   : > { %2173 = vrot.lane.b32.xlu1 %v4256_v42, %s3951_s29 }
 0x3d8   : > { %1899 = vrot.lane.b32.xlu0 %v5852_v52, %s3947_s24  ;;  %v2681_v25 = vpop.f32.mrf.mxu0 }
 0x3d9   : > { %v2103_v51 = vpop.permute.xlu1 %2102  ;;  %v5946_v5 = vadd.f32 %v5936_v22, %v2681_v25 }
 0x3da   : > { %2147 = vst.msk [vmem:[#allocation2 + $0x10] sm:$0xf] %vm6768_vm6, %v2103_v51  ;;  %v1807_v13 = vpop.permute.xlu0 %1806 }
 0x3db   : > { %1842 = vst.msk [vmem:[#allocation2 + $0x34] sm:$0xf] %vm1828_vm0, %v1807_v13  ;;  %v5950_v3 = vmul.f32 0.70710677, %v5946_v5  ;;  %1897 = vrot.lane.b32.xlu2 %v5864_v53, %s3947_s24 }
 0x3dc   : > { %2214 = vst.msk [vmem:[#allocation2 + $0x10] sm:$0xf] %vm2209_vm7, %v2170_v6  ;;  %v3435_v6 = vld [vmem:[%s6645_s2 + $0x8] sm:$0xf] }
 0x3dd   : > { %v2753_v42 = vmul.f32 %v5950_v3, %v5950_v3  ;;  %v1969_v47 = vpop.permute.xlu2 %1968 }
 0x3df   : > { %1972 = vrot.lane.b32.xlu1 %v1941_v20, %s3949_s26  ;;  %v5958_v55 = vmin.f32 %v2753_v42, 16.0 }
 0x3e0   : > { %1970 = vrot.lane.b32.xlu0 %v5847_v54, %s3949_s26  ;;  %v2683_v8 = vpop.f32.mrf.mxu0 }
 0x3e1   : > { %v1896_v59 = vpop.permute.xlu1 %1895  ;;  %v2755_v52 = vmul.f32 2.1237322e-06, %v5958_v55  ;;  %v2766_v37 = vmul.f32 3.8918573e-05, %v5958_v55  ;;  %v5966_v34 = vadd.f32 %v5936_v22, %v2683_v8 }
 0x3e2   : > { %1931 = vst.msk [vmem:[#allocation2 + $0x34] sm:$0xf] %vm1917_vm1, %v1896_v59  ;;  %v1894_v18 = vpop.permute.xlu0 %1893  ;;  %v3441_v59 = vunpack.c.l.b16 %v3435_v6 }
 0x3e3   : > { %1930 = vst.msk [vmem:[#allocation2 + $0x30] sm:$0xf] %vm1917_vm1, %v1894_v18  ;;  %v2756_v38 = vadd.f32 0.00028619796, %v2755_v52  ;;  %v2767_v30 = vadd.f32 0.001143296, %v2766_v37  ;;  %2175 = vrot.lane.b32.xlu2 %v4222_v61, %s3951_s29 }
 0x3e4   : > { %v5970_v15 = vmul.f32 0.70710677, %v5966_v34  ;;  %2004 = vst.msk [vmem:[#allocation2 + $0x34] sm:$0xf] %vm1990_vm3, %v1969_v47  ;;  %v2232_v47 = vrot.slane %v2230_v23, 5 }
 0x3e5   : > { %v2768_v54 = vmul.f32 %v2767_v30, %v5958_v55  ;;  %v2757_v0 = vmul.f32 %v2756_v38, %v5958_v55  ;;  %v2047_v50 = vpop.permute.xlu2 %2046  ;;  %v6034_v38 = vld [vmem:[%s4021_s27 + $0x88] sm:$0xf] }
 0x3e6   : > { %v2793_v41 = vmul.f32 %v5970_v15, %v5970_v15 }
 0x3e7   : > { %2050 = vrot.lane.b32.xlu1 %v5873_v46, %s3948_s25  ;;  %v2769_v53 = vadd.f32 0.014752088, %v2768_v54  ;;  %v2758_v46 = vadd.f32 0.0036580483, %v2757_v0  ;;  %v2236_v0 = vshll.u32 %v6034_v38, 16 }
 0x3e8   : > { %2264 = vrot.lane.b32.xlu0 %v6875_v1, %s3952_s30  ;;  %v5983_v56 = vmin.f32 %v2793_v41, 16.0 }
 0x3e9   : > { %v1967_v28 = vpop.permute.xlu1 %1966  ;;  %v2770_v2 = vmul.f32 %v2769_v53, %v5958_v55  ;;  %v2759_v44 = vmul.f32 %v2758_v46, %v5958_v55 }
 0x3ea   : > { %2003 = vst.msk [vmem:[#allocation2 + $0x30] sm:$0xf] %vm1990_vm3, %v1967_v28  ;;  %v2172_v61 = vpop.permute.xlu0 %2171  ;;  %v2795_v17 = vmul.f32 2.1237322e-06, %v5983_v56  ;;  %v2806_v39 = vmul.f32 3.8918573e-05, %v5983_v56 }
 0x3eb   : > { %2215 = vst.msk [vmem:[#allocation2 + $0x14] sm:$0xf] %vm2209_vm7, %v2172_v61  ;;  %v2771_v4 = vadd.f32 0.112945676, %v2770_v2  ;;  %2262 = vrot.lane.b32.xlu2 %v6878_v58, %s3952_s30  ;;  %v2760_v60 = vadd.f32 0.05243302, %v2759_v44 }
 0x3ec   : > { %2083 = vst.msk [vmem:[#allocation2 + $0x30] sm:$0xf] %vm6767_vm4, %v2047_v50  ;;  %v2796_v1 = vadd.f32 0.00028619796, %v2795_v17  ;;  %v2807_v45 = vadd.f32 0.001143296, %v2806_v39 }
 0x3ed   : > { %v2772_v20 = vmul.f32 %v2771_v4, %v5958_v55  ;;  %v2334_v12 = vpop.permute.xlu2 %2333  ;;  %v2761_v13 = vmul.f32 %v2760_v60, %v5958_v55  ;;  %v3776_v61 = vld [vmem:[%s6645_s2] sm:$0xff]  ;;  %v2318_v44 = vrot.slane %v6034_v38, 5 }
 0x3ee   : > { %v2797_v40 = vmul.f32 %v2796_v1, %v5983_v56  ;;  %v2808_v7 = vmul.f32 %v2807_v45, %v5983_v56 }
 0x3ef   : > { %2337 = vrot.lane.b32.xlu1 %v6889_v19, %s3953_s5  ;;  %v2773_v48 = vadd.f32 0.4994258, %v2772_v20  ;;  %v2227_v19 = vshrl.u32 %v6002_v26, 16 }
 0x3f0   : > { %2335 = vrot.lane.b32.xlu0 %v6890_v32, %s3953_s5  ;;  %v2798_v9 = vadd.f32 0.0036580483, %v2797_v40  ;;  %v2809_v35 = vadd.f32 0.014752088, %v2808_v7 }
 0x3f1   : > { %v2261_v57 = vpop.permute.xlu1 %2260  ;;  %v2774_v58 = vmul.f32 %v2773_v48, %v5958_v55  ;;  %v2229_v25 = vrot.slane %v2227_v19, 4 }
 0x3f2   : > { %2304 = vst.msk [vmem:[#allocation2 + $0x14] sm:$0xf] %vm2298_vm9, %v2261_v57  ;;  %v2259_v43 = vpop.permute.xlu0 %2258  ;;  %v2810_v29 = vmul.f32 %v2809_v35, %v5983_v56  ;;  %v2799_v32 = vmul.f32 %v2798_v9, %v5983_v56  ;;  %v6067_v35 = vld [vmem:[%s4021_s27 + $0x8c] sm:$0x3]  ;;  %s3956_s27 = smov 104  }
 0x3f3   : > { %2303 = vst.msk [vmem:[#allocation2 + $0x10] sm:$0xf] %vm2298_vm9, %v2259_v43  ;;  %v6009_v63 = vadd.f32 1.0, %v2774_v58  ;;  %2052 = vrot.lane.b32.xlu2 %v5868_v21, %s3948_s25  ;;  %v2233_v41 = vor.u32 %v2232_v47, %v2229_v25 }
 0x3f4   : > { %2377 = vst.msk [vmem:[#allocation2 + $0x14] sm:$0xf] %vm2371_vm10, %v2334_v12  ;;  %v2811_v14 = vadd.f32 0.112945676, %v2810_v29  ;;  %v2800_v42 = vadd.f32 0.05243302, %v2799_v32 }
 0x3f5   : > { %3855 = vrcp.f32 %v6009_v63  ;;  %v2412_v21 = vpop.permute.xlu2 %2411  ;;  %v2234_v46 = vrot.slane %v2233_v41, 4  ;;  %v2787_v45 = vand.u32 2147483648, %v6009_v63  ;;  %v2785_v40 = vand.u32 2147483647, %v6009_v63 }
 0x3f6   : > { %v2812_v51 = vmul.f32 %v2811_v14, %v5983_v56  ;;  %v2801_v54 = vmul.f32 %v2800_v42, %v5983_v56  ;;  %v2240_v29 = vshrl.u32 %v6034_v38, 16  ;;  %v2320_v32 = vrot.slane %v2318_v44, 4 }
 0x3f7   : > { %2415 = vrot.lane.b32.xlu1 %v4667_v62, %s3954_s6  ;;  %v3443_v62 = vpack.c.b16 %v3441_v59, %v3441_v59  ;;  %v2788_v43 = vor.u32 1.1754944e-38, %v2787_v45  ;;  %v2321_v14 = vrot.slane %v6067_v35, 5  ;;  %v2393_v59 = vrot.slane %v2236_v0, 6 }
 0x3f8   : > { %2124 = vrot.lane.b32.xlu0 %v5890_v49, %s3950_s28  ;;  %v2813_v8 = vadd.f32 0.4994258, %v2812_v51  ;;  %v2762_v49 = vadd.f32 0.18741608, %v2761_v13  ;;  %v2802_v39 = vadd.f32 0.18741608, %v2801_v54 }
 0x3f9   : > { %v2332_v52 = vpop.permute.xlu1 %2331  ;;  %v3475_v28 = vsel %vm3473_vm13, %v3443_v62, 0  ;;  %vm2781_vm13 = vweird.f32 %v6009_v63  ;;  %v2392_v47 = vrot.slane %v2240_v29, 5 }
 0x3fa   : > { %2376 = vst.msk [vmem:[#allocation2 + $0x10] sm:$0xf] %vm2371_vm10, %v2332_v52  ;;  %v2049_v37 = vpop.permute.xlu0 %2048  ;;  %v2814_v18 = vmul.f32 %v2813_v8, %v5983_v56  ;;  %3483 = vmatpush.bf16.msra.mxu1 %v3475_v28  ;;  %v2763_v17 = vmul.f32 %v2762_v49, %v5958_v55  ;;  %3785 = vmatpush.bf16.msra.mxu3 %v3475_v28  ;;  %v2397_v8 = vshrl.u32 %v6067_v35, 16 }
 0x3fb   : > { %2084 = vst.msk [vmem:[#allocation2 + $0x34] sm:$0xf] %vm6767_vm4, %v2049_v37  ;;  %v3856_v30 = vpop.eup %3855  ;;  %2122 = vrot.lane.b32.xlu2 %v5902_v16, %s3950_s28  ;;  %v6053_v16 = vrot.slane %v2236_v0, 5  ;;  %v2803_v12 = vmul.f32 %v2802_v39, %v5983_v56  ;;  %v2394_v54 = vor.u32 %v2393_v59, %v2392_v47  ;;  %s3635_s28 = sshll.u32 %s3913_s15, 4  ;;  %s3636_s15 = sshll.u32 %s6947_s16, 5 }
 0x3fc   : > { %2456 = vst.msk [vmem:[#allocation2 + $0x10] sm:$0xf] %vm2451_vm11, %v2412_v21  ;;  %v2777_v53 = vmul.f32 %v3856_v30, %v6009_v63  ;;  %v6040_v50 = vadd.f32 1.0, %v2814_v18  ;;  %vm2782_vm15 = vweird.f32 %v3856_v30  ;;  %v2764_v48 = vadd.f32 1.1283791, %v2763_v17  ;;  %p214_p6 = scmp.lt.s32.totalorder %s3635_s28, 31 }
 0x3fd   : > { %v2188_v4 = vpop.permute.xlu2 %2187  ;;  %vm2783_vm4 = vmor %vm2781_vm13, %vm2782_vm15  ;;  %v2239_v9 = vsel %vm4067_vm2, %v2234_v46, %v6053_v16  ;;  %v3663_v63 = vrot.slane %v6002_v26, 9  ;;  %v2804_v51 = vadd.f32 1.1283791, %v2803_v12  ;;  %v2399_v41 = vrot.slane %v2397_v8, 5 }
 0x3fe   : > { %v2778_v2 = vsub.f32 1.0, %v2777_v53  ;;  %3857 = vrcp.f32 %v6040_v50  ;;  %3484 = vmatpush.bf16.msra.mxu1 %v3776_v61  ;;  %3786 = vmatpush.bf16.msra.mxu3 %v3776_v61  ;;  %v2765_v6 = vmul.f32 %v2764_v48, %v5950_v3  ;;  %v2827_v13 = vand.u32 2147483648, %v6040_v50  ;;  %s6949_s28 = smov (!%p214_p6, %s3635_s28), 31 }
 0x3ff   : > { %2191 = vrot.lane.b32.xlu1 %v6034_v38, %s3951_s29  ;;  %v2825_v3 = vand.u32 2147483647, %v6040_v50  ;;  %v2805_v28 = vmul.f32 %v2804_v51, %v5970_v15  ;;  %v3664_v61 = vrot.slane %v6002_v26, 10  ;;  %v2470_v17 = vrot.slane %v6034_v38, 6 }
 0x400   : > { %2189 = vrot.lane.b32.xlu0 %v6002_v26, %s3951_s29  ;;  %v2779_v1 = vmul.f32 %v3856_v30, %v2778_v2  ;;  %v2828_v49 = vor.u32 1.1754944e-38, %v2827_v13  ;;  %v2242_v15 = vrot.slane %v2240_v29, 4  ;;  %v2721_v38 = vmul.f32 0.5, %v5946_v5  ;;  %s217_s29 = sadd.s32 %s3636_s15, %s6949_s28 }
 0x401   : > { %v2121_v20 = vpop.permute.xlu1 %2120  ;;  %vm2826_vm13 = vcmp.eq.f32.partialorder %v2825_v3, 8.507059e+37  ;;  %v2722_v48 = vmul.f32 0.5, %v5966_v34 }
 0x402   : > { %2156 = vst.msk [vmem:[#allocation2 + $0x34] sm:$0xf] %vm6768_vm6, %v2121_v20  ;;  %v2119_v55 = vpop.permute.xlu0 %2118  ;;  %v2780_v7 = vadd.f32 %v3856_v30, %v2779_v1 }
 0x403   : > { %2155 = vst.msk [vmem:[#allocation2 + $0x30] sm:$0xf] %vm6768_vm6, %v2119_v55  ;;  %vm2786_vm6 = vcmp.eq.f32.partialorder %v2785_v40, 8.507059e+37  ;;  %2417 = vrot.lane.b32.xlu2 %v4714_v10, %s3954_s6  ;;  %v2246_v10 = vshll.u32 %v6067_v35, 16 }
 0x404   : > { %2223 = vst.msk [vmem:[#allocation2 + $0x34] sm:$0xf] %vm2209_vm7, %v2188_v4  ;;  %v3858_v57 = vpop.eup %3857  ;;  %v2784_v58 = vsel %vm2783_vm4, %v3856_v30, %v2780_v7  ;;  %v2322_v30 = vsel %vm4296_vm5, %v2320_v32, %v2321_v14  ;;  %v2396_v4 = vrot.slane %v2394_v54, 4  ;;  %v2388_v7 = vrot.slane %v2227_v19, 5 }
 0x405   : > { %v2817_v60 = vmul.f32 %v3858_v57, %v6040_v50  ;;  %v2789_v56 = vsel %vm2786_vm6, %v2788_v43, %v2784_v58  ;;  %v2275_v42 = vpop.permute.xlu2 %2274  ;;  %vm2822_vm4 = vweird.f32 %v3858_v57  ;;  %vm2821_vm6 = vweird.f32 %v6040_v50 }
 0x406   : > { %v2790_v52 = vmul.f32 %v2789_v56, %v2765_v6  ;;  %vm2823_vm15 = vmor %vm2821_vm6, %vm2822_vm4  ;;  %v2400_v0 = vrot.slane %v2246_v10, 6  ;;  %v2248_v55 = vrot.slane %v2246_v10, 5  ;;  %v2472_v14 = vrot.slane %v2470_v17, 4 }
 0x407   : > { %2278 = vrot.lane.b32.xlu1 %v2239_v9, %s3952_s30  ;;  %v2818_v25 = vsub.f32 1.0, %v2817_v60  ;;  %v2471_v9 = vsel %vm4683_vm14, %v3664_v61, %v2470_v17  ;;  %v2473_v6 = vrot.slane %v6067_v35, 6 }
 0x408   : > { %2489 = vrot.lane.b32.xlu0 %v4818_v33, %s3955_s7  ;;  %v2319_v33 = vsel %vm4296_vm5, %v3663_v63, %v2318_v44  ;;  %v3729_v53 = vclamps-f32 %v2790_v52, 1.0  ;;  %v2401_v1 = vor.u32 %v2400_v0, %v2399_v41  ;;  %v2389_v44 = vrot.slane %v2230_v23, 6 }
 0x409   : > { %v2186_v21 = vpop.permute.xlu1 %2185  ;;  %v2819_v37 = vmul.f32 %v3858_v57, %v2818_v25  ;;  %vm3448_vm5 = vcmask 195584   ;;  %v2474_v11 = vsel %vm4683_vm14, %v2472_v14, %v2473_v6  ;;  %vm6924_vm14 = vcmask 650848  }
 0x40a   : > { %2222 = vst.msk [vmem:[#allocation2 + $0x30] sm:$0xf] %vm2209_vm7, %v2186_v21  ;;  %v2414_v62 = vpop.permute.xlu0 %2413  ;;  %v3393_v45 = vadd.f32 1.0, %v3729_v53  ;;  %v2390_v58 = vor.u32 %v2389_v44, %v2388_v7 }
 0x40b   : > { %2457 = vst.msk [vmem:[#allocation2 + $0x14] sm:$0xf] %vm2451_vm11, %v2414_v62  ;;  %v2820_v18 = vadd.f32 %v3858_v57, %v2819_v37  ;;  %2487 = vrot.lane.b32.xlu2 %v4832_v27, %s3955_s7  ;;  %v2243_v27 = vor.u32 %v2242_v15, %v6053_v16  ;;  %v2402_v16 = vsel %vm4370_vm8, %v2396_v4, %v2401_v1  ;;  %v6147_v62 = vpop.f32.mrf.mxu2 }
 0x40c   : > { %2311 = vst.msk [vmem:[#allocation2 + $0x30] sm:$0xf] %vm2298_vm9, %v2275_v42  ;;  %v3409_v43 = vmul.f32 %v3393_v45, %v2721_v38  ;;  %v2391_v29 = vrot.slane %v2390_v58, 4 }
 0x40d   : > { %v2824_v2 = vsel %vm2823_vm15, %v3858_v57, %v2820_v18  ;;  %v2350_v39 = vpop.permute.xlu2 %2349  ;;  %v2244_v57 = vrot.slane %v2243_v27, 4 }
 0x40e   : > { %v2829_v50 = vsel %vm2826_vm13, %v2828_v49, %v2824_v2  ;;  %v2395_v36 = vsel %vm4370_vm8, %v2391_v29, %v2394_v54 }
 0x40f   : > { %2353 = vrot.lane.b32.xlu1 %v2322_v30, %s3953_s5  ;;  %v2830_v24 = vmul.f32 %v2829_v50, %v2805_v28  ;;  %v2249_v5 = vsel %vm4067_vm2, %v2244_v57, %v2248_v55  ;;  %vm6922_vm2 = vcmask 618048  }
 0x410   : > { %2351 = vrot.lane.b32.xlu0 %v2319_v33, %s3953_s5  ;;  %vm6923_vm8 = vmmov %vm6922_vm2 }
 0x411   : > { %v2486_v46 = vpop.permute.xlu1 %2485  ;;  %v3730_v20 = vclamps-f32 %v2830_v24, 1.0 }
 0x412   : > { %v2484_v40 = vpop.permute.xlu0 %2483  ;;  %2529 = vst.msk [vmem:[#allocation2 + $0x14] sm:$0xf] %vm2523_vm12, %v2486_v46 }
 0x413   : > { %v3394_v12 = vadd.f32 1.0, %v3730_v20  ;;  %2528 = vst.msk [vmem:[#allocation2 + $0x10] sm:$0xf] %vm2523_vm12, %v2484_v40  ;;  %2280 = vrot.lane.b32.xlu2 %v2249_v5, %s3952_s30  ;;  %v6168_v46 = vpop.f32.mrf.mxu2  ;;  %s3637_s30 = sshll.u32 %s217_s29, 3 }
 0x415   : > { %v3410_v19 = vmul.f32 %v3394_v12, %v2722_v48  ;;  %v2500_v26 = vpop.permute.xlu2 %2499 }
 0x417   : > { %2503 = vrot.lane.b32.xlu1 %v2471_v9, %s3955_s7  ;;  %v3425_v34 = vpack.c.bf16 %v3410_v19, %v3409_v43 }
 0x418   : > { %2433 = vrot.lane.b32.xlu0 %v2402_v16, %s3954_s6 }
 0x419   : > { %v2348_v23 = vpop.permute.xlu1 %2347  ;;  %3749 = vmatmul.msk.bf16.vlgmr.msra.gmra.mxu1 %vm3448_vm5, %v3425_v34 }
 0x41a   : > { %v2277_v60 = vpop.permute.xlu0 %2276  ;;  %2384 = vst.msk [vmem:[#allocation2 + $0x30] sm:$0xf] %vm2371_vm10, %v2348_v23  ;;  %v3762_v56 = vld [vmem:[#allocation2 + $0x10] sm:$0xff] }
 0x41b   : > { %2312 = vst.msk [vmem:[#allocation2 + $0x34] sm:$0xf] %vm2298_vm9, %v2277_v60  ;;  %2690 = vmatmul.bf16.gmra.mxu0 %v3762_v56  ;;  %2431 = vrot.lane.b32.xlu2 %v2395_v36, %s3954_s6 }
 0x41c   : > { %2385 = vst.msk [vmem:[#allocation2 + $0x34] sm:$0xf] %vm2371_vm10, %v2350_v39 }
 0x41d   : > { %v1884_v63 = vpop.permute.xlu2 %1883 }
 0x41e   : > { %1925 = vst.msk [vmem:[#allocation2 + $0x1c] sm:$0xf] %vm1917_vm1, %v1884_v63 }
 0x420   : > { %3445 = vrot.lane.b32.xlu0 %v5936_v22, %s3956_s27 }
 0x421   : > { %v2430_v32 = vpop.permute.xlu1 %2429 }
 0x422   : > { %v2428_v51 = vpop.permute.xlu0 %2427  ;;  %2465 = vst.msk [vmem:[#allocation2 + $0x34] sm:$0xf] %vm2451_vm11, %v2430_v32 }
 0x423   : > { %2464 = vst.msk [vmem:[#allocation2 + $0x30] sm:$0xf] %vm2451_vm11, %v2428_v51  ;;  %2505 = vrot.lane.b32.xlu2 %v2474_v11, %s3955_s7  ;;  %s6285_s7 = scalar_lea.vmem %s6647_s4, %s3637_s30 }
 0x424   : > { %2536 = vst.msk [vmem:[#allocation2 + $0x30] sm:$0xf] %vm2523_vm12, %v2500_v26 }
 0x425   : > { %v2035_v25 = vpop.permute.xlu2 %2034 }
 0x429   : > { %v1882_v13 = vpop.permute.xlu1 %1881 }
 0x42a   : > { %v2502_v42 = vpop.permute.xlu0 %2501  ;;  %1924 = vst.msk [vmem:[#allocation2 + $0x18] sm:$0xf] %vm1917_vm1, %v1882_v13 }
 0x42b   : > { %2537 = vst.msk [vmem:[#allocation2 + $0x34] sm:$0xf] %vm2523_vm12, %v2502_v42 }
 0x42d   : > { %v1811_v35 = vpop.permute.xlu2 %1810 }
 0x42e   : > { %1844 = vst.msk [vmem:[#allocation2 + $0x3c] sm:$0xf] %vm1828_vm0, %v1811_v35 }
 0x431   : > { %v1957_v21 = vpop.permute.xlu1 %1956 }
 0x432   : > { %v1955_v10 = vpop.permute.xlu0 %1954  ;;  %1998 = vst.msk [vmem:[#allocation2 + $0x1c] sm:$0xf] %vm1990_vm3, %v1957_v21  ;;  %v3766_v47 = vld [vmem:[#allocation2 + $0x30] sm:$0xff] }
 0x433   : > { %1997 = vst.msk [vmem:[#allocation2 + $0x18] sm:$0xf] %vm1990_vm3, %v1955_v10  ;;  %2710 = vmatmul.bf16.gmra.mxu2 %v3766_v47 }
 0x434   : > { %2077 = vst.msk [vmem:[#allocation2 + $0x18] sm:$0xf] %vm6922_vm2, %v2035_v25 }
 0x435   : > { %v1898_v31 = vpop.permute.xlu2 %1897 }
 0x438   : > { %v2686_v59 = vpop.f32.mrf.mxu0 }
 0x439   : > { %v1809_v8 = vpop.permute.xlu1 %1808  ;;  %v6139_v37 = vadd.f32 %v5936_v22, %v2686_v59 }
 0x43a   : > { %v2037_v52 = vpop.permute.xlu0 %2036  ;;  %1843 = vst.msk [vmem:[#allocation2 + $0x38] sm:$0xf] %vm1828_vm0, %v1809_v8  ;;  %vm6925_vm0 = vmmov %vm6924_vm14 }
 0x43b   : > { %2078 = vst.msk [vmem:[#allocation2 + $0x1c] sm:$0xf] %vm6923_vm8, %v2037_v52  ;;  %v6144_v3 = vmul.f32 0.70710677, %v6139_v37  ;;  %vm6928_vm4 = vmmov %vm6925_vm0 }
 0x43c   : > { %1932 = vst.msk [vmem:[#allocation2 + $0x38] sm:$0xf] %vm1917_vm1, %v1898_v31 }
 0x43d   : > { %v2833_v18 = vmul.f32 %v6144_v3, %v6144_v3  ;;  %v2176_v30 = vpop.permute.xlu2 %2175 }
 0x43f   : > { %v6151_v33 = vmin.f32 %v2833_v18, 16.0 }
 0x440   : > { %v2688_v49 = vpop.f32.mrf.mxu0 }
 0x441   : > { %v2109_v54 = vpop.permute.xlu1 %2108  ;;  %v2835_v41 = vmul.f32 2.1237322e-06, %v6151_v33  ;;  %v2846_v0 = vmul.f32 3.8918573e-05, %v6151_v33  ;;  %v6156_v28 = vadd.f32 %v5936_v22, %v2688_v49 }
 0x442   : > { %v2107_v53 = vpop.permute.xlu0 %2106  ;;  %2150 = vst.msk [vmem:[#allocation2 + $0x1c] sm:$0xf] %vm6924_vm14, %v2109_v54  ;;  %vm6929_vm14 = vmmov %vm6925_vm0 }
 0x443   : > { %2149 = vst.msk [vmem:[#allocation2 + $0x18] sm:$0xf] %vm6925_vm0, %v2107_v53  ;;  %v2836_v2 = vadd.f32 0.00028619796, %v2835_v41  ;;  %v2847_v50 = vadd.f32 0.001143296, %v2846_v0 }
 0x444   : > { %v6161_v24 = vmul.f32 0.70710677, %v6156_v28  ;;  %2217 = vst.msk [vmem:[#allocation2 + $0x1c] sm:$0xf] %vm2209_vm7, %v2176_v30 }
 0x445   : > { %v2837_v61 = vmul.f32 %v2836_v2, %v6151_v33  ;;  %v2848_v17 = vmul.f32 %v2847_v50, %v6151_v33  ;;  %v2263_v15 = vpop.permute.xlu2 %2262 }
 0x446   : > { %v2873_v39 = vmul.f32 %v6161_v24, %v6161_v24 }
 0x447   : > { %v2838_v4 = vadd.f32 0.0036580483, %v2837_v61  ;;  %v2849_v1 = vadd.f32 0.014752088, %v2848_v17 }
 0x448   : > { %v6170_v45 = vmin.f32 %v2873_v39, 16.0 }
 0x449   : > { %v2174_v20 = vpop.permute.xlu1 %2173  ;;  %v2850_v40 = vmul.f32 %v2849_v1, %v6151_v33  ;;  %v2839_v44 = vmul.f32 %v2838_v4, %v6151_v33 }
 0x44a   : > { %v1900_v27 = vpop.permute.xlu0 %1899  ;;  %2216 = vst.msk [vmem:[#allocation2 + $0x18] sm:$0xf] %vm2209_vm7, %v2174_v20  ;;  %v2875_v55 = vmul.f32 2.1237322e-06, %v6170_v45  ;;  %v2886_v7 = vmul.f32 3.8918573e-05, %v6170_v45 }
 0x44b   : > { %1933 = vst.msk [vmem:[#allocation2 + $0x3c] sm:$0xf] %vm1917_vm1, %v1900_v27  ;;  %v2851_v38 = vadd.f32 0.112945676, %v2850_v40  ;;  %v2840_v58 = vadd.f32 0.05243302, %v2839_v44  ;;  %vm6926_vm1 = vmmov %vm6922_vm2 }
 0x44c   : > { %2305 = vst.msk [vmem:[#allocation2 + $0x18] sm:$0xf] %vm2298_vm9, %v2263_v15  ;;  %v2876_v48 = vadd.f32 0.00028619796, %v2875_v55  ;;  %v2887_v12 = vadd.f32 0.001143296, %v2886_v7 }
 0x44d   : > { %v2852_v9 = vmul.f32 %v2851_v38, %v6151_v33  ;;  %v2053_v5 = vpop.permute.xlu2 %2052  ;;  %v2841_v32 = vmul.f32 %v2840_v58, %v6151_v33 }
 0x44e   : > { %v2877_v16 = vmul.f32 %v2876_v48, %v6170_v45  ;;  %v2888_v57 = vmul.f32 %v2887_v12, %v6170_v45 }
 0x44f   : > { %v2853_v43 = vadd.f32 0.4994258, %v2852_v9  ;;  %v2706_v19 = vpop.f32.mrf.mxu2  ;;  %v2842_v42 = vadd.f32 0.18741608, %v2841_v32 }
 0x450   : > { %v2878_v34 = vadd.f32 0.0036580483, %v2877_v16  ;;  %v2889_v26 = vadd.f32 0.014752088, %v2888_v57  ;;  %v6183_v23 = vadd.f32 %v5936_v22, %v2706_v19 }
 0x451   : > { %v1973_v29 = vpop.permute.xlu1 %1972  ;;  %v2854_v60 = vmul.f32 %v2853_v43, %v6151_v33  ;;  %v2843_v41 = vmul.f32 %v2842_v42, %v6151_v33 }
 0x452   : > { %v1971_v56 = vpop.permute.xlu0 %1970  ;;  %2006 = vst.msk [vmem:[#allocation2 + $0x3c] sm:$0xf] %vm1990_vm3, %v1973_v29  ;;  %v2890_v36 = vmul.f32 %v2889_v26, %v6170_v45  ;;  %v6189_v63 = vmul.f32 0.70710677, %v6183_v23  ;;  %v2879_v6 = vmul.f32 %v2878_v34, %v6170_v45 }
 0x453   : > { %2005 = vst.msk [vmem:[#allocation2 + $0x38] sm:$0xf] %vm1990_vm3, %v1971_v56  ;;  %v6193_v14 = vadd.f32 1.0, %v2854_v60  ;;  %vm6927_vm3 = vmmov %vm6926_vm1  ;;  %v2844_v4 = vadd.f32 1.1283791, %v2843_v41 }
 0x454   : > { %2086 = vst.msk [vmem:[#allocation2 + $0x3c] sm:$0xf] %vm6926_vm1, %v2053_v5  ;;  %v2891_v51 = vadd.f32 0.112945676, %v2890_v36  ;;  %v3153_v11 = vmul.f32 %v6189_v63, %v6189_v63  ;;  %v2880_v35 = vadd.f32 0.05243302, %v2879_v6 }
 0x455   : > { %3859 = vrcp.f32 %v6193_v14  ;;  %v2123_v10 = vpop.permute.xlu2 %2122  ;;  %v2867_v33 = vand.u32 2147483648, %v6193_v14  ;;  %v2865_v44 = vand.u32 2147483647, %v6193_v14  ;;  %vm2861_vm15 = vweird.f32 %v6193_v14 }
 0x456   : > { %v2892_v25 = vmul.f32 %v2891_v51, %v6170_v45  ;;  %v6201_v13 = vmin.f32 %v3153_v11, 16.0 }
 0x457   : > { %v2708_v21 = vpop.f32.mrf.mxu2  ;;  %v2868_v57 = vor.u32 1.1754944e-38, %v2867_v33  ;;  %vm2866_vm2 = vcmp.eq.f32.partialorder %v2865_v44, 8.507059e+37 }
 0x458   : > { %v2893_v47 = vadd.f32 0.4994258, %v2892_v25  ;;  %v6204_v31 = vadd.f32 %v5936_v22, %v2708_v21  ;;  %v3155_v8 = vmul.f32 2.1237322e-06, %v6201_v13  ;;  %v3166_v52 = vmul.f32 3.8918573e-05, %v6201_v13 }
 0x459   : > { %v2051_v59 = vpop.permute.xlu1 %2050  ;;  %v2881_v22 = vmul.f32 %v2880_v35, %v6170_v45 }
 0x45a   : > { %v2265_v18 = vpop.permute.xlu0 %2264  ;;  %2085 = vst.msk [vmem:[#allocation2 + $0x38] sm:$0xf] %vm6927_vm3, %v2051_v59  ;;  %v2894_v30 = vmul.f32 %v2893_v47, %v6170_v45  ;;  %v6211_v49 = vmul.f32 0.70710677, %v6204_v31  ;;  %v3167_v0 = vadd.f32 0.001143296, %v3166_v52 }
 0x45b   : > { %2306 = vst.msk [vmem:[#allocation2 + $0x1c] sm:$0xf] %vm2298_vm9, %v2265_v18  ;;  %v3860_v54 = vpop.eup %3859  ;;  %v3156_v50 = vadd.f32 0.00028619796, %v3155_v8  ;;  %v2882_v1 = vadd.f32 0.18741608, %v2881_v22 }
 0x45c   : > { %2157 = vst.msk [vmem:[#allocation2 + $0x38] sm:$0xf] %vm6928_vm4, %v2123_v10  ;;  %v2857_v53 = vmul.f32 %v3860_v54, %v6193_v14  ;;  %v6218_v2 = vadd.f32 1.0, %v2894_v30  ;;  %v3168_v61 = vmul.f32 %v3167_v0, %v6201_v13  ;;  %v3193_v17 = vmul.f32 %v6211_v49, %v6211_v49 }
 0x45d   : > { %v2418_v20 = vpop.permute.xlu2 %2417  ;;  %vm2862_vm6 = vweird.f32 %v3860_v54  ;;  %v3157_v27 = vmul.f32 %v3156_v50, %v6201_v13  ;;  %v2883_v58 = vmul.f32 %v2882_v1, %v6170_v45  ;;  %v2845_v45 = vmul.f32 %v2844_v4, %v6144_v3 }
 0x45e   : > { %v2858_v39 = vsub.f32 1.0, %v2857_v53  ;;  %3861 = vrcp.f32 %v6218_v2  ;;  %v6225_v15 = vmin.f32 %v3193_v17, 16.0  ;;  %v3169_v55 = vadd.f32 0.014752088, %v3168_v61  ;;  %vm2863_vm13 = vmor %vm2861_vm15, %vm2862_vm6 }
 0x45f   : > { %v3158_v34 = vadd.f32 0.0036580483, %v3157_v27  ;;  %v2884_v6 = vadd.f32 1.1283791, %v2883_v58  ;;  %v2905_v25 = vand.u32 2147483647, %v6218_v2  ;;  %vm2901_vm0 = vweird.f32 %v6218_v2 }
 0x460   : > { %v2859_v40 = vmul.f32 %v3860_v54, %v2858_v39  ;;  %v3195_v38 = vmul.f32 2.1237322e-06, %v6225_v15  ;;  %v3170_v9 = vmul.f32 %v3169_v55, %v6201_v13  ;;  %v3206_v16 = vmul.f32 3.8918573e-05, %v6225_v15 }
 0x461   : > { %v2338_v7 = vpop.permute.xlu1 %2337  ;;  %v2907_v42 = vand.u32 2147483648, %v6218_v2  ;;  %v3159_v35 = vmul.f32 %v3158_v34, %v6201_v13  ;;  %v2885_v41 = vmul.f32 %v2884_v6, %v6161_v24  ;;  %vm2906_vm3 = vcmp.eq.f32.partialorder %v2905_v25, 8.507059e+37 }
 0x462   : > { %v2336_v48 = vpop.permute.xlu0 %2335  ;;  %2379 = vst.msk [vmem:[#allocation2 + $0x1c] sm:$0xf] %vm2371_vm10, %v2338_v7  ;;  %v2860_v12 = vadd.f32 %v3860_v54, %v2859_v40  ;;  %v3196_v43 = vadd.f32 0.00028619796, %v3195_v38  ;;  %v3171_v26 = vadd.f32 0.112945676, %v3170_v9 }
 0x463   : > { %2378 = vst.msk [vmem:[#allocation2 + $0x18] sm:$0xf] %vm2371_vm10, %v2336_v48  ;;  %v3207_v29 = vadd.f32 0.001143296, %v3206_v16  ;;  %v2908_v22 = vor.u32 1.1754944e-38, %v2907_v42  ;;  %v2723_v38 = vmul.f32 0.5, %v6139_v37 }
 0x464   : > { %2459 = vst.msk [vmem:[#allocation2 + $0x1c] sm:$0xf] %vm2451_vm11, %v2418_v20  ;;  %v3862_v19 = vpop.eup %3861  ;;  %v2864_v5 = vsel %vm2863_vm13, %v3860_v54, %v2860_v12  ;;  %v3172_v36 = vmul.f32 %v3171_v26, %v6201_v13  ;;  %v3197_v32 = vmul.f32 %v3196_v43, %v6225_v15  ;;  %v3160_v61 = vadd.f32 0.05243302, %v3159_v35 }
 0x465   : > { %v2897_v60 = vmul.f32 %v3862_v19, %v6218_v2  ;;  %v2869_v56 = vsel %vm2866_vm2, %v2868_v57, %v2864_v5  ;;  %v3208_v14 = vmul.f32 %v3207_v29, %v6225_v15  ;;  %v2488_v11 = vpop.permute.xlu2 %2487  ;;  %vm2902_vm8 = vweird.f32 %v3862_v19 }
 0x466   : > { %v3173_v21 = vadd.f32 0.4994258, %v3172_v36  ;;  %v2870_v47 = vmul.f32 %v2869_v56, %v2845_v45  ;;  %v3198_v18 = vadd.f32 0.0036580483, %v3197_v32  ;;  %vm2903_vm1 = vmor %vm2901_vm0, %vm2902_vm8  ;;  %v3161_v24 = vmul.f32 %v3160_v61, %v6201_v13 }
 0x467   : > { %v2898_v51 = vsub.f32 1.0, %v2897_v60  ;;  %v3209_v8 = vadd.f32 0.014752088, %v3208_v14  ;;  %v2724_v48 = vmul.f32 0.5, %v6156_v28 }
 0x468   : > { %v3174_v3 = vmul.f32 %v3173_v21, %v6201_v13  ;;  %v3731_v53 = vclamps-f32 %v2870_v47, 1.0  ;;  %v3199_v4 = vmul.f32 %v3198_v18, %v6225_v15  ;;  %v3162_v43 = vadd.f32 0.18741608, %v3161_v24 }
 0x469   : > { %v2416_v10 = vpop.permute.xlu1 %2415  ;;  %v2899_v59 = vmul.f32 %v3862_v19, %v2898_v51  ;;  %v3210_v54 = vmul.f32 %v3209_v8, %v6225_v15 }
 0x46a   : > { %v2125_v52 = vpop.permute.xlu0 %2124  ;;  %2458 = vst.msk [vmem:[#allocation2 + $0x18] sm:$0xf] %vm2451_vm11, %v2416_v10  ;;  %v3175_v0 = vadd.f32 1.0, %v3174_v3  ;;  %v3395_v20 = vadd.f32 1.0, %v3731_v53  ;;  %v3200_v44 = vadd.f32 0.05243302, %v3199_v4  ;;  %v3163_v28 = vmul.f32 %v3162_v43, %v6201_v13 }
 0x46b   : > { %2158 = vst.msk [vmem:[#allocation2 + $0x3c] sm:$0xf] %vm6929_vm14, %v2125_v52  ;;  %v2900_v30 = vadd.f32 %v3862_v19, %v2899_v59  ;;  %v3211_v17 = vadd.f32 0.112945676, %v3210_v54 }
 0x46c   : > { %2530 = vst.msk [vmem:[#allocation2 + $0x18] sm:$0xf] %vm2523_vm12, %v2488_v11  ;;  %3863 = vrcp.f32 %v3175_v0  ;;  %v3411_v57 = vmul.f32 %v3395_v20, %v2723_v38  ;;  %v3201_v5 = vmul.f32 %v3200_v44, %v6225_v15  ;;  %v3187_v36 = vand.u32 2147483648, %v3175_v0  ;;  %v6293_v38 = vld [vmem:[%s6646_s3] ss:$0 sm:$0xff] }
 0x46d   : > { %v2904_v50 = vsel %vm2903_vm1, %v3862_v19, %v2900_v30  ;;  %v3212_v2 = vmul.f32 %v3211_v17, %v6225_v15  ;;  %v2281_v7 = vpop.permute.xlu2 %2280  ;;  %v3185_v45 = vand.u32 2147483647, %v3175_v0  ;;  %v3164_v6 = vadd.f32 1.1283791, %v3163_v28 }
 0x46e   : > { %v2909_v39 = vsel %vm2906_vm3, %v2908_v22, %v2904_v50  ;;  %v3202_v32 = vadd.f32 0.18741608, %v3201_v5  ;;  %v3188_v25 = vor.u32 1.1754944e-38, %v3187_v36 }
 0x46f   : > { %v2910_v33 = vmul.f32 %v2909_v39, %v2885_v41  ;;  %v3213_v27 = vadd.f32 0.4994258, %v3212_v2  ;;  %vm3186_vm15 = vcmp.eq.f32.partialorder %v3185_v45, 8.507059e+37  ;;  %v3165_v47 = vmul.f32 %v3164_v6, %v6189_v63 }
 0x470   : > { %v3203_v13 = vmul.f32 %v3202_v32, %v6225_v15 }
 0x471   : > { %v2192_v1 = vpop.permute.xlu1 %2191  ;;  %v3732_v40 = vclamps-f32 %v2910_v33, 1.0  ;;  %v3214_v9 = vmul.f32 %v3213_v27, %v6225_v15 }
 0x472   : > { %v2190_v55 = vpop.permute.xlu0 %2189  ;;  %2225 = vst.msk [vmem:[#allocation2 + $0x3c] sm:$0xf] %vm2209_vm7, %v2192_v1  ;;  %v3864_v16 = vpop.eup %3863  ;;  %v3204_v3 = vadd.f32 1.1283791, %v3203_v13  ;;  %v2732_v1 = vmul.f32 0.5, %v6204_v31 }
 0x473   : > { %2224 = vst.msk [vmem:[#allocation2 + $0x38] sm:$0xf] %vm2209_vm7, %v2190_v55  ;;  %v3396_v12 = vadd.f32 1.0, %v3732_v40  ;;  %v3177_v19 = vmul.f32 %v3864_v16, %v3175_v0  ;;  %v3215_v34 = vadd.f32 1.0, %v3214_v9  ;;  %vm3182_vm4 = vweird.f32 %v3864_v16 }
 0x474   : > { %2314 = vst.msk [vmem:[#allocation2 + $0x3c] sm:$0xf] %vm2298_vm9, %v2281_v7  ;;  %vm3181_vm7 = vweird.f32 %v3175_v0  ;;  %v3205_v0 = vmul.f32 %v3204_v3, %v6211_v49  ;;  %v2731_v49 = vmul.f32 0.5, %v6183_v23 }
 0x475   : > { %v3412_v58 = vmul.f32 %v3396_v12, %v2724_v48  ;;  %v3178_v26 = vsub.f32 1.0, %v3177_v19  ;;  %3865 = vrcp.f32 %v3215_v34  ;;  %vm3183_vm6 = vmor %vm3181_vm7, %vm3182_vm4  ;;  %v2432_v42 = vpop.permute.xlu2 %2431  ;;  %v3227_v18 = vand.u32 2147483648, %v3215_v34 }
 0x476   : > { %v3225_v15 = vand.u32 2147483647, %v3215_v34  ;;  %vm3221_vm13 = vweird.f32 %v3215_v34 }
 0x477   : > { %v3426_v29 = vpack.c.bf16 %v3412_v58, %v3411_v57  ;;  %v3179_v60 = vmul.f32 %v3864_v16, %v3178_v26  ;;  %v3228_v63 = vor.u32 1.1754944e-38, %v3227_v18 }
 0x478   : > { %vm3226_vm8 = vcmp.eq.f32.partialorder %v3225_v15, 8.507059e+37 }
 0x479   : > { %v2279_v37 = vpop.permute.xlu1 %2278  ;;  %3750 = vmatmul.msk.bf16.gmra.mxu1 %vm3448_vm5, %v3426_v29  ;;  %v3180_v14 = vadd.f32 %v3864_v16, %v3179_v60 }
 0x47a   : > { %v2490_v56 = vpop.permute.xlu0 %2489  ;;  %2313 = vst.msk [vmem:[#allocation2 + $0x38] sm:$0xf] %vm2298_vm9, %v2279_v37 }
 0x47b   : > { %2531 = vst.msk [vmem:[#allocation2 + $0x1c] sm:$0xf] %vm2523_vm12, %v2490_v56  ;;  %v3184_v51 = vsel %vm3183_vm6, %v3864_v16, %v3180_v14  ;;  %v3866_v11 = vpop.eup %3865 }
 0x47c   : > { %v3217_v35 = vmul.f32 %v3866_v11, %v3215_v34  ;;  %v3189_v21 = vsel %vm3186_vm15, %v3188_v25, %v3184_v51  ;;  %vm3222_vm9 = vweird.f32 %v3866_v11 }
 0x47d   : > { %v3190_v30 = vmul.f32 %v3189_v21, %v3165_v47  ;;  %vm3223_vm2 = vmor %vm3221_vm13, %vm3222_vm9  ;;  %v2506_v17 = vpop.permute.xlu2 %2505 }
 0x47e   : > { %v3218_v59 = vsub.f32 1.0, %v3217_v35 }
 0x47f   : > { %v3739_v22 = vclamps-f32 %v3190_v30, 1.0 }
 0x480   : > { %v3219_v54 = vmul.f32 %v3866_v11, %v3218_v59 }
 0x481   : > { %v2354_v10 = vpop.permute.xlu1 %2353  ;;  %v3403_v33 = vadd.f32 1.0, %v3739_v22 }
 0x482   : > { %v2352_v8 = vpop.permute.xlu0 %2351  ;;  %2387 = vst.msk [vmem:[#allocation2 + $0x3c] sm:$0xf] %vm2371_vm10, %v2354_v10  ;;  %v3763_v52 = vld [vmem:[#allocation2 + $0x18] sm:$0xff]  ;;  %v3220_v41 = vadd.f32 %v3866_v11, %v3219_v54 }
 0x483   : > { %2386 = vst.msk [vmem:[#allocation2 + $0x38] sm:$0xf] %vm2371_vm10, %v2352_v8  ;;  %2695 = vmatmul.bf16.gmra.mxu0 %v3763_v52  ;;  %v3419_v40 = vmul.f32 %v3403_v33, %v2731_v49  ;;  %vm3526_vm10 = vcmask 64512  }
 0x484   : > { %2466 = vst.msk [vmem:[#allocation2 + $0x38] sm:$0xf] %vm2451_vm11, %v2432_v42  ;;  %v3224_v53 = vsel %vm3223_vm2, %v3866_v11, %v3220_v41 }
 0x485   : > { %v3229_v50 = vsel %vm3226_vm8, %v3228_v63, %v3224_v53 }
 0x486   : > { %v3230_v39 = vmul.f32 %v3229_v50, %v3205_v0 }
 0x488   : > { %v3740_v2 = vclamps-f32 %v3230_v39, 1.0 }
 0x489   : > { %v2504_v61 = vpop.permute.xlu1 %2503 }
 0x48a   : > { %v2434_v4 = vpop.permute.xlu0 %2433  ;;  %2538 = vst.msk [vmem:[#allocation2 + $0x38] sm:$0xf] %vm2523_vm12, %v2504_v61  ;;  %v3404_v20 = vadd.f32 1.0, %v3740_v2 }
 0x48b   : > { %2467 = vst.msk [vmem:[#allocation2 + $0x3c] sm:$0xf] %vm2451_vm11, %v2434_v4 }
 0x48c   : > { %2539 = vst.msk [vmem:[#allocation2 + $0x3c] sm:$0xf] %vm2523_vm12, %v2506_v17  ;;  %v3420_v24 = vmul.f32 %v3404_v20, %v2732_v1 }
 0x48e   : > { %v3430_v27 = vpack.c.bf16 %v3420_v24, %v3419_v40 }
 0x490   : > { %3754 = vmatmul.msk.bf16.vlgmr.msra.gmra.mxu3 %vm3448_vm5, %v3430_v27 }
 0x492   : > { %v6280_v7 = vpop.permute.xlu0 %3445 }
 0x493   : > { %v3767_v55 = vld [vmem:[#allocation2 + $0x38] sm:$0xff] }
 0x494   : > { %2715 = vmatmul.bf16.gmra.mxu2 %v3767_v55 }
 0x496   : > { %v3486_v23 = vpop.f32.mrf.mxu1 }
 0x497   : > { %v3487_v31 = vadd.f32 %v3486_v23, %v6280_v7 }
 0x498   : > { %v2691_v44 = vpop.f32.mrf.mxu0 }
 0x499   : > { %3527 = vst.msk [vmem:[%s6285_s7] sm:$0xff] %vm3526_vm10, %v3487_v31  ;;  %v6296_v48 = vadd.f32 %v6293_v38, %v2691_v44 }
 0x49b   : > { %v6299_v12 = vmul.f32 0.70710677, %v6296_v48 }
 0x49d   : > { %v2913_v9 = vmul.f32 %v6299_v12, %v6299_v12 }
 0x49e   : > { %v3488_v16 = vpop.f32.mrf.mxu1 }
 0x49f   : > { %v3489_v57 = vadd.f32 %v3488_v16, %v6280_v7  ;;  %v2914_v58 = vmin.f32 %v2913_v9, 16.0 }
 0x4a0   : > { %v2693_v43 = vpop.f32.mrf.mxu0 }
 0x4a1   : > { %3528 = vst.msk [vmem:[%s6285_s7 + $0x8] sm:$0xff] %vm3526_vm10, %v3489_v57  ;;  %v2915_v19 = vmul.f32 2.1237322e-06, %v2914_v58  ;;  %v2926_v5 = vmul.f32 3.8918573e-05, %v2914_v58  ;;  %v6307_v34 = vadd.f32 %v6293_v38, %v2693_v43 }
 0x4a3   : > { %v2916_v26 = vadd.f32 0.00028619796, %v2915_v19  ;;  %v2927_v29 = vadd.f32 0.001143296, %v2926_v5  ;;  %v6310_v37 = vmul.f32 0.70710677, %v6307_v34 }
 0x4a5   : > { %v2928_v28 = vmul.f32 %v2927_v29, %v2914_v58  ;;  %v2953_v60 = vmul.f32 %v6310_v37, %v6310_v37  ;;  %v2917_v56 = vmul.f32 %v2916_v26, %v2914_v58 }
 0x4a7   : > { %v2929_v36 = vadd.f32 0.014752088, %v2928_v28  ;;  %v2954_v32 = vmin.f32 %v2953_v60, 16.0  ;;  %v2918_v51 = vadd.f32 0.0036580483, %v2917_v56 }
 0x4a9   : > { %v2930_v14 = vmul.f32 %v2929_v36, %v2914_v58  ;;  %v2955_v45 = vmul.f32 2.1237322e-06, %v2954_v32  ;;  %v2966_v6 = vmul.f32 3.8918573e-05, %v2954_v32  ;;  %v2919_v10 = vmul.f32 %v2918_v51, %v2914_v58 }
 0x4ab   : > { %v2931_v11 = vadd.f32 0.112945676, %v2930_v14  ;;  %v2956_v25 = vadd.f32 0.00028619796, %v2955_v45  ;;  %v2967_v13 = vadd.f32 0.001143296, %v2966_v6 }
 0x4ac   : > { %v2920_v18 = vadd.f32 0.05243302, %v2919_v10 }
 0x4ad   : > { %v2932_v42 = vmul.f32 %v2931_v11, %v2914_v58  ;;  %v2957_v35 = vmul.f32 %v2956_v25, %v2954_v32  ;;  %v2968_v21 = vmul.f32 %v2967_v13, %v2954_v32 }
 0x4ae   : > { %v2921_v0 = vmul.f32 %v2920_v18, %v2914_v58 }
 0x4af   : > { %v2933_v47 = vadd.f32 0.4994258, %v2932_v42  ;;  %v2958_v59 = vadd.f32 0.0036580483, %v2957_v35  ;;  %v2969_v8 = vadd.f32 0.014752088, %v2968_v21 }
 0x4b0   : > { %v2922_v4 = vadd.f32 0.18741608, %v2921_v0 }
 0x4b1   : > { %v2934_v52 = vmul.f32 %v2933_v47, %v2914_v58  ;;  %v2970_v3 = vmul.f32 %v2969_v8, %v2954_v32  ;;  %v2959_v54 = vmul.f32 %v2958_v59, %v2954_v32 }
 0x4b2   : > { %v2923_v27 = vmul.f32 %v2922_v4, %v2914_v58 }
 0x4b3   : > { %v2935_v30 = vadd.f32 1.0, %v2934_v52  ;;  %v2971_v15 = vadd.f32 0.112945676, %v2970_v3  ;;  %v2960_v53 = vadd.f32 0.05243302, %v2959_v54 }
 0x4b4   : > { %v2924_v58 = vadd.f32 1.1283791, %v2923_v27 }
 0x4b5   : > { %3867 = vrcp.f32 %v2935_v30  ;;  %v2972_v63 = vmul.f32 %v2971_v15, %v2954_v32  ;;  %v2961_v33 = vmul.f32 %v2960_v53, %v2954_v32  ;;  %v2947_v9 = vand.u32 2147483648, %v2935_v30 }
 0x4b6   : > { %v2711_v41 = vpop.f32.mrf.mxu2  ;;  %vm2941_vm12 = vweird.f32 %v2935_v30  ;;  %v2945_v57 = vand.u32 2147483647, %v2935_v30  ;;  %v2925_v13 = vmul.f32 %v2924_v58, %v6299_v12 }
 0x4b7   : > { %v6315_v22 = vadd.f32 %v6293_v38, %v2711_v41  ;;  %v2973_v50 = vadd.f32 0.4994258, %v2972_v63  ;;  %v2962_v55 = vadd.f32 0.18741608, %v2961_v33  ;;  %v2948_v56 = vor.u32 1.1754944e-38, %v2947_v9 }
 0x4b8   : > { %vm2946_vm0 = vcmp.eq.f32.partialorder %v2945_v57, 8.507059e+37  ;;  %v2726_v9 = vmul.f32 0.5, %v6307_v34 }
 0x4b9   : > { %v6318_v61 = vmul.f32 0.70710677, %v6315_v22  ;;  %v2974_v17 = vmul.f32 %v2973_v50, %v2954_v32  ;;  %v2963_v29 = vmul.f32 %v2962_v55, %v2954_v32  ;;  %v2725_v55 = vmul.f32 0.5, %v6296_v48 }
 0x4bb   : > { %v3868_v39 = vpop.eup %3867  ;;  %v3233_v2 = vmul.f32 %v6318_v61, %v6318_v61  ;;  %v2975_v1 = vadd.f32 1.0, %v2974_v17  ;;  %v2964_v42 = vadd.f32 1.1283791, %v2963_v29 }
 0x4bc   : > { %v2937_v49 = vmul.f32 %v3868_v39, %v2935_v30  ;;  %vm2942_vm11 = vweird.f32 %v3868_v39 }
 0x4bd   : > { %v6322_v20 = vmin.f32 %v3233_v2, 16.0  ;;  %3869 = vrcp.f32 %v2975_v1  ;;  %vm2943_vm14 = vmor %vm2941_vm12, %vm2942_vm11  ;;  %v2987_v35 = vand.u32 2147483648, %v2975_v1  ;;  %v2985_v52 = vand.u32 2147483647, %v2975_v1 }
 0x4be   : > { %v2713_v40 = vpop.f32.mrf.mxu2  ;;  %v2938_v24 = vsub.f32 1.0, %v2937_v49  ;;  %vm2981_vm3 = vweird.f32 %v2975_v1  ;;  %v2965_v12 = vmul.f32 %v2964_v42, %v6310_v37 }
 0x4bf   : > { %v3235_v23 = vmul.f32 2.1237322e-06, %v6322_v20  ;;  %v6326_v31 = vadd.f32 %v6293_v38, %v2713_v40  ;;  %v3246_v16 = vmul.f32 3.8918573e-05, %v6322_v20  ;;  %v2988_v41 = vor.u32 1.1754944e-38, %v2987_v35 }
 0x4c0   : > { %v2939_v44 = vmul.f32 %v3868_v39, %v2938_v24  ;;  %vm2986_vm7 = vcmp.eq.f32.partialorder %v2985_v52, 8.507059e+37 }
 0x4c1   : > { %v3236_v19 = vadd.f32 0.00028619796, %v3235_v23  ;;  %v3247_v5 = vadd.f32 0.001143296, %v3246_v16  ;;  %v6330_v26 = vmul.f32 0.70710677, %v6326_v31 }
 0x4c2   : > { %v2940_v43 = vadd.f32 %v3868_v39, %v2939_v44 }
 0x4c3   : > { %v3870_v28 = vpop.eup %3869  ;;  %v3248_v36 = vmul.f32 %v3247_v5, %v6322_v20  ;;  %v3273_v14 = vmul.f32 %v6330_v26, %v6330_v26  ;;  %v3237_v51 = vmul.f32 %v3236_v19, %v6322_v20 }
 0x4c4   : > { %v2944_v60 = vsel %vm2943_vm14, %v3868_v39, %v2940_v43  ;;  %v2977_v45 = vmul.f32 %v3870_v28, %v2975_v1  ;;  %vm2982_vm1 = vweird.f32 %v3870_v28 }
 0x4c5   : > { %v2949_v6 = vsel %vm2946_vm0, %v2948_v56, %v2944_v60  ;;  %v3249_v11 = vadd.f32 0.014752088, %v3248_v36  ;;  %v6336_v25 = vmin.f32 %v3273_v14, 16.0  ;;  %v3238_v3 = vadd.f32 0.0036580483, %v3237_v51  ;;  %vm2983_vm4 = vmor %vm2981_vm3, %vm2982_vm1 }
 0x4c6   : > { %v2978_v32 = vsub.f32 1.0, %v2977_v45  ;;  %v2950_v59 = vmul.f32 %v2949_v6, %v2925_v13 }
 0x4c7   : > { %v3250_v21 = vmul.f32 %v3249_v11, %v6322_v20  ;;  %v3275_v10 = vmul.f32 2.1237322e-06, %v6336_v25  ;;  %v3286_v47 = vmul.f32 3.8918573e-05, %v6336_v25  ;;  %v3239_v4 = vmul.f32 %v3238_v3, %v6322_v20 }
 0x4c8   : > { %v2979_v8 = vmul.f32 %v3870_v28, %v2978_v32  ;;  %v3733_v53 = vclamps-f32 %v2950_v59, 1.0 }
 0x4c9   : > { %v3251_v18 = vadd.f32 0.112945676, %v3250_v21  ;;  %v3276_v30 = vadd.f32 0.00028619796, %v3275_v10  ;;  %v3287_v15 = vadd.f32 0.001143296, %v3286_v47  ;;  %v6360_v10 = vadd.f32 %v6293_v38, %v6147_v62 }
 0x4ca   : > { %v2980_v54 = vadd.f32 %v3870_v28, %v2979_v8  ;;  %v3397_v40 = vadd.f32 1.0, %v3733_v53  ;;  %v3240_v23 = vadd.f32 0.05243302, %v3239_v4  ;;  %v6364_v8 = vadd.f32 %v6293_v38, %v6168_v46 }
 0x4cb   : > { %v3252_v63 = vmul.f32 %v3251_v18, %v6322_v20  ;;  %v3277_v0 = vmul.f32 %v3276_v30, %v6336_v25  ;;  %v3288_v17 = vmul.f32 %v3287_v15, %v6336_v25 }
 0x4cc   : > { %v2984_v50 = vsel %vm2983_vm4, %v3870_v28, %v2980_v54  ;;  %v3413_v19 = vmul.f32 %v3397_v40, %v2725_v55  ;;  %v3241_v29 = vmul.f32 %v3240_v23, %v6322_v20  ;;  %v6368_v54 = vmul.f32 0.70710677, %v6360_v10 }
 0x4cd   : > { %v2989_v39 = vsel %vm2986_vm7, %v2988_v41, %v2984_v50  ;;  %v3253_v33 = vadd.f32 0.4994258, %v3252_v63  ;;  %v3278_v49 = vadd.f32 0.0036580483, %v3277_v0  ;;  %v3289_v1 = vadd.f32 0.014752088, %v3288_v17 }
 0x4ce   : > { %v2990_v2 = vmul.f32 %v2989_v39, %v2965_v12  ;;  %v3242_v34 = vadd.f32 0.18741608, %v3241_v29  ;;  %v6372_v12 = vmul.f32 0.70710677, %v6364_v8  ;;  %v2733_v55 = vmul.f32 0.5, %v6315_v22 }
 0x4cf   : > { %v3254_v37 = vmul.f32 %v3253_v33, %v6322_v20  ;;  %v3290_v27 = vmul.f32 %v3289_v1, %v6336_v25  ;;  %v3279_v57 = vmul.f32 %v3278_v49, %v6336_v25  ;;  %v2734_v23 = vmul.f32 0.5, %v6326_v31 }
 0x4d0   : > { %v3734_v24 = vclamps-f32 %v2990_v2, 1.0  ;;  %v3243_v11 = vmul.f32 %v3242_v34, %v6322_v20  ;;  %v3113_v17 = vmul.f32 %v6372_v12, %v6372_v12 }
 0x4d1   : > { %v3255_v44 = vadd.f32 1.0, %v3254_v37  ;;  %v3291_v43 = vadd.f32 0.112945676, %v3290_v27  ;;  %v3280_v28 = vadd.f32 0.05243302, %v3279_v57 }
 0x4d2   : > { %v3398_v16 = vadd.f32 1.0, %v3734_v24  ;;  %v3244_v47 = vadd.f32 1.1283791, %v3243_v11  ;;  %v6381_v37 = vmin.f32 %v3113_v17, 16.0 }
 0x4d3   : > { %3871 = vrcp.f32 %v3255_v44  ;;  %v3292_v58 = vmul.f32 %v3291_v43, %v6336_v25  ;;  %v3281_v45 = vmul.f32 %v3280_v28, %v6336_v25  ;;  %v3267_v42 = vand.u32 2147483648, %v3255_v44 }
 0x4d4   : > { %v3414_v5 = vmul.f32 %v3398_v16, %v2726_v9  ;;  %v3265_v35 = vand.u32 2147483647, %v3255_v44  ;;  %vm3261_vm15 = vweird.f32 %v3255_v44  ;;  %v3245_v62 = vmul.f32 %v3244_v47, %v6318_v61 }
 0x4d5   : > { %v3293_v60 = vadd.f32 0.4994258, %v3292_v58  ;;  %v3282_v32 = vadd.f32 0.18741608, %v3281_v45  ;;  %v3268_v20 = vor.u32 1.1754944e-38, %v3267_v42 }
 0x4d6   : > { %v3427_v56 = vpack.c.bf16 %v3414_v5, %v3413_v19  ;;  %vm3266_vm13 = vcmp.eq.f32.partialorder %v3265_v35, 8.507059e+37 }
 0x4d7   : > { %v3294_v48 = vmul.f32 %v3293_v60, %v6336_v25  ;;  %v3283_v3 = vmul.f32 %v3282_v32, %v6336_v25  ;;  %v3073_v25 = vmul.f32 %v6368_v54, %v6368_v54 }
 0x4d8   : > { %3751 = vmatmul.msk.bf16.gmra.mxu1 %vm3448_vm5, %v3427_v56 }
 0x4d9   : > { %v3872_v36 = vpop.eup %3871  ;;  %v3295_v6 = vadd.f32 1.0, %v3294_v48  ;;  %v3284_v41 = vadd.f32 1.1283791, %v3283_v3  ;;  %v6379_v49 = vmin.f32 %v3073_v25, 16.0 }
 0x4da   : > { %v3257_v14 = vmul.f32 %v3872_v36, %v3255_v44  ;;  %vm3262_vm6 = vweird.f32 %v3872_v36 }
 0x4db   : > { %3873 = vrcp.f32 %v3295_v6  ;;  %vm3263_vm9 = vmor %vm3261_vm15, %vm3262_vm6  ;;  %v3307_v63 = vand.u32 2147483648, %v3295_v6  ;;  %v3305_v53 = vand.u32 2147483647, %v3295_v6  ;;  %vm3301_vm8 = vweird.f32 %v3295_v6 }
 0x4dc   : > { %v3258_v51 = vsub.f32 1.0, %v3257_v14  ;;  %v3285_v4 = vmul.f32 %v3284_v41, %v6330_v26  ;;  %v3086_v27 = vmul.f32 3.8918573e-05, %v6379_v49  ;;  %v3126_v26 = vmul.f32 3.8918573e-05, %v6381_v37 }
 0x4dd   : > { %v3308_v61 = vor.u32 1.1754944e-38, %v3307_v63  ;;  %vm3306_vm12 = vcmp.eq.f32.partialorder %v3305_v53, 8.507059e+37  ;;  %v3075_v34 = vmul.f32 2.1237322e-06, %v6379_v49 }
 0x4de   : > { %v3259_v13 = vmul.f32 %v3872_v36, %v3258_v51  ;;  %v3087_v43 = vadd.f32 0.001143296, %v3086_v27  ;;  %v3127_v58 = vadd.f32 0.001143296, %v3126_v26 }
 0x4df   : > { %v3076_v11 = vadd.f32 0.00028619796, %v3075_v34 }
 0x4e0   : > { %v3260_v21 = vadd.f32 %v3872_v36, %v3259_v13  ;;  %v3088_v22 = vmul.f32 %v3087_v43, %v6379_v49  ;;  %v3128_v31 = vmul.f32 %v3127_v58, %v6381_v37  ;;  %v3115_v13 = vmul.f32 2.1237322e-06, %v6381_v37 }
 0x4e1   : > { %v3874_v59 = vpop.eup %3873 }
 0x4e2   : > { %v3264_v52 = vsel %vm3263_vm9, %v3872_v36, %v3260_v21  ;;  %v3297_v18 = vmul.f32 %v3874_v59, %v3295_v6  ;;  %vm3302_vm2 = vweird.f32 %v3874_v59  ;;  %v3089_v28 = vadd.f32 0.014752088, %v3088_v22 }
 0x4e3   : > { %v3269_v30 = vsel %vm3266_vm13, %v3268_v20, %v3264_v52  ;;  %vm3303_vm11 = vmor %vm3301_vm8, %vm3302_vm2  ;;  %v3129_v56 = vadd.f32 0.014752088, %v3128_v31  ;;  %v3077_v20 = vmul.f32 %v3076_v11, %v6379_v49  ;;  %v3116_v3 = vadd.f32 0.00028619796, %v3115_v13 }
 0x4e4   : > { %v3298_v15 = vsub.f32 1.0, %v3297_v18  ;;  %v3270_v46 = vmul.f32 %v3269_v30, %v3245_v62  ;;  %v3090_v14 = vmul.f32 %v3089_v28, %v6379_v49 }
 0x4e5   : > { %v3130_v6 = vmul.f32 %v3129_v56, %v6381_v37 }
 0x4e6   : > { %v3299_v0 = vmul.f32 %v3874_v59, %v3298_v15  ;;  %v3741_v39 = vclamps-f32 %v3270_v46, 1.0  ;;  %v3091_v42 = vadd.f32 0.112945676, %v3090_v14  ;;  %v3078_v46 = vadd.f32 0.0036580483, %v3077_v20 }
 0x4e7   : > { %v3131_v35 = vadd.f32 0.112945676, %v3130_v6 }
 0x4e8   : > { %v3300_v50 = vadd.f32 %v3874_v59, %v3299_v0  ;;  %v3405_v40 = vadd.f32 1.0, %v3741_v39  ;;  %v3092_v18 = vmul.f32 %v3091_v42, %v6379_v49  ;;  %v3117_v0 = vmul.f32 %v3116_v3, %v6381_v37 }
 0x4e9   : > { %v3132_v15 = vmul.f32 %v3131_v35, %v6381_v37 }
 0x4ea   : > { %v3304_v33 = vsel %vm3303_vm11, %v3874_v59, %v3300_v50  ;;  %v3421_v9 = vmul.f32 %v3405_v40, %v2733_v55  ;;  %v3093_v25 = vadd.f32 0.4994258, %v3092_v18 }
 0x4eb   : > { %v3309_v2 = vsel %vm3306_vm12, %v3308_v61, %v3304_v33  ;;  %v3133_v61 = vadd.f32 0.4994258, %v3132_v15  ;;  %v3079_v33 = vmul.f32 %v3078_v46, %v6379_v49 }
 0x4ec   : > { %v3310_v1 = vmul.f32 %v3309_v2, %v3285_v4  ;;  %v3118_v2 = vadd.f32 0.0036580483, %v3117_v0 }
 0x4ee   : > { %v3742_v24 = vclamps-f32 %v3310_v1, 1.0 }
 0x4f0   : > { %v3406_v44 = vadd.f32 1.0, %v3742_v24  ;;  %v3094_v24 = vmul.f32 %v3093_v25, %v6379_v49 }
 0x4f2   : > { %v3422_v16 = vmul.f32 %v3406_v44, %v2734_v23  ;;  %v3134_v23 = vmul.f32 %v3133_v61, %v6381_v37  ;;  %v6438_v58 = vadd.f32 1.0, %v3094_v24 }
 0x4f4   : > { %v3431_v5 = vpack.c.bf16 %v3422_v16, %v3421_v9  ;;  %v3080_v16 = vadd.f32 0.05243302, %v3079_v33  ;;  %3875 = vrcp.f32 %v6438_v58  ;;  %vm3101_vm6 = vweird.f32 %v6438_v58 }
 0x4f6   : > { %v3491_v57 = vpop.f32.mrf.mxu1  ;;  %3755 = vmatmul.msk.bf16.gmra.mxu3 %vm3448_vm5, %v3431_v5  ;;  %v3081_v6 = vmul.f32 %v3080_v16, %v6379_v49 }
 0x4f7   : > { %v3492_v19 = vadd.f32 %v3491_v57, %v6280_v7  ;;  %v3119_v57 = vmul.f32 %v3118_v2, %v6381_v37 }
 0x4f9   : > { %3529 = vst.msk [vmem:[%s6285_s7 + $0x10] sm:$0xff] %vm3526_vm10, %v3492_v19 }
 0x4fe   : > { %v3493_v29 = vpop.f32.mrf.mxu1 }
 0x4ff   : > { %v3494_v60 = vadd.f32 %v3493_v29, %v6280_v7 }
 0x500   : > { %v2696_v48 = vpop.f32.mrf.mxu0 }
 0x501   : > { %3530 = vst.msk [vmem:[%s6285_s7 + $0x18] sm:$0xff] %vm3526_vm10, %v3494_v60  ;;  %v6397_v36 = vadd.f32 %v6293_v38, %v2696_v48  ;;  %v6442_v60 = vadd.f32 1.0, %v3134_v23  ;;  %v3105_v23 = vand.u32 2147483647, %v6438_v58 }
 0x503   : > { %v6402_v45 = vmul.f32 0.70710677, %v6397_v36  ;;  %3877 = vrcp.f32 %v6442_v60  ;;  %vm3141_vm4 = vweird.f32 %v6442_v60 }
 0x505   : > { %v2993_v51 = vmul.f32 %v6402_v45, %v6402_v45 }
 0x507   : > { %v6408_v32 = vmin.f32 %v2993_v51, 16.0  ;;  %v3120_v51 = vadd.f32 0.05243302, %v3119_v57 }
 0x508   : > { %v2698_v21 = vpop.f32.mrf.mxu0 }
 0x509   : > { %v2995_v47 = vmul.f32 2.1237322e-06, %v6408_v32  ;;  %v3006_v59 = vmul.f32 3.8918573e-05, %v6408_v32  ;;  %v6413_v52 = vadd.f32 %v6293_v38, %v2698_v21  ;;  %v3121_v20 = vmul.f32 %v3120_v51, %v6381_v37 }
 0x50b   : > { %v2996_v30 = vadd.f32 0.00028619796, %v2995_v47  ;;  %v3007_v62 = vadd.f32 0.001143296, %v3006_v59  ;;  %v6419_v41 = vmul.f32 0.70710677, %v6413_v52 }
 0x50c   : > { %v3122_v33 = vadd.f32 0.18741608, %v3121_v20 }
 0x50d   : > { %v3008_v63 = vmul.f32 %v3007_v62, %v6408_v32  ;;  %v3033_v53 = vmul.f32 %v6419_v41, %v6419_v41  ;;  %v2997_v50 = vmul.f32 %v2996_v30, %v6408_v32  ;;  %v3082_v62 = vadd.f32 0.18741608, %v3081_v6 }
 0x50f   : > { %v3009_v17 = vadd.f32 0.014752088, %v3008_v63  ;;  %v6426_v39 = vmin.f32 %v3033_v53, 16.0  ;;  %v2998_v27 = vadd.f32 0.0036580483, %v2997_v50  ;;  %v6472_v50 = vpop.eup %3875 }
 0x510   : > { %v3097_v16 = vmul.f32 %v6472_v50, %v6438_v58  ;;  %vm3102_vm3 = vweird.f32 %v6472_v50 }
 0x511   : > { %v3010_v4 = vmul.f32 %v3009_v17, %v6408_v32  ;;  %v3035_v1 = vmul.f32 2.1237322e-06, %v6426_v39  ;;  %v3046_v40 = vmul.f32 3.8918573e-05, %v6426_v39  ;;  %v2999_v22 = vmul.f32 %v2998_v27, %v6408_v32  ;;  %vm6560_vm12 = vmor %vm3101_vm6, %vm3102_vm3 }
 0x512   : > { %v3098_v51 = vsub.f32 1.0, %v3097_v16 }
 0x513   : > { %v3011_v55 = vadd.f32 0.112945676, %v3010_v4  ;;  %v3036_v44 = vadd.f32 0.00028619796, %v3035_v1  ;;  %v3047_v26 = vadd.f32 0.001143296, %v3046_v40  ;;  %v3511_v5 = vpop.f32.mrf.mxu3  ;;  %v6478_v4 = vpop.eup %3877 }
 0x514   : > { %v3512_v29 = vadd.f32 %v3511_v5, %v6280_v7  ;;  %v3000_v42 = vadd.f32 0.05243302, %v2999_v22  ;;  %v3137_v57 = vmul.f32 %v6478_v4, %v6442_v60  ;;  %v3145_v5 = vand.u32 2147483647, %v6442_v60 }
 0x515   : > { %v3012_v9 = vmul.f32 %v3011_v55, %v6408_v32  ;;  %v3037_v43 = vmul.f32 %v3036_v44, %v6426_v39  ;;  %v3048_v19 = vmul.f32 %v3047_v26, %v6426_v39  ;;  %vm3142_vm9 = vweird.f32 %v6478_v4 }
 0x516   : > { %3537 = vst.msk [vmem:[%s6285_s7 + $0x50] sm:$0xff] %vm3526_vm10, %v3512_v29  ;;  %v3001_v15 = vmul.f32 %v3000_v42, %v6408_v32  ;;  %vm6549_vm11 = vmor %vm3141_vm4, %vm3142_vm9 }
 0x517   : > { %v3013_v31 = vadd.f32 0.4994258, %v3012_v9  ;;  %v2716_v28 = vpop.f32.mrf.mxu2  ;;  %v3038_v56 = vadd.f32 0.0036580483, %v3037_v43  ;;  %v3049_v48 = vadd.f32 0.014752088, %v3048_v19  ;;  %v6500_v19 = vmul.f32 %v3122_v33, %v6381_v37 }
 0x518   : > { %v6445_v34 = vadd.f32 %v6293_v38, %v2716_v28  ;;  %v3002_v24 = vadd.f32 0.18741608, %v3001_v15  ;;  %v3138_v37 = vsub.f32 1.0, %v3137_v57 }
 0x519   : > { %v3014_v14 = vmul.f32 %v3013_v31, %v6408_v32  ;;  %v3050_v11 = vmul.f32 %v3049_v48, %v6426_v39  ;;  %v3039_v21 = vmul.f32 %v3038_v56, %v6426_v39 }
 0x51a   : > { %v6453_v13 = vmul.f32 0.70710677, %v6445_v34  ;;  %v3003_v31 = vmul.f32 %v3002_v24, %v6408_v32  ;;  %v3139_v24 = vmul.f32 %v6478_v4, %v3138_v37 }
 0x51b   : > { %v6456_v35 = vadd.f32 1.0, %v3014_v14  ;;  %v3051_v47 = vadd.f32 0.112945676, %v3050_v11  ;;  %v3513_v30 = vpop.f32.mrf.mxu3  ;;  %v3040_v63 = vadd.f32 0.05243302, %v3039_v21 }
 0x51c   : > { %v3313_v59 = vmul.f32 %v6453_v13, %v6453_v13  ;;  %v3514_v46 = vadd.f32 %v3513_v30, %v6280_v7 }
 0x51d   : > { %3879 = vrcp.f32 %v6456_v35  ;;  %v3052_v3 = vmul.f32 %v3051_v47, %v6426_v39  ;;  %v3041_v27 = vmul.f32 %v3040_v63, %v6426_v39  ;;  %v3027_v29 = vand.u32 2147483648, %v6456_v35 }
 0x51e   : > { %v6465_v18 = vmin.f32 %v3313_v59, 16.0  ;;  %3538 = vst.msk [vmem:[%s6285_s7 + $0x58] sm:$0xff] %vm3526_vm10, %v3514_v46  ;;  %v3025_v11 = vand.u32 2147483647, %v6456_v35  ;;  %vm3021_vm0 = vweird.f32 %v6456_v35  ;;  %v3004_v59 = vadd.f32 1.1283791, %v3003_v31 }
 0x51f   : > { %v2718_v0 = vpop.f32.mrf.mxu2  ;;  %v3053_v53 = vadd.f32 0.4994258, %v3052_v3  ;;  %v3042_v28 = vadd.f32 0.18741608, %v3041_v27  ;;  %v3028_v3 = vor.u32 1.1754944e-38, %v3027_v29 }
 0x520   : > { %v6470_v25 = vadd.f32 %v6293_v38, %v2718_v0  ;;  %v3315_v17 = vmul.f32 2.1237322e-06, %v6465_v18  ;;  %v3326_v61 = vmul.f32 3.8918573e-05, %v6465_v18  ;;  %v6485_v38 = vmul.f32 %v3082_v62, %v6379_v49 }
 0x521   : > { %v3054_v2 = vmul.f32 %v3053_v53, %v6426_v39  ;;  %v3043_v30 = vmul.f32 %v3042_v28, %v6426_v39  ;;  %v3099_v53 = vmul.f32 %v6472_v50, %v3098_v51  ;;  %vm3026_vm7 = vcmp.eq.f32.partialorder %v3025_v11, 8.507059e+37 }
 0x522   : > { %v6482_v1 = vmul.f32 0.70710677, %v6470_v25  ;;  %v3327_v55 = vadd.f32 0.001143296, %v3326_v61  ;;  %v3316_v9 = vadd.f32 0.00028619796, %v3315_v17  ;;  %v3005_v27 = vmul.f32 %v3004_v59, %v6402_v45 }
 0x523   : > { %v3880_v40 = vpop.eup %3879  ;;  %v6490_v26 = vadd.f32 1.0, %v3054_v2  ;;  %v3147_v17 = vand.u32 2147483648, %v6442_v60  ;;  %v3100_v29 = vadd.f32 %v6472_v50, %v3099_v53  ;;  %v3107_v59 = vand.u32 2147483648, %v6438_v58 }
 0x524   : > { %v3017_v44 = vmul.f32 %v3880_v40, %v6456_v35  ;;  %v3328_v49 = vmul.f32 %v3327_v55, %v6465_v18  ;;  %v3353_v43 = vmul.f32 %v6482_v1, %v6482_v1  ;;  %vm3022_vm14 = vweird.f32 %v3880_v40 }
 0x525   : > { %3881 = vrcp.f32 %v6490_v26  ;;  %v3317_v14 = vmul.f32 %v3316_v9, %v6465_v18  ;;  %vm6514_vm1 = vmor %vm3021_vm0, %vm3022_vm14  ;;  %v3044_v55 = vadd.f32 1.1283791, %v3043_v30  ;;  %v3065_v9 = vand.u32 2147483647, %v6490_v26 }
 0x526   : > { %v3018_v22 = vsub.f32 1.0, %v3017_v44  ;;  %v6506_v56 = vmin.f32 %v3353_v43, 16.0  ;;  %v3329_v6 = vadd.f32 0.014752088, %v3328_v49  ;;  %v3067_v16 = vand.u32 2147483648, %v6490_v26 }
 0x527   : > { %v3318_v35 = vadd.f32 0.0036580483, %v3317_v14  ;;  %vm3061_vm13 = vweird.f32 %v6490_v26  ;;  %v3045_v51 = vmul.f32 %v3044_v55, %v6419_v41  ;;  %vm3066_vm8 = vcmp.eq.f32.partialorder %v3065_v9, 8.507059e+37 }
 0x528   : > { %v3019_v48 = vmul.f32 %v3880_v40, %v3018_v22  ;;  %v3355_v42 = vmul.f32 2.1237322e-06, %v6506_v56  ;;  %v3330_v32 = vmul.f32 %v3329_v6, %v6465_v18  ;;  %v3366_v47 = vmul.f32 3.8918573e-05, %v6506_v56 }
 0x529   : > { %v3319_v57 = vmul.f32 %v3318_v35, %v6465_v18  ;;  %v3068_v37 = vor.u32 1.1754944e-38, %v3067_v16  ;;  %v3104_v35 = vsel %vm6560_vm12, %v6472_v50, %v3100_v29  ;;  %vm3146_vm14 = vcmp.eq.f32.partialorder %v3145_v5, 8.507059e+37 }
 0x52a   : > { %v3020_v21 = vadd.f32 %v3880_v40, %v3019_v48  ;;  %v3356_v62 = vadd.f32 0.00028619796, %v3355_v42  ;;  %v3331_v46 = vadd.f32 0.112945676, %v3330_v32  ;;  %v3367_v0 = vadd.f32 0.001143296, %v3366_v47 }
 0x52b   : > { %v3882_v15 = vpop.eup %3881  ;;  %v3140_v48 = vadd.f32 %v6478_v4, %v3139_v24  ;;  %v3320_v32 = vadd.f32 0.05243302, %v3319_v57  ;;  %vm3106_vm0 = vcmp.eq.f32.partialorder %v3105_v23, 8.507059e+37  ;;  %v2728_v50 = vmul.f32 0.5, %v6413_v52 }
 0x52c   : > { %v3024_v63 = vsel %vm6514_vm1, %v3880_v40, %v3020_v21  ;;  %v3057_v61 = vmul.f32 %v3882_v15, %v6490_v26  ;;  %v3332_v33 = vmul.f32 %v3331_v46, %v6465_v18  ;;  %v3357_v2 = vmul.f32 %v3356_v62, %v6506_v56 }
 0x52d   : > { %v3029_v39 = vsel %vm3026_vm7, %v3028_v3, %v3024_v63  ;;  %v3368_v40 = vmul.f32 %v3367_v0, %v6506_v56  ;;  %vm3062_vm15 = vweird.f32 %v3882_v15  ;;  %v3084_v3 = vadd.f32 1.1283791, %v6485_v38 }
 0x52e   : > { %v3058_v44 = vsub.f32 1.0, %v3057_v61  ;;  %v3333_v49 = vadd.f32 0.4994258, %v3332_v33  ;;  %v3030_v43 = vmul.f32 %v3029_v39, %v3005_v27  ;;  %v3358_v45 = vadd.f32 0.0036580483, %v3357_v2  ;;  %vm3063_vm2 = vmor %vm3061_vm13, %vm3062_vm15 }
 0x52f   : > { %v3369_v31 = vadd.f32 0.014752088, %v3368_v40  ;;  %v3144_v62 = vsel %vm6549_vm11, %v6478_v4, %v3140_v48  ;;  %v3124_v38 = vadd.f32 1.1283791, %v6500_v19  ;;  %v3148_v46 = vor.u32 1.1754944e-38, %v3147_v17 }
 0x530   : > { %v3059_v22 = vmul.f32 %v3882_v15, %v3058_v44  ;;  %v3334_v28 = vmul.f32 %v3333_v49, %v6465_v18  ;;  %v3735_v42 = vclamps-f32 %v3030_v43, 1.0  ;;  %v3359_v20 = vmul.f32 %v3358_v45, %v6506_v56 }
 0x531   : > { %v3370_v6 = vmul.f32 %v3369_v31, %v6506_v56  ;;  %v3321_v61 = vmul.f32 %v3320_v32, %v6465_v18  ;;  %v3108_v4 = vor.u32 1.1754944e-38, %v3107_v59  ;;  %v3149_v33 = vsel %vm3146_vm14, %v3148_v46, %v3144_v62 }
 0x532   : > { %v3060_v14 = vadd.f32 %v3882_v15, %v3059_v22  ;;  %v6542_v11 = vadd.f32 1.0, %v3334_v28  ;;  %v3399_v0 = vadd.f32 1.0, %v3735_v42  ;;  %v3360_v2 = vadd.f32 0.05243302, %v3359_v20 }
 0x533   : > { %v3371_v47 = vadd.f32 0.112945676, %v3370_v6  ;;  %v2727_v40 = vmul.f32 0.5, %v6397_v36  ;;  %v3109_v17 = vsel %vm3106_vm0, %v3108_v4, %v3104_v35  ;;  %v3125_v24 = vmul.f32 %v3124_v38, %v6372_v12 }
 0x534   : > { %v3064_v21 = vsel %vm3063_vm2, %v3882_v15, %v3060_v14  ;;  %3883 = vrcp.f32 %v6542_v11  ;;  %v3322_v44 = vadd.f32 0.18741608, %v3321_v61  ;;  %v3085_v23 = vmul.f32 %v3084_v3, %v6368_v54 }
 0x535   : > { %v3069_v41 = vsel %vm3066_vm8, %v3068_v37, %v3064_v21  ;;  %v3372_v63 = vmul.f32 %v3371_v47, %v6506_v56  ;;  %v3415_v27 = vmul.f32 %v3399_v0, %v2727_v40  ;;  %v3150_v9 = vmul.f32 %v3149_v33, %v3125_v24 }
 0x536   : > { %v3070_v15 = vmul.f32 %v3069_v41, %v3045_v51  ;;  %v3361_v16 = vmul.f32 %v3360_v2, %v6506_v56  ;;  %v3110_v49 = vmul.f32 %v3109_v17, %v3085_v23  ;;  %v3323_v43 = vmul.f32 %v3322_v44, %v6465_v18 }
 0x537   : > { %v3373_v39 = vadd.f32 0.4994258, %v3372_v63  ;;  %v3738_v12 = vclamps-f32 %v3150_v9, 1.0  ;;  %v3347_v31 = vand.u32 2147483648, %v6542_v11  ;;  %vm3341_vm3 = vweird.f32 %v6542_v11 }
 0x538   : > { %v3736_v53 = vclamps-f32 %v3070_v15, 1.0  ;;  %v3362_v29 = vadd.f32 0.18741608, %v3361_v16  ;;  %v3345_v54 = vand.u32 2147483647, %v6542_v11  ;;  %v3737_v45 = vclamps-f32 %v3110_v49, 1.0 }
 0x539   : > { %v3374_v60 = vmul.f32 %v3373_v39, %v6506_v56  ;;  %v3324_v48 = vadd.f32 1.1283791, %v3323_v43  ;;  %v3402_v51 = vadd.f32 1.0, %v3738_v12  ;;  %v3348_v18 = vor.u32 1.1754944e-38, %v3347_v31 }
 0x53a   : > { %v3400_v19 = vadd.f32 1.0, %v3736_v53  ;;  %v3884_v5 = vpop.eup %3883  ;;  %v3363_v37 = vmul.f32 %v3362_v29, %v6506_v56  ;;  %vm3346_vm7 = vcmp.eq.f32.partialorder %v3345_v54, 8.507059e+37  ;;  %v3401_v21 = vadd.f32 1.0, %v3737_v45 }
 0x53b   : > { %v3337_v58 = vmul.f32 %v3884_v5, %v6542_v11  ;;  %v3375_v36 = vadd.f32 1.0, %v3374_v60  ;;  %vm3342_vm1 = vweird.f32 %v3884_v5  ;;  %v2730_v32 = vmul.f32 0.5, %v6364_v8 }
 0x53c   : > { %v3416_v55 = vmul.f32 %v3400_v19, %v2728_v50  ;;  %vm3343_vm4 = vmor %vm3341_vm3, %vm3342_vm1  ;;  %v3325_v59 = vmul.f32 %v3324_v48, %v6453_v13  ;;  %v2729_v11 = vmul.f32 0.5, %v6360_v10  ;;  %v3364_v20 = vadd.f32 1.1283791, %v3363_v37 }
 0x53d   : > { %v3338_v57 = vsub.f32 1.0, %v3337_v58  ;;  %3885 = vrcp.f32 %v3375_v36  ;;  %v3418_v41 = vmul.f32 %v3402_v51, %v2730_v32  ;;  %v3387_v3 = vand.u32 2147483648, %v3375_v36 }
 0x53e   : > { %v3428_v52 = vpack.c.bf16 %v3416_v55, %v3415_v27  ;;  %v3385_v15 = vand.u32 2147483647, %v3375_v36  ;;  %v3417_v63 = vmul.f32 %v3401_v21, %v2729_v11  ;;  %vm3381_vm15 = vweird.f32 %v3375_v36 }
 0x53f   : > { %v3339_v22 = vmul.f32 %v3884_v5, %v3338_v57  ;;  %v3388_v35 = vor.u32 1.1754944e-38, %v3387_v3  ;;  %v3365_v46 = vmul.f32 %v3364_v20, %v6482_v1  ;;  %v2735_v39 = vmul.f32 0.5, %v6445_v34 }
 0x540   : > { %3752 = vmatmul.msk.bf16.gmra.mxu1 %vm3448_vm5, %v3428_v52  ;;  %v3429_v38 = vpack.c.bf16 %v3418_v41, %v3417_v63  ;;  %vm3386_vm13 = vcmp.eq.f32.partialorder %v3385_v15, 8.507059e+37  ;;  %v2736_v4 = vmul.f32 0.5, %v6470_v25 }
 0x541   : > { %v3340_v28 = vadd.f32 %v3884_v5, %v3339_v22 }
 0x543   : > { %v3344_v14 = vsel %vm3343_vm4, %v3884_v5, %v3340_v28  ;;  %v3886_v6 = vpop.eup %3885 }
 0x544   : > { %v3377_v42 = vmul.f32 %v3886_v6, %v3375_v36  ;;  %v3349_v47 = vsel %vm3346_vm7, %v3348_v18, %v3344_v14  ;;  %vm3382_vm6 = vweird.f32 %v3886_v6 }
 0x545   : > { %v3350_v30 = vmul.f32 %v3349_v47, %v3325_v59  ;;  %vm3383_vm9 = vmor %vm3381_vm15, %vm3382_vm6 }
 0x546   : > { %v3378_v26 = vsub.f32 1.0, %v3377_v42 }
 0x547   : > { %v3743_v8 = vclamps-f32 %v3350_v30, 1.0 }
 0x548   : > { %v3379_v62 = vmul.f32 %v3886_v6, %v3378_v26 }
 0x549   : > { %v3407_v53 = vadd.f32 1.0, %v3743_v8 }
 0x54a   : > { %v3380_v56 = vadd.f32 %v3886_v6, %v3379_v62 }
 0x54b   : > { %v3423_v2 = vmul.f32 %v3407_v53, %v2735_v39 }
 0x54c   : > { %v3384_v13 = vsel %vm3383_vm9, %v3886_v6, %v3380_v56 }
 0x54d   : > { %v3389_v10 = vsel %vm3386_vm13, %v3388_v35, %v3384_v13 }
 0x54e   : > { %v3390_v0 = vmul.f32 %v3389_v10, %v3365_v46 }
 0x550   : > { %3753 = vmatmul.msk.bf16.gmra.mxu1 %vm3448_vm5, %v3429_v38  ;;  %v3744_v61 = vclamps-f32 %v3390_v0, 1.0 }
 0x552   : > { %v3408_v33 = vadd.f32 1.0, %v3744_v61 }
 0x554   : > { %v3424_v40 = vmul.f32 %v3408_v33, %v2736_v4 }
 0x555   : > { %v3496_v1 = vpop.f32.mrf.mxu1 }
 0x556   : > { %v3497_v50 = vadd.f32 %v3496_v1, %v6280_v7  ;;  %v3432_v19 = vpack.c.bf16 %v3424_v40, %v3423_v2 }
 0x558   : > { %3531 = vst.msk [vmem:[%s6285_s7 + $0x20] sm:$0xff] %vm3526_vm10, %v3497_v50  ;;  %3756 = vmatmul.msk.bf16.gmra.mxu3 %vm3448_vm5, %v3432_v19 }
 0x55d   : > { %v3498_v60 = vpop.f32.mrf.mxu1 }
 0x55e   : > { %v3499_v5 = vadd.f32 %v3498_v60, %v6280_v7 }
 0x560   : > { %3532 = vst.msk [vmem:[%s6285_s7 + $0x28] sm:$0xff] %vm3526_vm10, %v3499_v5 }
 0x579   : > { %v3516_v34 = vpop.f32.mrf.mxu3 }
 0x57a   : > { %v3517_v25 = vadd.f32 %v3516_v34, %v6280_v7 }
 0x57c   : > { %3539 = vst.msk [vmem:[%s6285_s7 + $0x60] sm:$0xff] %vm3526_vm10, %v3517_v25 }
 0x581   : > { %v3518_v17 = vpop.f32.mrf.mxu3 }
 0x582   : > { %v3519_v24 = vadd.f32 %v3518_v17, %v6280_v7 }
 0x584   : > { %3540 = vst.msk [vmem:[%s6285_s7 + $0x68] sm:$0xff] %vm3526_vm10, %v3519_v24 }
 0x5bd   : > { %v3501_v27 = vpop.f32.mrf.mxu1 }
 0x5be   : > { %v3502_v55 = vadd.f32 %v3501_v27, %v6280_v7 }
 0x5c0   : > { %3533 = vst.msk [vmem:[%s6285_s7 + $0x30] sm:$0xff] %vm3526_vm10, %v3502_v55 }
 0x5c5   : > { %v3503_v44 = vpop.f32.mrf.mxu1 }
 0x5c6   : > { %v3504_v58 = vadd.f32 %v3503_v44, %v6280_v7 }
 0x5c8   : > { %3534 = vst.msk [vmem:[%s6285_s7 + $0x38] sm:$0xff] %vm3526_vm10, %v3504_v58 }
 0x5cd   : > { %v3506_v23 = vpop.f32.mrf.mxu1 }
 0x5ce   : > { %v3507_v9 = vadd.f32 %v3506_v23, %v6280_v7 }
 0x5d0   : > { %3535 = vst.msk [vmem:[%s6285_s7 + $0x40] sm:$0xff] %vm3526_vm10, %v3507_v9 }
 0x5d5   : > { %v3508_v16 = vpop.f32.mrf.mxu1 }
 0x5d6   : > { %v3509_v36 = vadd.f32 %v3508_v16, %v6280_v7 }
 0x5d8   : > { %3536 = vst.msk [vmem:[%s6285_s7 + $0x48] sm:$0xff] %vm3526_vm10, %v3509_v36 }
 0x5db   : > { %v3521_v57 = vpop.f32.mrf.mxu3 }
 0x5dc   : > { %v3522_v52 = vadd.f32 %v3521_v57, %v6280_v7 }
 0x5de   : > { %3541 = vst.msk [vmem:[%s6285_s7 + $0x70] sm:$0xff] %vm3526_vm10, %v3522_v52 }
 0x5e3   : > { %v3523_v49 = vpop.f32.mrf.mxu3 }
 0x5e4   : > { %v3524_v43 = vadd.f32 %v3523_v49, %v6280_v7 }
 0x5e6   : > { %3542 = vst.msk [vmem:[%s6285_s7 + $0x78] sm:$0xff] %vm3526_vm10, %v3524_v43 }
 0x5e7 PF: > { %s14_s19 = sadd.s32 1, %s3929_s19   ;;  %s6936_s15 = smov %s3921_s17 }
 0x5e8   : > { %p11_p7 = scmp.ge.s32.totalorder %s14_s19, 6   ;;  %s6937_s16 = smov %s3925_s18 }
 0x5e9   : > { %s6938_s17 = smov %s6941_s20  ;;  %s6939_s18 = smov %s6945_s21 }
 0x5ea   :  { %13 = sbr.rel (!%p11_p7) target bundleno = 3 (0x3), region = 67 }

</bundles_post_ra>
